<compile_context>
chip_gen: v7x
topology: tpu7x:2x2x1
jax: 0.10.0
libtpu: 0.0.40
codegen_flags: <defaults>
</compile_context>

<pallas_src>
import functools

import jax
import jax.numpy as jnp
import numpy as np
from jax import lax
from jax.experimental import pallas as pl
from jax.experimental.pallas import tpu as pltpu

_EPS = 1e-5                        # nn.BatchNorm2d default eps
_PREC = lax.Precision.HIGHEST      # used only by the pure-JAX reference
_CPAD = 128                        # lane-dense channel padding (Cin and Cout)
_TILE = 128                        # row tile: (128,128) f32 accumulator = 16 vregs
_ALIGN = 16                        # sublane alignment (bf16 packing granularity)


def _round_up(x, m):
    return (x + m - 1) // m * m


def _basic_block_kernel(cfg, has_proj, *refs):
    """Whole BasicBlock forward; batch + spatial flattened into matmul rows."""
    Wp, r0, TILE, num_tiles, Lr_pad, inv_count = cfg
    if has_proj:
        (mask_ref, xpf_ref, w1_ref, g1_ref, b1_ref, w2_ref, g2_ref, b2_ref,
         ws_ref, gs_ref, bs_ref, out_ref, y_ref, h1p_ref, sc_ref) = refs
    else:
        (mask_ref, xpf_ref, w1_ref, g1_ref, b1_ref, w2_ref, g2_ref, b2_ref,
         out_ref, y_ref, h1p_ref) = refs
        ws_ref = gs_ref = bs_ref = sc_ref = None

    C = xpf_ref.shape[-1]
    R_total = h1p_ref.shape[0]
    EXT = TILE + r0 + Wp + 1           # extended tile rows covering all 9 taps
    zero_s = jnp.zeros((1, C), jnp.float32)

    def conv3x3(ext_b, w_ref):
        """(TILE,C) 3x3 conv: 9 accumulated MXU matmuls; taps are STATIC slices
        of the in-register extended tile (one aligned VMEM load per tile)."""
        acc = jnp.zeros((TILE, C), jnp.float32)
        for kh in range(3):
            for kw in range(3):
                off = r0 + (kh - 1) * Wp + (kw - 1)          # static offset
                acc = acc + jnp.dot(ext_b[off:off + TILE, :], w_ref[kh * 3 + kw],
                                    preferred_element_type=jnp.float32)
        return acc

    def bn_coeffs(s1, s2, g, b):
        mean = s1 * inv_count
        # TODO(synk): one-pass E[x^2]-E[x]^2 is cancellation-prone when
        # |mean| >> std; switch to a shifted/two-pass form if that regime matters.
        var = jnp.maximum(s2 * inv_count - mean * mean, 0.0)
        scale = lax.rsqrt(var + _EPS) * g
        return scale, b - mean * scale

    # ---- pass 1: conv1 (+ 1x1 shortcut conv) per row tile; fused BN sums ----
    def p1_body(t, carry):
        base = pl.multiple_of(t * TILE, TILE)                # 16-aligned start
        ext_b = xpf_ref[pl.ds(base, EXT), :].astype(jnp.bfloat16)
        m = mask_ref[pl.ds(base, TILE), :]                   # (TILE,1) lane-bcast
        y1 = conv3x3(ext_b, w1_ref)                          # f32, vreg-resident
        y_ref[pl.ds(base, TILE), :] = y1
        ym = y1 * m
        s1 = carry[0] + jnp.sum(ym, axis=0, keepdims=True)
        s2 = carry[1] + jnp.sum(ym * y1, axis=0, keepdims=True)
        if has_proj:
            sc = jnp.dot(ext_b[r0:r0 + TILE, :], ws_ref[...],
                         preferred_element_type=jnp.float32)
            sc_ref[pl.ds(base, TILE), :] = sc
            # xpf is exactly zero on every non-valid row -> no masking needed.
            s1s = carry[2] + jnp.sum(sc, axis=0, keepdims=True)
            s2s = carry[3] + jnp.sum(sc * sc, axis=0, keepdims=True)
            return s1, s2, s1s, s2s
        return s1, s2

    if has_proj:
        s1_1, s2_1, s1_s, s2_s = lax.fori_loop(
            0, num_tiles, p1_body, (zero_s, zero_s, zero_s, zero_s))
    else:
        s1_1, s2_1 = lax.fori_loop(0, num_tiles, p1_body, (zero_s, zero_s))
    scale1, shift1 = bn_coeffs(s1_1, s2_1, g1_ref[...], b1_ref[...])

    # ---- pass 2a: bn1 + relu + mask, re-padded into h1p (conv2 input) -------
    h1p_ref[pl.ds(0, r0), :] = jnp.zeros((r0, C), h1p_ref.dtype)
    tail = R_total - (r0 + Lr_pad)
    h1p_ref[pl.ds(r0 + Lr_pad, tail), :] = jnp.zeros((tail, C), h1p_ref.dtype)

    def p2a_body(t, carry):
        base = pl.multiple_of(t * TILE, TILE)
        m = mask_ref[pl.ds(base, TILE), :]
        h1 = jnp.maximum(y_ref[pl.ds(base, TILE), :] * scale1 + shift1, 0.0) * m
        dst = pl.multiple_of(r0 + base, _ALIGN)
        h1p_ref[pl.ds(dst, TILE), :] = h1.astype(h1p_ref.dtype)
        return carry

    lax.fori_loop(0, num_tiles, p2a_body, 0)

    # ---- pass 2b: conv2 per row tile; fused BN sums; y scratch reused -------
    def p2b_body(t, carry):
        base = pl.multiple_of(t * TILE, TILE)
        y2 = conv3x3(h1p_ref[pl.ds(base, EXT), :], w2_ref)   # bf16 ext already
        y_ref[pl.ds(base, TILE), :] = y2
        m = mask_ref[pl.ds(base, TILE), :]
        ym = y2 * m
        return (carry[0] + jnp.sum(ym, axis=0, keepdims=True),
                carry[1] + jnp.sum(ym * y2, axis=0, keepdims=True))

    s1_2, s2_2 = lax.fori_loop(0, num_tiles, p2b_body, (zero_s, zero_s))
    scale2, shift2 = bn_coeffs(s1_2, s2_2, g2_ref[...], b2_ref[...])
    if has_proj:
        scale_s, shift_s = bn_coeffs(s1_s, s2_s, gs_ref[...], bs_ref[...])

    # ---- pass 3: bn2 + shortcut + relu -> compact lane-dense output ---------
    def p3_body(t, carry):
        base = pl.multiple_of(t * TILE, TILE)
        h2 = y_ref[pl.ds(base, TILE), :] * scale2 + shift2
        if has_proj:
            sc = sc_ref[pl.ds(base, TILE), :] * scale_s + shift_s
        else:
            src = pl.multiple_of(r0 + base, _ALIGN)
            sc = xpf_ref[pl.ds(src, TILE), :]                # f32 identity path
        out_ref[pl.ds(base, TILE), :] = jnp.maximum(h2 + sc, 0.0
                                                    ).astype(out_ref.dtype)
        return carry

    lax.fori_loop(0, num_tiles, p3_body, 0)


def basic_block_forward(x_nchw, params, stride=1):
    """Wrapper: NCHW in / NCHW out, calls the Pallas kernel on a flattened layout."""
    if stride != 1:
        # TODO(synk): strided (downsampling) conv1 / strided 1x1 shortcut not implemented.
        raise NotImplementedError("stride > 1 not supported by this kernel")

    N, Cin, H, W = x_nchw.shape
    Cout = params["w1"].shape[-1]
    has_proj = (Cin != Cout)
    Hp, Wp = H + 2, W + 2
    C = _CPAD
    TILE = _TILE
    assert Cin <= C and Cout <= C, "channel counts above 128 need channel tiling"
    # TODO(synk): tile channels (256-wide K/N) for real ResNet stages on v6e/v7x.

    # Geometry: `front` keeps every extended-tile load, h1p store and shortcut
    # load 16-row aligned; r0 is the xpf row of the first compute-window pixel.
    front = (-(Wp + 1)) % _ALIGN
    r0 = front + Wp + 1
    R_core = N * Hp * Wp
    Lr_need = (N - 1) * Hp * Wp + (H - 1) * Wp + W
    Lr_pad = _round_up(Lr_need, TILE)
    num_tiles = Lr_pad // TILE
    R_total = _round_up(front + max(R_core, Lr_pad + 2 * (Wp + 1)), _ALIGN)

    # NCHW -> NHWC -> pad spatial ring + channel lanes -> flatten -> row pad.
    # x stays f32 (identity shortcut adds full-precision activations); only the
    # conv operands are cast to bf16 inside the kernel.
    # TODO(synk): keep NHWC end-to-end in the surrounding model and fold the pad
    # ring into a tiled grid index_map to drop these wrapper HBM passes.
    x_nhwc = jnp.transpose(x_nchw, (0, 2, 3, 1)).astype(jnp.float32)
    xp = jnp.pad(x_nhwc, ((0, 0), (1, 1), (1, 1), (0, C - Cin)))
    xpf = jnp.pad(xp.reshape(R_core, C),
                  ((front, R_total - front - R_core), (0, 0)))

    # Valid-pixel mask (Lr_pad, 1): lane-broadcast in-kernel, no (Lr, C) slab.
    rel = np.arange(Lr_pad) + (Wp + 1)
    within = rel % (Hp * Wp)
    r, c = within // Wp, within % Wp
    valid = (rel < R_core) & (r >= 1) & (r <= H) & (c >= 1) & (c <= W)
    mask = jnp.asarray(valid.astype(np.float32)[:, None])

    def pad_w3(w):    # (9, Cin_, Cout_) -> (9, C, C) bf16
        return jnp.pad(w, ((0, 0), (0, C - w.shape[1]), (0, C - w.shape[2]))
                       ).astype(jnp.bfloat16)

    def pad_vec(v):   # (1, Cout_) -> (1, C) f32
        return jnp.pad(v, ((0, 0), (0, C - v.shape[1])))

    args = [mask, xpf,
            pad_w3(params["w1"]), pad_vec(params["g1"]), pad_vec(params["b1"]),
            pad_w3(params["w2"]), pad_vec(params["g2"]), pad_vec(params["b2"])]
    scratch = [pltpu.VMEM((Lr_pad, C), jnp.float32),     # raw conv outputs (reused)
               pltpu.VMEM((R_total, C), jnp.bfloat16)]   # re-padded bn1 output
    if has_proj:
        ws = jnp.pad(params["ws"], ((0, C - Cin), (0, C - Cout))).astype(jnp.bfloat16)
        args += [ws, pad_vec(params["gs"]), pad_vec(params["bs"])]
        scratch.append(pltpu.VMEM((Lr_pad, C), jnp.float32))  # raw shortcut conv

    # Derive the VMEM budget from the actual resident footprint (+ headroom).
    vmem_bytes = (R_total * C * 4            # xpf (f32)
                  + Lr_pad * 128 * 4         # mask (lane-padded in VMEM)
                  + Lr_pad * C * 4           # output (f32, compact)
                  + Lr_pad * C * 4           # y scratch (f32)
                  + R_total * C * 2          # h1p scratch (bf16)
                  + (Lr_pad * C * 4 if has_proj else 0)
                  + 2 * 9 * C * C * 2 + 8 * 8 * C * 4)
    vmem_limit = int(min(max(2 * vmem_bytes, 32 << 20) + (8 << 20), 100 << 20))

    cfg = (Wp, r0, TILE, num_tiles, Lr_pad, 1.0 / float(N * H * W))
    out_flat = pl.pallas_call(
        functools.partial(_basic_block_kernel, cfg, has_proj),
        out_shape=jax.ShapeDtypeStruct((Lr_pad, C), jnp.float32),
        in_specs=[pl.BlockSpec(memory_space=pltpu.MemorySpace.VMEM)] * len(args),
        out_specs=pl.BlockSpec(memory_space=pltpu.MemorySpace.VMEM),
        scratch_shapes=scratch,
        compiler_params=pltpu.CompilerParams(vmem_limit_bytes=vmem_limit),
    )(*args)

    # window rows -> padded core rows -> crop pad ring & channels -> NCHW.
    out_core = jnp.pad(out_flat[:Lr_need],
                       ((Wp + 1, R_core - (Wp + 1) - Lr_need), (0, 0)))
    out = out_core.reshape(N, Hp, Wp, C)[:, 1:H + 1, 1:W + 1, :Cout]
    return jnp.transpose(out, (0, 3, 1, 2)).astype(x_nchw.dtype)


def init_basic_block_params(key, in_planes, planes):
    """Deterministic params matching BasicBlock.__init__ shapes (stride=1)."""
    k1, k2, k3 = jax.random.split(key, 3)

    def conv_weight(k, cout, cin, ksize):
        # PyTorch Conv2d default init (kaiming-uniform, a=sqrt(5)) bound.
        fan_in = cin * ksize * ksize
        bound = (1.0 / fan_in) ** 0.5
        w = jax.random.uniform(k, (cout, cin, ksize, ksize), jnp.float32,
                               minval=-bound, maxval=bound)       # OIHW like torch
        # OIHW -> tap-major (ksize*ksize, Cin, Cout) layout used by the kernel.
        return jnp.transpose(w, (2, 3, 1, 0)).reshape(ksize * ksize, cin, cout)

    params = {
        "w1": conv_weight(k1, planes, in_planes, 3),
        "g1": jnp.ones((1, planes), jnp.float32),     # BatchNorm2d weight init
        "b1": jnp.zeros((1, planes), jnp.float32),    # BatchNorm2d bias init
        "w2": conv_weight(k2, planes, planes, 3),
        "g2": jnp.ones((1, planes), jnp.float32),
        "b2": jnp.zeros((1, planes), jnp.float32),
    }
    if in_planes != planes:                            # projection shortcut
        params["ws"] = conv_weight(k3, planes, in_planes, 1).reshape(in_planes, planes)
        params["gs"] = jnp.ones((1, planes), jnp.float32)
        params["bs"] = jnp.zeros((1, planes), jnp.float32)
    return params


def _ref_forward(x_nchw, params):
    """Pure-JAX f32/HIGHEST reference of BasicBlock.forward (training-mode BN)."""
    x = jnp.transpose(x_nchw, (0, 2, 3, 1))
    Cin = x.shape[-1]
    Cout = params["w1"].shape[-1]

    def conv(h, w, ksize):
        w = w.reshape(ksize, ksize, -1, Cout)
        return jax.lax.conv_general_dilated(
            h, w, (1, 1), [(ksize // 2, ksize // 2)] * 2,
            dimension_numbers=("NHWC", "HWIO", "NHWC"), precision=_PREC)

    def bn(y, g, b):
        mean = jnp.mean(y, axis=(0, 1, 2), keepdims=True)
        var = jnp.mean(jnp.square(y - mean), axis=(0, 1, 2), keepdims=True)
        return (y - mean) * jax.lax.rsqrt(var + _EPS) * g.reshape(1, 1, 1, -1) \
            + b.reshape(1, 1, 1, -1)

    h = jax.nn.relu(bn(conv(x, params["w1"], 3), params["g1"], params["b1"]))
    h = bn(conv(h, params["w2"], 3), params["g2"], params["b2"])
    if Cin != Cout:
        sc = bn(jnp.einsum("nhwc,co->nhwo", x, params["ws"], precision=_PREC),
                params["gs"], params["bs"])
    else:
        sc = x
    out = jax.nn.relu(h + sc)
    return jnp.transpose(out, (0, 3, 1, 2))


if __name__ == "__main__":
    key = jax.random.PRNGKey(0)
    kx1, kp1, kx2, kp2 = jax.random.split(key, 4)

    # Kernel uses bf16 MXU operands (f32 accumulation); reference is f32/HIGHEST.
    TOL = dict(rtol=2e-2, atol=2e-2)

    # Config 1: in_planes=4, planes=8, stride=1 -> projection (1x1 conv + BN) shortcut.
    x1 = jax.random.normal(kx1, (2, 4, 16, 16), jnp.float32)     # NCHW like PyTorch
    p1 = init_basic_block_params(kp1, 4, 8)
    out1 = jax.jit(basic_block_forward)(x1, p1)
    jax.block_until_ready(out1)
    assert out1.shape == (2, 8, 16, 16)
    np.testing.assert_allclose(np.asarray(out1), np.asarray(_ref_forward(x1, p1)), **TOL)

    # Config 2: in_planes=planes=4, stride=1 -> identity shortcut.
    x2 = jax.random.normal(kx2, (2, 4, 16, 16), jnp.float32)
    p2 = init_basic_block_params(kp2, 4, 4)
    out2 = jax.jit(basic_block_forward)(x2, p2)
    jax.block_until_ready(out2)
    assert out2.shape == (2, 4, 16, 16)
    np.testing.assert_allclose(np.asarray(out2), np.asarray(_ref_forward(x2, p2)), **TOL)

    print("KERNEL_OK")
</pallas_src>

<mosaic_0001>
module attributes {stable_mosaic.version = 11 : i64} {
  func.func @_basic_block_kernel(%arg0: memref<640x1xf32, #tpu.memory_space<vmem>>, %arg1: memref<704x128xf32, #tpu.memory_space<vmem>>, %arg2: memref<9x128x128xbf16, #tpu.memory_space<vmem>>, %arg3: memref<1x128xf32, #tpu.memory_space<vmem>>, %arg4: memref<1x128xf32, #tpu.memory_space<vmem>>, %arg5: memref<9x128x128xbf16, #tpu.memory_space<vmem>>, %arg6: memref<1x128xf32, #tpu.memory_space<vmem>>, %arg7: memref<1x128xf32, #tpu.memory_space<vmem>>, %arg8: memref<128x128xbf16, #tpu.memory_space<vmem>>, %arg9: memref<1x128xf32, #tpu.memory_space<vmem>>, %arg10: memref<1x128xf32, #tpu.memory_space<vmem>>, %arg11: memref<640x128xf32, #tpu.memory_space<vmem>>, %arg12: memref<640x128xf32, #tpu.memory_space<vmem>>, %arg13: memref<704x128xbf16, #tpu.memory_space<vmem>>, %arg14: memref<640x128xf32, #tpu.memory_space<vmem>>) attributes {dimension_semantics = [], scalar_prefetch = 0 : i64, scratch_operands = 3 : i64, tpu.core_type = #tpu.core_type<tc>} {
    %cst = arith.constant 0.000000e+00 : f32
    %0 = vector.broadcast %cst : f32 to vector<1x128xf32>
    %c0_i32 = arith.constant 0 : i32
    %c5_i32 = arith.constant 5 : i32
    %1 = arith.addi %c0_i32, %c5_i32 : i32
    %c1_i32 = arith.constant 1 : i32
    %2:4 = scf.for %arg15 = %c0_i32 to %1 step %c1_i32 iter_args(%arg16 = %0, %arg17 = %0, %arg18 = %0, %arg19 = %0) -> (vector<1x128xf32>, vector<1x128xf32>, vector<1x128xf32>, vector<1x128xf32>)  : i32 {
      %c128_i32 = arith.constant 128 : i32
      %59 = arith.muli %arg15, %c128_i32 : i32
      %60 = tpu.assume_multiple %59, 128 : i32
      %61 = arith.index_cast %60 : i32 to index
      %c0_41 = arith.constant 0 : index
      %62 = vector.load %arg1[%61, %c0_41] : memref<704x128xf32, #tpu.memory_space<vmem>>, vector<179x128xf32>
      %63 = arith.truncf %62 : vector<179x128xf32> to vector<179x128xbf16>
      %64 = arith.index_cast %60 : i32 to index
      %c0_42 = arith.constant 0 : index
      %65 = vector.load %arg0[%64, %c0_42] : memref<640x1xf32, #tpu.memory_space<vmem>>, vector<128x1xf32>
      %cst_43 = arith.constant 0.000000e+00 : f32
      %66 = vector.broadcast %cst_43 : f32 to vector<128x128xf32>
      %67 = vector.extract_strided_slice %63 {offsets = [13, 0], sizes = [128, 128], strides = [1, 1]} : vector<179x128xbf16> to vector<128x128xbf16>
      %c0_44 = arith.constant 0 : index
      %c0_45 = arith.constant 0 : index
      %c0_46 = arith.constant 0 : index
      %68 = vector.load %arg2[%c0_44, %c0_45, %c0_46] : memref<9x128x128xbf16, #tpu.memory_space<vmem>>, vector<1x128x128xbf16>
      %69 = vector.shape_cast %68 : vector<1x128x128xbf16> to vector<128x128xbf16>
      %cst_47 = arith.constant dense<0.000000e+00> : vector<128x128xf32>
      %70 = tpu.matmul %67, %69, %cst_47 {dimension_numbers = #tpu.dot_dimension_numbers<[1], [0], [0], [1], [0, 0, 1, 1], [], []>} : vector<128x128xbf16>, vector<128x128xbf16>, vector<128x128xf32> -> vector<128x128xf32>
      %71 = arith.addf %66, %70 : vector<128x128xf32>
      %72 = vector.extract_strided_slice %63 {offsets = [14, 0], sizes = [128, 128], strides = [1, 1]} : vector<179x128xbf16> to vector<128x128xbf16>
      %c1 = arith.constant 1 : index
      %c0_48 = arith.constant 0 : index
      %c0_49 = arith.constant 0 : index
      %73 = vector.load %arg2[%c1, %c0_48, %c0_49] : memref<9x128x128xbf16, #tpu.memory_space<vmem>>, vector<1x128x128xbf16>
      %74 = vector.shape_cast %73 : vector<1x128x128xbf16> to vector<128x128xbf16>
      %cst_50 = arith.constant dense<0.000000e+00> : vector<128x128xf32>
      %75 = tpu.matmul %72, %74, %cst_50 {dimension_numbers = #tpu.dot_dimension_numbers<[1], [0], [0], [1], [0, 0, 1, 1], [], []>} : vector<128x128xbf16>, vector<128x128xbf16>, vector<128x128xf32> -> vector<128x128xf32>
      %76 = arith.addf %71, %75 : vector<128x128xf32>
      %77 = vector.extract_strided_slice %63 {offsets = [15, 0], sizes = [128, 128], strides = [1, 1]} : vector<179x128xbf16> to vector<128x128xbf16>
      %c2 = arith.constant 2 : index
      %c0_51 = arith.constant 0 : index
      %c0_52 = arith.constant 0 : index
      %78 = vector.load %arg2[%c2, %c0_51, %c0_52] : memref<9x128x128xbf16, #tpu.memory_space<vmem>>, vector<1x128x128xbf16>
      %79 = vector.shape_cast %78 : vector<1x128x128xbf16> to vector<128x128xbf16>
      %cst_53 = arith.constant dense<0.000000e+00> : vector<128x128xf32>
      %80 = tpu.matmul %77, %79, %cst_53 {dimension_numbers = #tpu.dot_dimension_numbers<[1], [0], [0], [1], [0, 0, 1, 1], [], []>} : vector<128x128xbf16>, vector<128x128xbf16>, vector<128x128xf32> -> vector<128x128xf32>
      %81 = arith.addf %76, %80 : vector<128x128xf32>
      %82 = vector.extract_strided_slice %63 {offsets = [31, 0], sizes = [128, 128], strides = [1, 1]} : vector<179x128xbf16> to vector<128x128xbf16>
      %c3 = arith.constant 3 : index
      %c0_54 = arith.constant 0 : index
      %c0_55 = arith.constant 0 : index
      %83 = vector.load %arg2[%c3, %c0_54, %c0_55] : memref<9x128x128xbf16, #tpu.memory_space<vmem>>, vector<1x128x128xbf16>
      %84 = vector.shape_cast %83 : vector<1x128x128xbf16> to vector<128x128xbf16>
      %cst_56 = arith.constant dense<0.000000e+00> : vector<128x128xf32>
      %85 = tpu.matmul %82, %84, %cst_56 {dimension_numbers = #tpu.dot_dimension_numbers<[1], [0], [0], [1], [0, 0, 1, 1], [], []>} : vector<128x128xbf16>, vector<128x128xbf16>, vector<128x128xf32> -> vector<128x128xf32>
      %86 = arith.addf %81, %85 : vector<128x128xf32>
      %87 = vector.extract_strided_slice %63 {offsets = [32, 0], sizes = [128, 128], strides = [1, 1]} : vector<179x128xbf16> to vector<128x128xbf16>
      %c4 = arith.constant 4 : index
      %c0_57 = arith.constant 0 : index
      %c0_58 = arith.constant 0 : index
      %88 = vector.load %arg2[%c4, %c0_57, %c0_58] : memref<9x128x128xbf16, #tpu.memory_space<vmem>>, vector<1x128x128xbf16>
      %89 = vector.shape_cast %88 : vector<1x128x128xbf16> to vector<128x128xbf16>
      %cst_59 = arith.constant dense<0.000000e+00> : vector<128x128xf32>
      %90 = tpu.matmul %87, %89, %cst_59 {dimension_numbers = #tpu.dot_dimension_numbers<[1], [0], [0], [1], [0, 0, 1, 1], [], []>} : vector<128x128xbf16>, vector<128x128xbf16>, vector<128x128xf32> -> vector<128x128xf32>
      %91 = arith.addf %86, %90 : vector<128x128xf32>
      %92 = vector.extract_strided_slice %63 {offsets = [33, 0], sizes = [128, 128], strides = [1, 1]} : vector<179x128xbf16> to vector<128x128xbf16>
      %c5 = arith.constant 5 : index
      %c0_60 = arith.constant 0 : index
      %c0_61 = arith.constant 0 : index
      %93 = vector.load %arg2[%c5, %c0_60, %c0_61] : memref<9x128x128xbf16, #tpu.memory_space<vmem>>, vector<1x128x128xbf16>
      %94 = vector.shape_cast %93 : vector<1x128x128xbf16> to vector<128x128xbf16>
      %cst_62 = arith.constant dense<0.000000e+00> : vector<128x128xf32>
      %95 = tpu.matmul %92, %94, %cst_62 {dimension_numbers = #tpu.dot_dimension_numbers<[1], [0], [0], [1], [0, 0, 1, 1], [], []>} : vector<128x128xbf16>, vector<128x128xbf16>, vector<128x128xf32> -> vector<128x128xf32>
      %96 = arith.addf %91, %95 : vector<128x128xf32>
      %97 = vector.extract_strided_slice %63 {offsets = [49, 0], sizes = [128, 128], strides = [1, 1]} : vector<179x128xbf16> to vector<128x128xbf16>
      %c6 = arith.constant 6 : index
      %c0_63 = arith.constant 0 : index
      %c0_64 = arith.constant 0 : index
      %98 = vector.load %arg2[%c6, %c0_63, %c0_64] : memref<9x128x128xbf16, #tpu.memory_space<vmem>>, vector<1x128x128xbf16>
      %99 = vector.shape_cast %98 : vector<1x128x128xbf16> to vector<128x128xbf16>
      %cst_65 = arith.constant dense<0.000000e+00> : vector<128x128xf32>
      %100 = tpu.matmul %97, %99, %cst_65 {dimension_numbers = #tpu.dot_dimension_numbers<[1], [0], [0], [1], [0, 0, 1, 1], [], []>} : vector<128x128xbf16>, vector<128x128xbf16>, vector<128x128xf32> -> vector<128x128xf32>
      %101 = arith.addf %96, %100 : vector<128x128xf32>
      %102 = vector.extract_strided_slice %63 {offsets = [50, 0], sizes = [128, 128], strides = [1, 1]} : vector<179x128xbf16> to vector<128x128xbf16>
      %c7 = arith.constant 7 : index
      %c0_66 = arith.constant 0 : index
      %c0_67 = arith.constant 0 : index
      %103 = vector.load %arg2[%c7, %c0_66, %c0_67] : memref<9x128x128xbf16, #tpu.memory_space<vmem>>, vector<1x128x128xbf16>
      %104 = vector.shape_cast %103 : vector<1x128x128xbf16> to vector<128x128xbf16>
      %cst_68 = arith.constant dense<0.000000e+00> : vector<128x128xf32>
      %105 = tpu.matmul %102, %104, %cst_68 {dimension_numbers = #tpu.dot_dimension_numbers<[1], [0], [0], [1], [0, 0, 1, 1], [], []>} : vector<128x128xbf16>, vector<128x128xbf16>, vector<128x128xf32> -> vector<128x128xf32>
      %106 = arith.addf %101, %105 : vector<128x128xf32>
      %107 = vector.extract_strided_slice %63 {offsets = [51, 0], sizes = [128, 128], strides = [1, 1]} : vector<179x128xbf16> to vector<128x128xbf16>
      %c8 = arith.constant 8 : index
      %c0_69 = arith.constant 0 : index
      %c0_70 = arith.constant 0 : index
      %108 = vector.load %arg2[%c8, %c0_69, %c0_70] : memref<9x128x128xbf16, #tpu.memory_space<vmem>>, vector<1x128x128xbf16>
      %109 = vector.shape_cast %108 : vector<1x128x128xbf16> to vector<128x128xbf16>
      %cst_71 = arith.constant dense<0.000000e+00> : vector<128x128xf32>
      %110 = tpu.matmul %107, %109, %cst_71 {dimension_numbers = #tpu.dot_dimension_numbers<[1], [0], [0], [1], [0, 0, 1, 1], [], []>} : vector<128x128xbf16>, vector<128x128xbf16>, vector<128x128xf32> -> vector<128x128xf32>
      %111 = arith.addf %106, %110 : vector<128x128xf32>
      %112 = arith.index_cast %60 : i32 to index
      %c0_72 = arith.constant 0 : index
      %113 = vector.load %arg12[%112, %c0_72] : memref<640x128xf32, #tpu.memory_space<vmem>>, vector<128x128xf32>
      tpu.vector_store %arg12[%112, %c0_72], %111 {strides = array<i32>} : memref<640x128xf32, #tpu.memory_space<vmem>>, vector<128x128xf32>,
      %114 = vector.broadcast %65 : vector<128x1xf32> to vector<128x128xf32>
      %115 = arith.mulf %111, %114 : vector<128x128xf32>
      %cst_73 = arith.constant dense<0.000000e+00> : vector<128xf32>
      %116 = vector.multi_reduction <add>, %115, %cst_73 [0] : vector<128x128xf32> to vector<128xf32>
      %117 = vector.shape_cast %116 : vector<128xf32> to vector<1x128xf32>
      %118 = arith.addf %arg16, %117 : vector<1x128xf32>
      %119 = arith.mulf %115, %111 : vector<128x128xf32>
      %cst_74 = arith.constant dense<0.000000e+00> : vector<128xf32>
      %120 = vector.multi_reduction <add>, %119, %cst_74 [0] : vector<128x128xf32> to vector<128xf32>
      %121 = vector.shape_cast %120 : vector<128xf32> to vector<1x128xf32>
      %122 = arith.addf %arg17, %121 : vector<1x128xf32>
      %123 = vector.extract_strided_slice %63 {offsets = [32, 0], sizes = [128, 128], strides = [1, 1]} : vector<179x128xbf16> to vector<128x128xbf16>
      %c0_75 = arith.constant 0 : index
      %c0_76 = arith.constant 0 : index
      %124 = vector.load %arg8[%c0_75, %c0_76] : memref<128x128xbf16, #tpu.memory_space<vmem>>, vector<128x128xbf16>
      %cst_77 = arith.constant dense<0.000000e+00> : vector<128x128xf32>
      %125 = tpu.matmul %123, %124, %cst_77 {dimension_numbers = #tpu.dot_dimension_numbers<[1], [0], [0], [1], [0, 0, 1, 1], [], []>} : vector<128x128xbf16>, vector<128x128xbf16>, vector<128x128xf32> -> vector<128x128xf32>
      %126 = arith.index_cast %60 : i32 to index
      %c0_78 = arith.constant 0 : index
      %127 = vector.load %arg14[%126, %c0_78] : memref<640x128xf32, #tpu.memory_space<vmem>>, vector<128x128xf32>
      tpu.vector_store %arg14[%126, %c0_78], %125 {strides = array<i32>} : memref<640x128xf32, #tpu.memory_space<vmem>>, vector<128x128xf32>,
      %cst_79 = arith.constant dense<0.000000e+00> : vector<128xf32>
      %128 = vector.multi_reduction <add>, %125, %cst_79 [0] : vector<128x128xf32> to vector<128xf32>
      %129 = vector.shape_cast %128 : vector<128xf32> to vector<1x128xf32>
      %130 = arith.addf %arg18, %129 : vector<1x128xf32>
      %131 = arith.mulf %125, %125 : vector<128x128xf32>
      %cst_80 = arith.constant dense<0.000000e+00> : vector<128xf32>
      %132 = vector.multi_reduction <add>, %131, %cst_80 [0] : vector<128x128xf32> to vector<128xf32>
      %133 = vector.shape_cast %132 : vector<128xf32> to vector<1x128xf32>
      %134 = arith.addf %arg19, %133 : vector<1x128xf32>
      scf.yield %118, %122, %130, %134 : vector<1x128xf32>, vector<1x128xf32>, vector<1x128xf32>, vector<1x128xf32>
    }
    %c5_i32_0 = arith.constant 5 : i32
    %c0 = arith.constant 0 : index
    %c0_1 = arith.constant 0 : index
    %3 = vector.load %arg3[%c0, %c0_1] : memref<1x128xf32, #tpu.memory_space<vmem>>, vector<1x128xf32>
    %c0_2 = arith.constant 0 : index
    %c0_3 = arith.constant 0 : index
    %4 = vector.load %arg4[%c0_2, %c0_3] : memref<1x128xf32, #tpu.memory_space<vmem>>, vector<1x128xf32>
    %cst_4 = arith.constant 0.001953125 : f32
    %5 = vector.broadcast %cst_4 : f32 to vector<1x128xf32>
    %6 = arith.mulf %2#0, %5 : vector<1x128xf32>
    %cst_5 = arith.constant 0.001953125 : f32
    %7 = vector.broadcast %cst_5 : f32 to vector<1x128xf32>
    %8 = arith.mulf %2#1, %7 : vector<1x128xf32>
    %9 = arith.mulf %6, %6 : vector<1x128xf32>
    %10 = arith.subf %8, %9 : vector<1x128xf32>
    %cst_6 = arith.constant 0.000000e+00 : f32
    %11 = vector.broadcast %cst_6 : f32 to vector<1x128xf32>
    %12 = arith.maximumf %10, %11 : vector<1x128xf32>
    %cst_7 = arith.constant 9.99999974E-6 : f32
    %13 = vector.broadcast %cst_7 : f32 to vector<1x128xf32>
    %14 = arith.addf %12, %13 : vector<1x128xf32>
    %15 = math.rsqrt %14 : vector<1x128xf32>
    %16 = arith.mulf %15, %3 : vector<1x128xf32>
    %17 = arith.mulf %6, %16 : vector<1x128xf32>
    %18 = arith.subf %4, %17 : vector<1x128xf32>
    %cst_8 = arith.constant 0.000000e+00 : bf16
    %19 = vector.broadcast %cst_8 : bf16 to vector<32x128xbf16>
    %c0_9 = arith.constant 0 : index
    %c0_10 = arith.constant 0 : index
    %20 = vector.load %arg13[%c0_9, %c0_10] : memref<704x128xbf16, #tpu.memory_space<vmem>>, vector<32x128xbf16>
    tpu.vector_store %arg13[%c0_9, %c0_10], %19 {strides = array<i32>} : memref<704x128xbf16, #tpu.memory_space<vmem>>, vector<32x128xbf16>,
    %cst_11 = arith.constant 0.000000e+00 : bf16
    %21 = vector.broadcast %cst_11 : bf16 to vector<32x128xbf16>
    %c672 = arith.constant 672 : index
    %c0_12 = arith.constant 0 : index
    %22 = vector.load %arg13[%c672, %c0_12] : memref<704x128xbf16, #tpu.memory_space<vmem>>, vector<32x128xbf16>
    tpu.vector_store %arg13[%c672, %c0_12], %21 {strides = array<i32>} : memref<704x128xbf16, #tpu.memory_space<vmem>>, vector<32x128xbf16>,
    %c0_i32_13 = arith.constant 0 : i32
    %c5_i32_14 = arith.constant 5 : i32
    %23 = arith.addi %c0_i32_13, %c5_i32_14 : i32
    %c1_i32_15 = arith.constant 1 : i32
    scf.for %arg15 = %c0_i32_13 to %23 step %c1_i32_15  : i32 {
      %c128_i32 = arith.constant 128 : i32
      %59 = arith.muli %arg15, %c128_i32 : i32
      %60 = tpu.assume_multiple %59, 128 : i32
      %61 = arith.index_cast %60 : i32 to index
      %c0_41 = arith.constant 0 : index
      %62 = vector.load %arg0[%61, %c0_41] : memref<640x1xf32, #tpu.memory_space<vmem>>, vector<128x1xf32>
      %63 = arith.index_cast %60 : i32 to index
      %c0_42 = arith.constant 0 : index
      %64 = vector.load %arg12[%63, %c0_42] : memref<640x128xf32, #tpu.memory_space<vmem>>, vector<128x128xf32>
      %65 = vector.broadcast %16 : vector<1x128xf32> to vector<128x128xf32>
      %66 = arith.mulf %64, %65 : vector<128x128xf32>
      %67 = vector.broadcast %18 : vector<1x128xf32> to vector<128x128xf32>
      %68 = arith.addf %66, %67 : vector<128x128xf32>
      %cst_43 = arith.constant 0.000000e+00 : f32
      %69 = vector.broadcast %cst_43 : f32 to vector<128x128xf32>
      %70 = arith.maximumf %68, %69 : vector<128x128xf32>
      %71 = vector.broadcast %62 : vector<128x1xf32> to vector<128x128xf32>
      %72 = arith.mulf %70, %71 : vector<128x128xf32>
      %c32_i32 = arith.constant 32 : i32
      %73 = arith.addi %c32_i32, %60 : i32
      %74 = tpu.assume_multiple %73, 16 : i32
      %75 = arith.truncf %72 : vector<128x128xf32> to vector<128x128xbf16>
      %76 = arith.index_cast %74 : i32 to index
      %c0_44 = arith.constant 0 : index
      %77 = vector.load %arg13[%76, %c0_44] : memref<704x128xbf16, #tpu.memory_space<vmem>>, vector<128x128xbf16>
      tpu.vector_store %arg13[%76, %c0_44], %75 {strides = array<i32>} : memref<704x128xbf16, #tpu.memory_space<vmem>>, vector<128x128xbf16>,
    }
    %c5_i32_16 = arith.constant 5 : i32
    %c0_i32_17 = arith.constant 0 : i32
    %c5_i32_18 = arith.constant 5 : i32
    %24 = arith.addi %c0_i32_17, %c5_i32_18 : i32
    %c1_i32_19 = arith.constant 1 : i32
    %25:2 = scf.for %arg15 = %c0_i32_17 to %24 step %c1_i32_19 iter_args(%arg16 = %0, %arg17 = %0) -> (vector<1x128xf32>, vector<1x128xf32>)  : i32 {
      %c128_i32 = arith.constant 128 : i32
      %59 = arith.muli %arg15, %c128_i32 : i32
      %60 = tpu.assume_multiple %59, 128 : i32
      %61 = arith.index_cast %60 : i32 to index
      %c0_41 = arith.constant 0 : index
      %62 = vector.load %arg13[%61, %c0_41] : memref<704x128xbf16, #tpu.memory_space<vmem>>, vector<179x128xbf16>
      %cst_42 = arith.constant 0.000000e+00 : f32
      %63 = vector.broadcast %cst_42 : f32 to vector<128x128xf32>
      %64 = vector.extract_strided_slice %62 {offsets = [13, 0], sizes = [128, 128], strides = [1, 1]} : vector<179x128xbf16> to vector<128x128xbf16>
      %c0_43 = arith.constant 0 : index
      %c0_44 = arith.constant 0 : index
      %c0_45 = arith.constant 0 : index
      %65 = vector.load %arg5[%c0_43, %c0_44, %c0_45] : memref<9x128x128xbf16, #tpu.memory_space<vmem>>, vector<1x128x128xbf16>
      %66 = vector.shape_cast %65 : vector<1x128x128xbf16> to vector<128x128xbf16>
      %cst_46 = arith.constant dense<0.000000e+00> : vector<128x128xf32>
      %67 = tpu.matmul %64, %66, %cst_46 {dimension_numbers = #tpu.dot_dimension_numbers<[1], [0], [0], [1], [0, 0, 1, 1], [], []>} : vector<128x128xbf16>, vector<128x128xbf16>, vector<128x128xf32> -> vector<128x128xf32>
      %68 = arith.addf %63, %67 : vector<128x128xf32>
      %69 = vector.extract_strided_slice %62 {offsets = [14, 0], sizes = [128, 128], strides = [1, 1]} : vector<179x128xbf16> to vector<128x128xbf16>
      %c1 = arith.constant 1 : index
      %c0_47 = arith.constant 0 : index
      %c0_48 = arith.constant 0 : index
      %70 = vector.load %arg5[%c1, %c0_47, %c0_48] : memref<9x128x128xbf16, #tpu.memory_space<vmem>>, vector<1x128x128xbf16>
      %71 = vector.shape_cast %70 : vector<1x128x128xbf16> to vector<128x128xbf16>
      %cst_49 = arith.constant dense<0.000000e+00> : vector<128x128xf32>
      %72 = tpu.matmul %69, %71, %cst_49 {dimension_numbers = #tpu.dot_dimension_numbers<[1], [0], [0], [1], [0, 0, 1, 1], [], []>} : vector<128x128xbf16>, vector<128x128xbf16>, vector<128x128xf32> -> vector<128x128xf32>
      %73 = arith.addf %68, %72 : vector<128x128xf32>
      %74 = vector.extract_strided_slice %62 {offsets = [15, 0], sizes = [128, 128], strides = [1, 1]} : vector<179x128xbf16> to vector<128x128xbf16>
      %c2 = arith.constant 2 : index
      %c0_50 = arith.constant 0 : index
      %c0_51 = arith.constant 0 : index
      %75 = vector.load %arg5[%c2, %c0_50, %c0_51] : memref<9x128x128xbf16, #tpu.memory_space<vmem>>, vector<1x128x128xbf16>
      %76 = vector.shape_cast %75 : vector<1x128x128xbf16> to vector<128x128xbf16>
      %cst_52 = arith.constant dense<0.000000e+00> : vector<128x128xf32>
      %77 = tpu.matmul %74, %76, %cst_52 {dimension_numbers = #tpu.dot_dimension_numbers<[1], [0], [0], [1], [0, 0, 1, 1], [], []>} : vector<128x128xbf16>, vector<128x128xbf16>, vector<128x128xf32> -> vector<128x128xf32>
      %78 = arith.addf %73, %77 : vector<128x128xf32>
      %79 = vector.extract_strided_slice %62 {offsets = [31, 0], sizes = [128, 128], strides = [1, 1]} : vector<179x128xbf16> to vector<128x128xbf16>
      %c3 = arith.constant 3 : index
      %c0_53 = arith.constant 0 : index
      %c0_54 = arith.constant 0 : index
      %80 = vector.load %arg5[%c3, %c0_53, %c0_54] : memref<9x128x128xbf16, #tpu.memory_space<vmem>>, vector<1x128x128xbf16>
      %81 = vector.shape_cast %80 : vector<1x128x128xbf16> to vector<128x128xbf16>
      %cst_55 = arith.constant dense<0.000000e+00> : vector<128x128xf32>
      %82 = tpu.matmul %79, %81, %cst_55 {dimension_numbers = #tpu.dot_dimension_numbers<[1], [0], [0], [1], [0, 0, 1, 1], [], []>} : vector<128x128xbf16>, vector<128x128xbf16>, vector<128x128xf32> -> vector<128x128xf32>
      %83 = arith.addf %78, %82 : vector<128x128xf32>
      %84 = vector.extract_strided_slice %62 {offsets = [32, 0], sizes = [128, 128], strides = [1, 1]} : vector<179x128xbf16> to vector<128x128xbf16>
      %c4 = arith.constant 4 : index
      %c0_56 = arith.constant 0 : index
      %c0_57 = arith.constant 0 : index
      %85 = vector.load %arg5[%c4, %c0_56, %c0_57] : memref<9x128x128xbf16, #tpu.memory_space<vmem>>, vector<1x128x128xbf16>
      %86 = vector.shape_cast %85 : vector<1x128x128xbf16> to vector<128x128xbf16>
      %cst_58 = arith.constant dense<0.000000e+00> : vector<128x128xf32>
      %87 = tpu.matmul %84, %86, %cst_58 {dimension_numbers = #tpu.dot_dimension_numbers<[1], [0], [0], [1], [0, 0, 1, 1], [], []>} : vector<128x128xbf16>, vector<128x128xbf16>, vector<128x128xf32> -> vector<128x128xf32>
      %88 = arith.addf %83, %87 : vector<128x128xf32>
      %89 = vector.extract_strided_slice %62 {offsets = [33, 0], sizes = [128, 128], strides = [1, 1]} : vector<179x128xbf16> to vector<128x128xbf16>
      %c5 = arith.constant 5 : index
      %c0_59 = arith.constant 0 : index
      %c0_60 = arith.constant 0 : index
      %90 = vector.load %arg5[%c5, %c0_59, %c0_60] : memref<9x128x128xbf16, #tpu.memory_space<vmem>>, vector<1x128x128xbf16>
      %91 = vector.shape_cast %90 : vector<1x128x128xbf16> to vector<128x128xbf16>
      %cst_61 = arith.constant dense<0.000000e+00> : vector<128x128xf32>
      %92 = tpu.matmul %89, %91, %cst_61 {dimension_numbers = #tpu.dot_dimension_numbers<[1], [0], [0], [1], [0, 0, 1, 1], [], []>} : vector<128x128xbf16>, vector<128x128xbf16>, vector<128x128xf32> -> vector<128x128xf32>
      %93 = arith.addf %88, %92 : vector<128x128xf32>
      %94 = vector.extract_strided_slice %62 {offsets = [49, 0], sizes = [128, 128], strides = [1, 1]} : vector<179x128xbf16> to vector<128x128xbf16>
      %c6 = arith.constant 6 : index
      %c0_62 = arith.constant 0 : index
      %c0_63 = arith.constant 0 : index
      %95 = vector.load %arg5[%c6, %c0_62, %c0_63] : memref<9x128x128xbf16, #tpu.memory_space<vmem>>, vector<1x128x128xbf16>
      %96 = vector.shape_cast %95 : vector<1x128x128xbf16> to vector<128x128xbf16>
      %cst_64 = arith.constant dense<0.000000e+00> : vector<128x128xf32>
      %97 = tpu.matmul %94, %96, %cst_64 {dimension_numbers = #tpu.dot_dimension_numbers<[1], [0], [0], [1], [0, 0, 1, 1], [], []>} : vector<128x128xbf16>, vector<128x128xbf16>, vector<128x128xf32> -> vector<128x128xf32>
      %98 = arith.addf %93, %97 : vector<128x128xf32>
      %99 = vector.extract_strided_slice %62 {offsets = [50, 0], sizes = [128, 128], strides = [1, 1]} : vector<179x128xbf16> to vector<128x128xbf16>
      %c7 = arith.constant 7 : index
      %c0_65 = arith.constant 0 : index
      %c0_66 = arith.constant 0 : index
      %100 = vector.load %arg5[%c7, %c0_65, %c0_66] : memref<9x128x128xbf16, #tpu.memory_space<vmem>>, vector<1x128x128xbf16>
      %101 = vector.shape_cast %100 : vector<1x128x128xbf16> to vector<128x128xbf16>
      %cst_67 = arith.constant dense<0.000000e+00> : vector<128x128xf32>
      %102 = tpu.matmul %99, %101, %cst_67 {dimension_numbers = #tpu.dot_dimension_numbers<[1], [0], [0], [1], [0, 0, 1, 1], [], []>} : vector<128x128xbf16>, vector<128x128xbf16>, vector<128x128xf32> -> vector<128x128xf32>
      %103 = arith.addf %98, %102 : vector<128x128xf32>
      %104 = vector.extract_strided_slice %62 {offsets = [51, 0], sizes = [128, 128], strides = [1, 1]} : vector<179x128xbf16> to vector<128x128xbf16>
      %c8 = arith.constant 8 : index
      %c0_68 = arith.constant 0 : index
      %c0_69 = arith.constant 0 : index
      %105 = vector.load %arg5[%c8, %c0_68, %c0_69] : memref<9x128x128xbf16, #tpu.memory_space<vmem>>, vector<1x128x128xbf16>
      %106 = vector.shape_cast %105 : vector<1x128x128xbf16> to vector<128x128xbf16>
      %cst_70 = arith.constant dense<0.000000e+00> : vector<128x128xf32>
      %107 = tpu.matmul %104, %106, %cst_70 {dimension_numbers = #tpu.dot_dimension_numbers<[1], [0], [0], [1], [0, 0, 1, 1], [], []>} : vector<128x128xbf16>, vector<128x128xbf16>, vector<128x128xf32> -> vector<128x128xf32>
      %108 = arith.addf %103, %107 : vector<128x128xf32>
      %109 = arith.index_cast %60 : i32 to index
      %c0_71 = arith.constant 0 : index
      %110 = vector.load %arg12[%109, %c0_71] : memref<640x128xf32, #tpu.memory_space<vmem>>, vector<128x128xf32>
      tpu.vector_store %arg12[%109, %c0_71], %108 {strides = array<i32>} : memref<640x128xf32, #tpu.memory_space<vmem>>, vector<128x128xf32>,
      %111 = arith.index_cast %60 : i32 to index
      %c0_72 = arith.constant 0 : index
      %112 = vector.load %arg0[%111, %c0_72] : memref<640x1xf32, #tpu.memory_space<vmem>>, vector<128x1xf32>
      %113 = vector.broadcast %112 : vector<128x1xf32> to vector<128x128xf32>
      %114 = arith.mulf %108, %113 : vector<128x128xf32>
      %cst_73 = arith.constant dense<0.000000e+00> : vector<128xf32>
      %115 = vector.multi_reduction <add>, %114, %cst_73 [0] : vector<128x128xf32> to vector<128xf32>
      %116 = vector.shape_cast %115 : vector<128xf32> to vector<1x128xf32>
      %117 = arith.addf %arg16, %116 : vector<1x128xf32>
      %118 = arith.mulf %114, %108 : vector<128x128xf32>
      %cst_74 = arith.constant dense<0.000000e+00> : vector<128xf32>
      %119 = vector.multi_reduction <add>, %118, %cst_74 [0] : vector<128x128xf32> to vector<128xf32>
      %120 = vector.shape_cast %119 : vector<128xf32> to vector<1x128xf32>
      %121 = arith.addf %arg17, %120 : vector<1x128xf32>
      scf.yield %117, %121 : vector<1x128xf32>, vector<1x128xf32>
    }
    %c5_i32_20 = arith.constant 5 : i32
    %c0_21 = arith.constant 0 : index
    %c0_22 = arith.constant 0 : index
    %26 = vector.load %arg6[%c0_21, %c0_22] : memref<1x128xf32, #tpu.memory_space<vmem>>, vector<1x128xf32>
    %c0_23 = arith.constant 0 : index
    %c0_24 = arith.constant 0 : index
    %27 = vector.load %arg7[%c0_23, %c0_24] : memref<1x128xf32, #tpu.memory_space<vmem>>, vector<1x128xf32>
    %cst_25 = arith.constant 0.001953125 : f32
    %28 = vector.broadcast %cst_25 : f32 to vector<1x128xf32>
    %29 = arith.mulf %25#0, %28 : vector<1x128xf32>
    %cst_26 = arith.constant 0.001953125 : f32
    %30 = vector.broadcast %cst_26 : f32 to vector<1x128xf32>
    %31 = arith.mulf %25#1, %30 : vector<1x128xf32>
    %32 = arith.mulf %29, %29 : vector<1x128xf32>
    %33 = arith.subf %31, %32 : vector<1x128xf32>
    %cst_27 = arith.constant 0.000000e+00 : f32
    %34 = vector.broadcast %cst_27 : f32 to vector<1x128xf32>
    %35 = arith.maximumf %33, %34 : vector<1x128xf32>
    %cst_28 = arith.constant 9.99999974E-6 : f32
    %36 = vector.broadcast %cst_28 : f32 to vector<1x128xf32>
    %37 = arith.addf %35, %36 : vector<1x128xf32>
    %38 = math.rsqrt %37 : vector<1x128xf32>
    %39 = arith.mulf %38, %26 : vector<1x128xf32>
    %40 = arith.mulf %29, %39 : vector<1x128xf32>
    %41 = arith.subf %27, %40 : vector<1x128xf32>
    %c0_29 = arith.constant 0 : index
    %c0_30 = arith.constant 0 : index
    %42 = vector.load %arg9[%c0_29, %c0_30] : memref<1x128xf32, #tpu.memory_space<vmem>>, vector<1x128xf32>
    %c0_31 = arith.constant 0 : index
    %c0_32 = arith.constant 0 : index
    %43 = vector.load %arg10[%c0_31, %c0_32] : memref<1x128xf32, #tpu.memory_space<vmem>>, vector<1x128xf32>
    %cst_33 = arith.constant 0.001953125 : f32
    %44 = vector.broadcast %cst_33 : f32 to vector<1x128xf32>
    %45 = arith.mulf %2#2, %44 : vector<1x128xf32>
    %cst_34 = arith.constant 0.001953125 : f32
    %46 = vector.broadcast %cst_34 : f32 to vector<1x128xf32>
    %47 = arith.mulf %2#3, %46 : vector<1x128xf32>
    %48 = arith.mulf %45, %45 : vector<1x128xf32>
    %49 = arith.subf %47, %48 : vector<1x128xf32>
    %cst_35 = arith.constant 0.000000e+00 : f32
    %50 = vector.broadcast %cst_35 : f32 to vector<1x128xf32>
    %51 = arith.maximumf %49, %50 : vector<1x128xf32>
    %cst_36 = arith.constant 9.99999974E-6 : f32
    %52 = vector.broadcast %cst_36 : f32 to vector<1x128xf32>
    %53 = arith.addf %51, %52 : vector<1x128xf32>
    %54 = math.rsqrt %53 : vector<1x128xf32>
    %55 = arith.mulf %54, %42 : vector<1x128xf32>
    %56 = arith.mulf %45, %55 : vector<1x128xf32>
    %57 = arith.subf %43, %56 : vector<1x128xf32>
    %c0_i32_37 = arith.constant 0 : i32
    %c5_i32_38 = arith.constant 5 : i32
    %58 = arith.addi %c0_i32_37, %c5_i32_38 : i32
    %c1_i32_39 = arith.constant 1 : i32
    scf.for %arg15 = %c0_i32_37 to %58 step %c1_i32_39  : i32 {
      %c128_i32 = arith.constant 128 : i32
      %59 = arith.muli %arg15, %c128_i32 : i32
      %60 = tpu.assume_multiple %59, 128 : i32
      %61 = arith.index_cast %60 : i32 to index
      %c0_41 = arith.constant 0 : index
      %62 = vector.load %arg12[%61, %c0_41] : memref<640x128xf32, #tpu.memory_space<vmem>>, vector<128x128xf32>
      %63 = vector.broadcast %39 : vector<1x128xf32> to vector<128x128xf32>
      %64 = arith.mulf %62, %63 : vector<128x128xf32>
      %65 = vector.broadcast %41 : vector<1x128xf32> to vector<128x128xf32>
      %66 = arith.addf %64, %65 : vector<128x128xf32>
      %67 = arith.index_cast %60 : i32 to index
      %c0_42 = arith.constant 0 : index
      %68 = vector.load %arg14[%67, %c0_42] : memref<640x128xf32, #tpu.memory_space<vmem>>, vector<128x128xf32>
      %69 = vector.broadcast %55 : vector<1x128xf32> to vector<128x128xf32>
      %70 = arith.mulf %68, %69 : vector<128x128xf32>
      %71 = vector.broadcast %57 : vector<1x128xf32> to vector<128x128xf32>
      %72 = arith.addf %70, %71 : vector<128x128xf32>
      %73 = arith.addf %66, %72 : vector<128x128xf32>
      %cst_43 = arith.constant 0.000000e+00 : f32
      %74 = vector.broadcast %cst_43 : f32 to vector<128x128xf32>
      %75 = arith.maximumf %73, %74 : vector<128x128xf32>
      %76 = arith.index_cast %60 : i32 to index
      %c0_44 = arith.constant 0 : index
      %77 = vector.load %arg11[%76, %c0_44] : memref<640x128xf32, #tpu.memory_space<vmem>>, vector<128x128xf32>
      tpu.vector_store %arg11[%76, %c0_44], %75 {strides = array<i32>} : memref<640x128xf32, #tpu.memory_space<vmem>>, vector<128x128xf32>,
    }
    %c5_i32_40 = arith.constant 5 : i32
    return
  }
}

</mosaic_0001>

<bundles_post_ra>
// kernel: basic_block_forward.1
= control target key start
LH: loop header
LB: loop body
LE: loop exit
PB: predicated region body
PF: predicated region fallthrough
CT: control target
= control target key end

     0   :  { %v6931_v0 = vmov 0.0   ;;  %v6933_v1 = vmov 0.0   ;;  %v6935_v2 = vmov 0.0   ;;  %v6937_v3 = vmov 0.0   ;;  %s6939_s17 = smov 0   ;;  %s8724_s0 = inlined_call_operand.vmem [shape: f32[640,1], index: 0, kind: input, shape index: {}]   ;;  %s8725_s1 = inlined_call_operand.vmem [shape: f32[704,128], index: 1, kind: input, shape index: {}]   ;;  %s8726_s2 = inlined_call_operand.vmem [shape: bf16[9,128,128], index: 2, kind: input, shape index: {}]   ;;  %s8727_s3 = inlined_call_operand.vmem [shape: f32[1,128], index: 3, kind: input, shape index: {}]   ;;  %s8728_s4 = inlined_call_operand.vmem [shape: f32[1,128], index: 4, kind: input, shape index: {}]   ;;  %s8729_s5 = inlined_call_operand.vmem [shape: bf16[9,128,128], index: 5, kind: input, shape index: {}]   ;;  %s8730_s6 = inlined_call_operand.vmem [shape: f32[1,128], index: 6, kind: input, shape index: {}]   ;;  %s8731_s7 = inlined_call_operand.vmem [shape: f32[1,128], index: 7, kind: input, shape index: {}]   ;;  %s8732_s8 = inlined_call_operand.vmem [shape: bf16[128,128], index: 8, kind: input, shape index: {}]   ;;  %s8733_s9 = inlined_call_operand.vmem [shape: f32[1,128], index: 9, kind: input, shape index: {}]   ;;  %s8734_s10 = inlined_call_operand.vmem [shape: f32[1,128], index: 10, kind: input, shape index: {}]   ;;  %s8735_s11 = inlined_call_operand.vmem [shape: f32[640,128], index: 11, kind: output, shape index: {}]  }
   0x1 LB: > { %v6625_v4 = vld [vmem:[%s8726_s2 + $0x40] sm:$0xff]   ;;  %v6627_v6 = vld [vmem:[%s8726_s2 + $0x48] sm:$0xff]   ;;  %v6629_v8 = vld [vmem:[%s8726_s2 + $0x50] sm:$0xff]   ;;  %s6981_s15 = sshll.u32 %s6845_s17, 7  ;;  %vm145_vm0 = vcmask 1040384   ;;  %vm1549_vm5 = vcmask 1046528   ;;  %s6845_s17 = sphi %s6939_s17, %s44_s17   ;;  %v6841_v3 = vphi %v6937_v3, %v8758_v3   ;;  %v6837_v2 = vphi %v6935_v2, %v8757_v2   ;;  %v6833_v1 = vphi %v6933_v1, %v8756_v1   ;;  %v6829_v0 = vphi %v6931_v0, %v8754_v0  }
   0x2   : > { %v6626_v5 = vld [vmem:[%s8726_s2 + $0x100] sm:$0xff]   ;;  %5659 = vmatprep.subr.bf16.mxu1 %v6625_v4  ;;  %v6628_v7 = vld [vmem:[%s8726_s2 + $0x108] sm:$0xff]   ;;  %v6630_v9 = vld [vmem:[%s8726_s2 + $0x110] sm:$0xff]   ;;  %s6993_s23 = scalar_lea.vmem %s8725_s1, %s6981_s15  ;;  %vm316_vm1 = vsmask.f32 1280  ;;  %s7343_s20 = scalar_lea.vmem %s8724_s0, %s6981_s15 }
   0x3   : > { %5787 = vmatprep.subr.bf16.mxu0 %v6626_v5  ;;  %5660 = vmatpush3.bf16.msra.mxu1 %v6625_v4  ;;  %v6631_v10 = vld [vmem:[%s8726_s2 + $0x58] sm:$0xff]   ;;  %v6633_v12 = vld [vmem:[%s8726_s2 + $0x60] sm:$0xff]   ;;  %v6635_v14 = vld [vmem:[%s8726_s2 + $0x68] sm:$0xff]   ;;  %vm1144_vm2 = vsmask.f32 7424  ;;  %s7631_s18 = scalar_lea.vmem [#allocation4], %s6981_s15 }
   0x4   : > { %5788 = vmatpush3.bf16.msra.mxu0 %v6626_v5  ;;  %5661 = vmatprep.subr.bf16.mxu1 %v6627_v6  ;;  %v6632_v11 = vld [vmem:[%s8726_s2 + $0x118] sm:$0xff]   ;;  %v6634_v13 = vld [vmem:[%s8726_s2 + $0x120] sm:$0xff]   ;;  %v6636_v15 = vld [vmem:[%s8726_s2 + $0x128] sm:$0xff]   ;;  %vm567_vm3 = vsmask.f32 256  ;;  %s7637_s19 = scalar_lea.vmem [#allocation2], %s6981_s15 }
   0x5   : > { %5789 = vmatprep.subr.bf16.mxu0 %v6628_v7  ;;  %v51_v16 = vld [vmem:[%s6993_s23] sm:$0xff]  ;;  %v52_v17 = vld [vmem:[%s6993_s23 + $0x8] sm:$0xff]  ;;  %v53_v18 = vld [vmem:[%s6993_s23 + $0x10] sm:$0xff]  ;;  %vm1753_vm4 = vsmask.f32 6400  ;;  %s44_s17 = sadd.s32 1, %s6845_s17  }
   0x6   : > { %v54_v19 = vld [vmem:[%s6993_s23 + $0x18] sm:$0xff]  ;;  %v7005_v20 = vpack.c.bf16 %v52_v17, %v51_v16  ;;  %v55_v21 = vld [vmem:[%s6993_s23 + $0x20] sm:$0xff]  ;;  %v56_v22 = vld [vmem:[%s6993_s23 + $0x28] sm:$0xff]  ;;  %p41_p0 = scmp.ge.s32.totalorder %s44_s17, 5  }
   0x7   : > { %5662 = vmatpush3.bf16.msra.mxu1 %v6627_v6  ;;  %v7009_v23 = vpack.c.bf16 %v54_v19, %v53_v18  ;;  %v7012_v25 = vpack.c.bf16 %v56_v22, %v55_v21  ;;  %v6637_v26 = vld [vmem:[%s8726_s2 + $0x70] sm:$0xff]   ;;  %v6639_v30 = vld [vmem:[%s8726_s2 + $0x78] sm:$0xff]   ;;  %v6641_v35 = vld [vmem:[%s8726_s2] sm:$0xff]  }
   0x8   : > { %5790 = vmatpush3.bf16.msra.mxu0 %v6628_v7  ;;  %5663 = vmatprep.subr.bf16.mxu1 %v6629_v8  ;;  %v146_v24 = vrot.slane %v7005_v20, 7  ;;  %v6638_v27 = vld [vmem:[%s8726_s2 + $0x130] sm:$0xff]   ;;  %v6640_v31 = vld [vmem:[%s8726_s2 + $0x138] sm:$0xff]   ;;  %v59_v37 = vld [vmem:[%s6993_s23 + $0x40] sm:$0xff]  ;;  %v318_v63 = vshrl.u32 %v7005_v20, 16  ;;  %v321_v4 = vshll.u32 %v7005_v20, 16 }
   0x9   : > { %5791 = vmatprep.subr.bf16.mxu0 %v6630_v9  ;;  %v147_v28 = vrot.slane %v7009_v23, 7  ;;  %5803 = vmatprep.mubr.bf16.mxu0 %v7012_v25  ;;  %v57_v32 = vld [vmem:[%s6993_s23 + $0x30] sm:$0xff]  ;;  %v58_v33 = vld [vmem:[%s6993_s23 + $0x38] sm:$0xff]  ;;  %v149_v34 = vrot.slane %v7012_v25, 7  ;;  %v60_v38 = vld [vmem:[%s6993_s23 + $0x48] sm:$0xff]  ;;  %v326_v5 = vshrl.u32 %v7009_v23, 16 }
   0xa   : > { %v7035_v36 = vpack.c.bf16 %v58_v33, %v57_v32  ;;  %v6642_v39 = vld [vmem:[%s8726_s2 + $0x140] sm:$0xff]   ;;  %v7044_v42 = vpack.c.bf16 %v60_v38, %v59_v37  ;;  %v6643_v43 = vld [vmem:[%s8726_s2 + $0x8] sm:$0xff]   ;;  %v61_v45 = vld [vmem:[%s6993_s23 + $0x50] sm:$0xff]  ;;  %v320_v16 = vrot.slane %v318_v63, 6  ;;  %v323_v18 = vrot.slane %v321_v4, 7 }
   0xb   : > { %5664 = vmatpush3.bf16.msra.mxu1 %v6629_v8  ;;  %v148_v29 = vsel %vm145_vm0, %v146_v24, %v147_v28  ;;  %v150_v41 = vsel %vm145_vm0, %v147_v28, %v149_v34  ;;  %v6644_v44 = vld [vmem:[%s8726_s2 + $0x148] sm:$0xff]   ;;  %v62_v46 = vld [vmem:[%s6993_s23 + $0x58] sm:$0xff]  ;;  %v6645_v49 = vld [vmem:[%s8726_s2 + $0x10] sm:$0xff]   ;;  %v328_v19 = vrot.slane %v326_v5, 6  ;;  %v7118_v24 = vshrl.u32 %v7012_v25, 16 }
   0xc   : > { %5792 = vmatpush3.bf16.msra.mxu0 %v6630_v9  ;;  %5665 = vmatprep.subr.bf16.mxu1 %v6631_v10  ;;  %v151_v40 = vrot.slane %v7035_v36, 7  ;;  %v153_v48 = vrot.slane %v7044_v42, 7  ;;  %v63_v50 = vld [vmem:[%s6993_s23 + $0x60] sm:$0xff]  ;;  %v7061_v51 = vpack.c.bf16 %v62_v46, %v61_v45  ;;  %v64_v52 = vld [vmem:[%s6993_s23 + $0x68] sm:$0xff]  ;;  %v6646_v53 = vld [vmem:[%s8726_s2 + $0x150] sm:$0xff]   ;;  %v7150_v46 = vshll.u32 %v7044_v42, 16 }
   0xd   : > { %5793 = vmatprep.subr.bf16.mxu0 %v6632_v11  ;;  %5675 = vmatprep.mubr.bf16.mxu1 %v148_v29  ;;  %v6647_v54 = vld [vmem:[%s8726_s2 + $0x18] sm:$0xff]   ;;  %v7076_v58 = vpack.c.bf16 %v64_v52, %v63_v50  ;;  %v65_v59 = vld [vmem:[%s6993_s23 + $0x70] sm:$0xff]  ;;  %v6649_v62 = vld [vmem:[%s8726_s2 + $0x20] sm:$0xff]   ;;  %v7159_v52 = vshrl.u32 %v7044_v42, 16 }
   0xe   : > { %v152_v47 = vsel %vm145_vm0, %v149_v34, %v151_v40  ;;  %v155_v55 = vrot.slane %v7061_v51, 7  ;;  %v154_v56 = vsel %vm145_vm0, %v151_v40, %v153_v48  ;;  %v6648_v57 = vld [vmem:[%s8726_s2 + $0x158] sm:$0xff]   ;;  %v67_v7 = vld [vmem:[%s6993_s23 + $0x80] sm:$0xff]  ;;  %v68_v9 = vld [vmem:[%s6993_s23 + $0x88] sm:$0xff]  ;;  %v7136_v34 = vshrl.u32 %v7035_v36, 16 }
   0xf   : > { %5666 = vmatpush3.bf16.msra.mxu1 %v6631_v10  ;;  %v66_v60 = vld [vmem:[%s6993_s23 + $0x78] sm:$0xff]  ;;  %v157_v6 = vrot.slane %v7076_v58, 7  ;;  %v329_v10 = vshll.u32 %v7009_v23, 16  ;;  %v6651_v17 = vld [vmem:[%s8726_s2 + $0x28] sm:$0xff]   ;;  %v6654_v33 = vld [vmem:[%s8726_s2 + $0x170] sm:$0xff]   ;;  %v355_v4 = vrot.slane %v7159_v52, 6 }
  0x10   : > { %5794 = vmatpush3.bf16.msra.mxu0 %v6632_v11  ;;  %5667 = vmatprep.subr.bf16.mxu1 %v6633_v12  ;;  %v156_v61 = vsel %vm145_vm0, %v153_v48, %v155_v55  ;;  %v7090_v8 = vpack.c.bf16 %v66_v60, %v65_v59  ;;  %v6650_v11 = vld [vmem:[%s8726_s2 + $0x160] sm:$0xff]   ;;  %v6652_v22 = vld [vmem:[%s8726_s2 + $0x168] sm:$0xff]   ;;  %v70_v32 = vld [vmem:[%s6993_s23 + $0x98] sm:$0xff]  ;;  %v346_v48 = vrot.slane %v7136_v34, 6  ;;  %v1150_v59 = vrot.slane %v7150_v46, 1 }
  0x11   : > { %5795 = vmatprep.subr.bf16.mxu0 %v6634_v13  ;;  %v331_v21 = vrot.slane %v329_v10, 7  ;;  %v6655_v45 = vld [vmem:[%s8726_s2 + $0x38] sm:$0xff]   ;;  %v6658_v60 = vld [vmem:[%s8726_s2 + $0x180] sm:$0xff]  }
  0x13   : > { %5668 = vmatpush3.bf16.msra.mxu1 %v6633_v12  ;;  %v159_v12 = vrot.slane %v7090_v8, 7  ;;  %v332_v37 = vor.u32 %v331_v21, %v328_v19 }
  0x14   : > { %5796 = vmatpush3.bf16.msra.mxu0 %v6634_v13  ;;  %5669 = vmatprep.subr.bf16.mxu1 %v6635_v14  ;;  %v7100_v13 = vshll.u32 %v7012_v25, 16 }
  0x15   : > { %5797 = vmatprep.subr.bf16.mxu0 %v6636_v15 }
  0x16   : > { %v1145_v28 = vrot.slane %v7100_v13, 1 }
  0x17   : > { %5670 = vmatpush3.bf16.msra.mxu1 %v6635_v14  ;;  %v158_v14 = vsel %vm145_vm0, %v155_v55, %v157_v6  ;;  %v7164_v55 = vshll.u32 %v7061_v51, 16 }
  0x18   : > { %5798 = vmatpush3.bf16.msra.mxu0 %v6636_v15  ;;  %5671 = vmatprep.subr.bf16.mxu1 %v6637_v26  ;;  %v7103_v15 = vpack.c.bf16 %v68_v9, %v67_v7  ;;  %v1152_v7 = vor.u32 %v1150_v59, %v7159_v52 }
  0x19   : > { %5799 = vmatprep.subr.bf16.mxu0 %v6638_v27  ;;  %v1153_v9 = vrot.slane %v7164_v55, 1  ;;  %v367_v21 = vrot.slane %v7164_v55, 7 }
  0x1a   : > { %v161_v29 = vrot.slane %v7103_v15, 7 }
  0x1b   : > { %5672 = vmatpush3.bf16.msra.mxu1 %v6637_v26  ;;  %v160_v26 = vsel %vm145_vm0, %v157_v6, %v159_v12 }
  0x1c   : > { %5800 = vmatpush3.bf16.msra.mxu0 %v6638_v27  ;;  %5673 = vmatprep.subr.bf16.mxu1 %v6639_v30  ;;  %v7122_v27 = vshll.u32 %v7035_v36, 16  ;;  %v162_v40 = vsel %vm145_vm0, %v159_v12, %v161_v29  ;;  %v7205_v29 = vshll.u32 %v7090_v8, 16 }
  0x1d   : > { %5801 = vmatprep.subr.bf16.mxu0 %v6640_v31 }
  0x1e   : > { %v1147_v38 = vrot.slane %v7122_v27, 1  ;;  %v349_v50 = vrot.slane %v7122_v27, 7 }
  0x1f   : > { %5674 = vmatpush3.bf16.msra.mxu1 %v6639_v30  ;;  %v6653_v30 = vld [vmem:[%s8726_s2 + $0x30] sm:$0xff]  }
  0x20   : > { %5802 = vmatpush3.bf16.msra.mxu0 %v6640_v31  ;;  %5691 = vmatprep.subr.bf16.mxu1 %v6641_v35  ;;  %v69_v31 = vld [vmem:[%s6993_s23 + $0x90] sm:$0xff] }
  0x21   : > { %5819 = vmatprep.subr.bf16.mxu0 %v6642_v39 }
  0x22   : > { %5676 = vmatmul.mubr.bf16.vlgmr.msra.gmra.mrb[0].mxu1 %v150_v41  ;;  %v7142_v41 = vpack.c.bf16 %v70_v32, %v69_v31 }
  0x23   : > { %5804 = vmatmul.mubr.bf16.vlgmr.msra.gmra.mrb[0].mxu0 %v7035_v36  ;;  %5692 = vmatpush3.bf16.msra.mxu1 %v6641_v35  ;;  %v324_v35 = vor.u32 %v323_v18, %v320_v16  ;;  %v7189_v16 = vshll.u32 %v7076_v58, 16 }
  0x24   : > { %5820 = vmatpush3.bf16.msra.mxu0 %v6642_v39  ;;  %5693 = vmatprep.subr.bf16.mxu1 %v6643_v43  ;;  %v337_v39 = vrot.slane %v7118_v24, 6 }
  0x25   : > { %5821 = vmatprep.subr.bf16.mxu0 %v6644_v44  ;;  %5679 = vmatprep.mubr.bf16.mxu1 %v152_v47  ;;  %v6656_v47 = vld [vmem:[%s8726_s2 + $0x178] sm:$0xff]   ;;  %v1156_v32 = vrot.slane %v7189_v16, 1 }
  0x26   : > { %5807 = vmatprep.mubr.bf16.mxu0 %v7044_v42 }
  0x27   : > { %5694 = vmatpush3.bf16.msra.mxu1 %v6643_v43  ;;  %v1146_v43 = vor.u32 %v1145_v28, %v7118_v24  ;;  %v7202_v28 = vshrl.u32 %v7076_v58, 16 }
  0x28   : > { %5822 = vmatpush3.bf16.msra.mxu0 %v6644_v44  ;;  %5695 = vmatprep.subr.bf16.mxu1 %v6645_v49  ;;  %v340_v44 = vrot.slane %v7100_v13, 7 }
  0x29   : > { %5823 = vmatprep.subr.bf16.mxu0 %v6646_v53 }
  0x2a   : > { %5680 = vmatmul.mubr.bf16.gmra.mrb[4].mxu1 %v154_v56  ;;  %v1149_v56 = vor.u32 %v1147_v38, %v7136_v34 }
  0x2b   : > { %5808 = vmatmul.mubr.bf16.gmra.mrb[4].mxu0 %v7061_v51  ;;  %5696 = vmatpush3.bf16.msra.mxu1 %v6645_v49  ;;  %v333_v49 = vsel %vm316_vm1, %v324_v35, %v332_v37  ;;  %v6663_v35 = vld [vmem:[%s8726_s2 + $0x98] sm:$0xff]  }
  0x2c   : > { %5824 = vmatpush3.bf16.msra.mxu0 %v6646_v53  ;;  %5697 = vmatprep.subr.bf16.mxu1 %v6647_v54  ;;  %v1148_v53 = vsel %vm1144_vm2, %v1146_v43, %v1147_v38  ;;  %v7183_v12 = vsel %vm1144_vm2, %v1149_v56, %v1150_v59  ;;  %v376_v38 = vrot.slane %v7189_v16, 7  ;;  %v6664_v43 = vld [vmem:[%s8726_s2 + $0x198] sm:$0xff]  }
  0x2d   : > { %5825 = vmatprep.subr.bf16.mxu0 %v6648_v57  ;;  %5683 = vmatprep.mubr.bf16.mxu1 %v156_v61  ;;  %v6659_v61 = vld [vmem:[%s8726_s2 + $0x88] sm:$0xff]  }
  0x2e   : > { %5811 = vmatprep.mubr.bf16.mxu0 %v7076_v58 }
  0x2f   : > { %5698 = vmatpush3.bf16.msra.mxu1 %v6647_v54  ;;  %v341_v54 = vor.u32 %v340_v44, %v337_v39  ;;  %v7221_v39 = vshrl.u32 %v7090_v8, 16  ;;  %v1158_v44 = vor.u32 %v1156_v32, %v7202_v28 }
  0x30   : > { %5826 = vmatpush3.bf16.msra.mxu0 %v6648_v57  ;;  %5699 = vmatprep.subr.bf16.mxu1 %v6649_v62  ;;  %v6657_v57 = vld [vmem:[%s8726_s2 + $0x80] sm:$0xff]  }
  0x31   : > { %5827 = vmatprep.subr.bf16.mxu0 %v6650_v11  ;;  %v342_v6 = vsel %vm316_vm1, %v332_v37, %v341_v54  ;;  %v382_v59 = vrot.slane %v7221_v39, 6 }
  0x32   : > { %5684 = vmatmul.mubr.bf16.gmra.mrb[8].mxu1 %v158_v14  ;;  %v7186_v14 = vshrl.u32 %v7061_v51, 16 }
  0x33   : > { %5812 = vmatmul.mubr.bf16.gmra.mrb[8].mxu0 %v7090_v8  ;;  %5700 = vmatpush3.bf16.msra.mxu1 %v6649_v62  ;;  %v350_v62 = vor.u32 %v349_v50, %v346_v48  ;;  %v71_v50 = vld [vmem:[%s6993_s23 + $0xa0] sm:$0xff] }
  0x34   : > { %5828 = vmatpush3.bf16.msra.mxu0 %v6650_v11  ;;  %5701 = vmatprep.subr.bf16.mxu1 %v6651_v17  ;;  %v358_v11 = vrot.slane %v7150_v46, 7  ;;  %v364_v19 = vrot.slane %v7186_v14, 6  ;;  %v1155_v31 = vor.u32 %v1153_v9, %v7186_v14 }
  0x35   : > { %5829 = vmatprep.subr.bf16.mxu0 %v6652_v22  ;;  %5687 = vmatprep.mubr.bf16.mxu1 %v160_v26  ;;  %v351_v18 = vsel %vm316_vm1, %v341_v54, %v350_v62  ;;  %v72_v54 = vld [vmem:[%s6993_s23 + $0xa8] sm:$0xff] }
  0x36   : > { %5815 = vmatprep.mubr.bf16.mxu0 %v7103_v15  ;;  %v359_v26 = vor.u32 %v358_v11, %v355_v4  ;;  %v368_v37 = vor.u32 %v367_v21, %v364_v19  ;;  %v7231_v48 = vsel %vm1144_vm2, %v1155_v31, %v1156_v32  ;;  %v6666_v4 = vld [vmem:[%s8726_s2 + $0x1a0] sm:$0xff]   ;;  %v7264_v19 = vshrl.u32 %v7142_v41, 16  ;;  %v6667_v21 = vld [vmem:[%s8726_s2 + $0xa8] sm:$0xff]  }
  0x37   : > { %5702 = vmatpush3.bf16.msra.mxu1 %v6651_v17  ;;  %v6660_v17 = vld [vmem:[%s8726_s2 + $0x188] sm:$0xff]  }
  0x38   : > { %5830 = vmatpush3.bf16.msra.mxu0 %v6652_v22  ;;  %5703 = vmatprep.subr.bf16.mxu1 %v6653_v30  ;;  %v7199_v22 = vsel %vm1144_vm2, %v1152_v7, %v1153_v9  ;;  %v369_v56 = vsel %vm316_vm1, %v359_v26, %v368_v37  ;;  %v6668_v31 = vld [vmem:[%s8726_s2 + $0x1a8] sm:$0xff]  }
  0x39   : > { %5831 = vmatprep.subr.bf16.mxu0 %v6654_v33 }
  0x3a   : > { %5688 = vmatmul.mubr.bf16.gmra.mrb[12].mxu1 %v162_v40  ;;  %v360_v40 = vsel %vm316_vm1, %v350_v62, %v359_v26 }
  0x3b   : > { %5816 = vmatmul.mubr.bf16.gmra.mrb[12].mxu0 %v7142_v41  ;;  %5704 = vmatpush3.bf16.msra.mxu1 %v6653_v30  ;;  %v6661_v30 = vld [vmem:[%s8726_s2 + $0x90] sm:$0xff]  }
  0x3c   : > { %5832 = vmatpush3.bf16.msra.mxu0 %v6654_v33  ;;  %5705 = vmatprep.subr.bf16.mxu1 %v6655_v45  ;;  %v6662_v33 = vld [vmem:[%s8726_s2 + $0x190] sm:$0xff]  }
  0x3d   : > { %5833 = vmatprep.subr.bf16.mxu0 %v6656_v47  ;;  %5707 = vmatprep.mubr.bf16.mxu1 %v333_v49  ;;  %v7234_v49 = vshll.u32 %v7103_v15, 16 }
  0x3e   : > { %5835 = vmatprep.mubr.bf16.mxu0 %v1148_v53  ;;  %v7238_v53 = vshll.u32 %v7142_v41, 16 }
  0x3f   : > { %5706 = vmatpush3.bf16.msra.mxu1 %v6655_v45  ;;  %v1159_v45 = vrot.slane %v7205_v29, 1  ;;  %v1162_v9 = vrot.slane %v7234_v49, 1  ;;  %v394_v11 = vrot.slane %v7234_v49, 7 }
  0x40   : > { %5834 = vmatpush3.bf16.msra.mxu0 %v6656_v47  ;;  %5723 = vmatprep.subr.bf16.mxu1 %v6657_v57  ;;  %v373_v47 = vrot.slane %v7202_v28, 6 }
  0x41   : > { %5851 = vmatprep.subr.bf16.mxu0 %v6658_v60  ;;  %v1161_v7 = vor.u32 %v1159_v45, %v7221_v39 }
  0x42   : > { %5708 = vmatmul.mubr.bf16.vlgmr.msra.gmra.mrb[0].mxu1 %v342_v6  ;;  %v377_v62 = vor.u32 %v376_v38, %v373_v47  ;;  %v7255_v6 = vshrl.u32 %v7103_v15, 16  ;;  %v1754_v38 = vrot.slane %v7136_v34, 1  ;;  %v1757_v47 = vrot.slane %v7159_v52, 1 }
  0x43   : > { %5836 = vmatmul.mubr.bf16.vlgmr.msra.gmra.mrb[0].mxu0 %v7183_v12  ;;  %5724 = vmatpush3.bf16.msra.mxu1 %v6657_v57  ;;  %v6665_v57 = vld [vmem:[%s8726_s2 + $0xa0] sm:$0xff]  }
  0x44   : > { %5852 = vmatpush3.bf16.msra.mxu0 %v6658_v60  ;;  %5725 = vmatprep.subr.bf16.mxu1 %v6659_v61  ;;  %v385_v60 = vrot.slane %v7205_v29, 7  ;;  %v1164_v32 = vor.u32 %v1162_v9, %v7255_v6 }
  0x45   : > { %5853 = vmatprep.subr.bf16.mxu0 %v6660_v17  ;;  %5711 = vmatprep.mubr.bf16.mxu1 %v351_v18  ;;  %v1165_v18 = vrot.slane %v7238_v53, 1 }
  0x46   : > { %5839 = vmatprep.mubr.bf16.mxu0 %v7199_v22  ;;  %v386_v26 = vor.u32 %v385_v60, %v382_v59  ;;  %v6670_v60 = vld [vmem:[%s8726_s2 + $0x1b0] sm:$0xff]  }
  0x47   : > { %5726 = vmatpush3.bf16.msra.mxu1 %v6659_v61  ;;  %v7249_v61 = vsel %vm1144_vm2, %v1158_v44, %v1159_v45  ;;  %v7285_v45 = vrot.slane %v326_v5, 7  ;;  %v7295_v59 = vsel %vm1144_vm2, %v1164_v32, %v1165_v18 }
  0x48   : > { %5854 = vmatpush3.bf16.msra.mxu0 %v6660_v17  ;;  %5727 = vmatprep.subr.bf16.mxu1 %v6661_v30  ;;  %v7260_v17 = vpack.c.bf16 %v72_v54, %v71_v50  ;;  %v387_v50 = vsel %vm316_vm1, %v377_v62, %v386_v26 }
  0x49   : > { %5855 = vmatprep.subr.bf16.mxu0 %v6662_v33  ;;  %v570_v20 = vor.u32 %v7285_v45, %v329_v10  ;;  %v6672_v10 = vld [vmem:[%s8726_s2 + $0x1b8] sm:$0xff]  }
  0x4a   : > { %5712 = vmatmul.mubr.bf16.gmra.mrb[4].mxu1 %v360_v40  ;;  %v7278_v40 = vsel %vm1144_vm2, %v1161_v7, %v1162_v9  ;;  %v1169_v44 = vshll.u32 %v7260_v17, 16  ;;  %v1761_v7 = vrot.slane %v7186_v14, 1  ;;  %v1167_v9 = vor.u32 %v1165_v18, %v7264_v19  ;;  %v6671_v18 = vld [vmem:[%s8726_s2 + $0xb8] sm:$0xff]  }
  0x4b   : > { %5840 = vmatmul.mubr.bf16.gmra.mrb[4].mxu0 %v7231_v48  ;;  %5728 = vmatpush3.bf16.msra.mxu1 %v6661_v30  ;;  %v378_v30 = vsel %vm316_vm1, %v368_v37, %v377_v62  ;;  %v1755_v37 = vrot.slane %v7122_v27, 2  ;;  %v568_v62 = vrot.slane %v318_v63, 7  ;;  %v8736_v63 = vrot.slane %v7118_v24, 7 }
  0x4c   : > { %5856 = vmatpush3.bf16.msra.mxu0 %v6662_v33  ;;  %5729 = vmatprep.subr.bf16.mxu1 %v6663_v35  ;;  %v391_v33 = vrot.slane %v7255_v6, 6 }
  0x4d   : > { %5857 = vmatprep.subr.bf16.mxu0 %v6664_v43  ;;  %5715 = vmatprep.mubr.bf16.mxu1 %v369_v56  ;;  %v1756_v54 = vor.u32 %v1755_v37, %v1754_v38  ;;  %v1758_v56 = vrot.slane %v7150_v46, 2  ;;  %v1766_v38 = vrot.slane %v7189_v16, 2  ;;  %v1769_v37 = vrot.slane %v7221_v39, 1 }
  0x4e   : > { %5843 = vmatprep.mubr.bf16.mxu0 %v7249_v61  ;;  %v395_v5 = vor.u32 %v394_v11, %v391_v33  ;;  %v1762_v11 = vrot.slane %v7164_v55, 2 }
  0x4f   : > { %5730 = vmatpush3.bf16.msra.mxu1 %v6663_v35  ;;  %v73_v35 = vld [vmem:[%s6993_s23 + $0xb0] sm:$0x7] }
  0x50   : > { %5858 = vmatpush3.bf16.msra.mxu0 %v6664_v43  ;;  %5731 = vmatprep.subr.bf16.mxu1 %v6665_v57  ;;  %v6669_v43 = vld [vmem:[%s8726_s2 + $0xb0] sm:$0xff]   ;;  %v7313_v32 = vpack.c.bf16 %v73_v35, %v73_v35  ;;  %v1763_v33 = vor.u32 %v1762_v11, %v1761_v7  ;;  %v396_v23 = vsel %vm316_vm1, %v386_v26, %v395_v5  ;;  %v575_v35 = vrot.slane %v7136_v34, 7  ;;  %v6680_v34 = vld [vmem:[%s8726_s2 + $0x1d8] sm:$0xff]  }
  0x51   : > { %5859 = vmatprep.subr.bf16.mxu0 %v6666_v4  ;;  %v571_v26 = vsel %vm567_vm3, %v568_v62, %v570_v20  ;;  %v573_v5 = vor.u32 %v8736_v63, %v7100_v13  ;;  %v1774_v11 = vrot.slane %v7234_v49, 2  ;;  %v1777_v62 = vrot.slane %v7264_v19, 1 }
  0x52   : > { %5716 = vmatmul.mubr.bf16.gmra.mrb[8].mxu1 %v378_v30  ;;  %v1759_v30 = vor.u32 %v1758_v56, %v1757_v47  ;;  %v1770_v56 = vrot.slane %v7205_v29, 2  ;;  %v8737_v7 = vshll.u32 %v7313_v32, 16  ;;  %v1785_v63 = vshrl.u32 %v7313_v32, 16 }
  0x53   : > { %5844 = vmatmul.mubr.bf16.gmra.mrb[8].mxu0 %v7278_v40  ;;  %5732 = vmatpush3.bf16.msra.mxu1 %v6665_v57  ;;  %v7306_v57 = vrot.slane %v1169_v44, 1 }
  0x54   : > { %5860 = vmatpush3.bf16.msra.mxu0 %v6666_v4  ;;  %5733 = vmatprep.subr.bf16.mxu1 %v6667_v21  ;;  %v1765_v4 = vrot.slane %v7202_v28, 1  ;;  %v7349_v13 = vsel %vm1753_vm4, %v1756_v54, %v1759_v30  ;;  %v7352_v20 = vsel %vm1753_vm4, %v1759_v30, %v1763_v33  ;;  %v1782_v30 = vrot.slane %v1169_v44, 2 }
  0x55   : > { %5861 = vmatprep.subr.bf16.mxu0 %v6668_v31  ;;  %5719 = vmatprep.mubr.bf16.mxu1 %v387_v50  ;;  %v7329_v47 = vsel %vm1144_vm2, %v1167_v9, %v7306_v57  ;;  %v8738_v50 = vshrl.u32 %v7260_v17, 16  ;;  %v1771_v9 = vor.u32 %v1770_v56, %v1769_v37  ;;  %v576_v44 = vor.u32 %v575_v35, %v7122_v27  ;;  %v6675_v27 = vld [vmem:[%s8726_s2 + $0xc8] sm:$0xff]  }
  0x56   : > { %5847 = vmatprep.mubr.bf16.mxu0 %v7295_v59 }
  0x57   : > { %5734 = vmatpush3.bf16.msra.mxu1 %v6667_v21  ;;  %v1767_v21 = vor.u32 %v1766_v38, %v1765_v4  ;;  %v1778_v38 = vrot.slane %v7238_v53, 2  ;;  %v1781_v54 = vrot.slane %v8738_v50, 1  ;;  %v89_v50 = vld [vmem:[%s7343_s20 + $0x10] sm:$0xff] }
  0x58   : > { %5862 = vmatpush3.bf16.msra.mxu0 %v6668_v31  ;;  %5735 = vmatprep.subr.bf16.mxu1 %v6669_v43  ;;  %v1773_v31 = vrot.slane %v7255_v6, 1 }
  0x59   : > { %5863 = vmatprep.subr.bf16.mxu0 %v6670_v60  ;;  %v7355_v4 = vsel %vm1753_vm4, %v1763_v33, %v1767_v21  ;;  %v7362_v37 = vsel %vm1753_vm4, %v1767_v21, %v1771_v9  ;;  %v87_v33 = vld [vmem:[%s7343_s20] sm:$0xff]  ;;  %v1779_v56 = vor.u32 %v1778_v38, %v1777_v62  ;;  %v1788_v21 = vrot.slane %v8737_v7, 2 }
  0x5a   : > { %5720 = vmatmul.mubr.bf16.gmra.mrb[12].mxu1 %v396_v23  ;;  %v6673_v23 = vld [vmem:[%s8726_s2 + $0xc0] sm:$0xff]   ;;  %v7384_v62 = vsel %vm567_vm3, %v7285_v45, %v573_v5  ;;  %v578_v38 = vrot.slane %v7159_v52, 7  ;;  %v6676_v52 = vld [vmem:[%s8726_s2 + $0x1c8] sm:$0xff]   ;;  %v581_v5 = vrot.slane %v7186_v14, 7  ;;  %v6678_v14 = vld [vmem:[%s8726_s2 + $0x1d0] sm:$0xff]  }
  0x5b   : > { %5848 = vmatmul.mubr.bf16.gmra.mrb[12].mxu0 %v7329_v47  ;;  %5736 = vmatpush3.bf16.msra.mxu1 %v6669_v43  ;;  %v1775_v43 = vor.u32 %v1774_v11, %v1773_v31  ;;  %v6867_v11 = vmov 0  }
  0x5c   : > { %5864 = vmatpush3.bf16.msra.mxu0 %v6670_v60  ;;  %5737 = vmatprep.subr.bf16.mxu1 %v6671_v18  ;;  %v6674_v60 = vld [vmem:[%s8726_s2 + $0x1c0] sm:$0xff]  }
  0x5d   : > { %5865 = vmatprep.subr.bf16.mxu0 %v6672_v10  ;;  %5739 = vmatprep.mubr.bf16.mxu1 %v571_v26  ;;  %v7380_v31 = vsel %vm1753_vm4, %v1771_v9, %v1775_v43  ;;  %v1783_v26 = vor.u32 %v1782_v30, %v1781_v54  ;;  %v7388_v7 = vsel %vm1753_vm4, %v1775_v43, %v1779_v56  ;;  %v88_v54 = vld [vmem:[%s7343_s20 + $0x8] sm:$0xff]  ;;  %v90_v30 = vld [vmem:[%s7343_s20 + $0x18] sm:$0xff] }
  0x5e   : > { %5867 = vmatprep.mubr.bf16.mxu0 %v7183_v12  ;;  %6623 = vset.pattern.permute.xlu0 %v6867_v11  ;;  %v1787_v12 = vrot.slane %v1785_v63, 1  ;;  %v8746_v63 = vrot.slane %v7118_v24, 7  ;;  %v579_v9 = vor.u32 %v578_v38, %v7150_v46  ;;  %v6677_v24 = vld [vmem:[%s8726_s2 + $0xd0] sm:$0xff]   ;;  %v582_v46 = vor.u32 %v581_v5, %v7164_v55 }
  0x5f   : > { %5738 = vmatpush3.bf16.msra.mxu1 %v6671_v18  ;;  %1979 = vperm.xlu0 %6623, %v87_v33   ;;  %v7395_v18 = vsel %vm1753_vm4, %v1779_v56, %v1783_v26  ;;  %v92_v33 = vld [vmem:[%s7343_s20 + $0x28] sm:$0xff]  ;;  %v93_v56 = vld [vmem:[%s7343_s20 + $0x30] sm:$0xff] }
  0x60   : > { %5866 = vmatpush3.bf16.msra.mxu0 %v6672_v10  ;;  %5755 = vmatprep.subr.bf16.mxu1 %v6673_v23  ;;  %v1789_v45 = vor.u32 %v1788_v21, %v1787_v12  ;;  %v7404_v10 = vsel %vm567_vm3, %v8746_v63, %v576_v44  ;;  %v7438_v55 = vsel %vm567_vm3, %v578_v38, %v582_v46  ;;  %v590_v21 = vrot.slane %v7255_v6, 7  ;;  %v94_v44 = vld [vmem:[%s7343_s20 + $0x38] sm:$0xff]  ;;  %v95_v38 = vld [vmem:[%s7343_s20 + $0x40] sm:$0xff]  ;;  %v6685_v12 = vld [vmem:[%s8726_s2 + $0xf0] sm:$0xff]  }
  0x61   : > { %5883 = vmatprep.subr.bf16.mxu0 %v6674_v60  ;;  %6624 = vset.pattern.permute.xlu1 %v6867_v11  ;;  %v96_v63 = vld [vmem:[%s7343_s20 + $0x48] sm:$0xff]  ;;  %v98_v46 = vld [vmem:[%s7343_s20 + $0x58] sm:$0xff] }
  0x62   : > { %5740 = vmatmul.mubr.bf16.vlgmr.msra.gmra.mrb[0].mxu1 %v7384_v62  ;;  %1989 = vperm.xlu1 %6624, %v89_v50   ;;  %v7410_v43 = vsel %vm1753_vm4, %v1783_v26, %v1789_v45  ;;  %v584_v50 = vrot.slane %v7202_v28, 7  ;;  %v587_v28 = vrot.slane %v7221_v39, 7  ;;  %v6682_v39 = vld [vmem:[%s8726_s2 + $0x1e0] sm:$0xff]   ;;  %v6683_v26 = vld [vmem:[%s8726_s2 + $0xe8] sm:$0xff]   ;;  %v591_v11 = vor.u32 %v590_v21, %v7234_v49  ;;  %v6686_v49 = vld [vmem:[%s8726_s2 + $0x1f0] sm:$0xff]  }
  0x63   : > { %5868 = vmatmul.mubr.bf16.vlgmr.msra.gmra.mrb[0].mxu0 %v7199_v22  ;;  %5756 = vmatpush3.bf16.msra.mxu1 %v6673_v23  ;;  %v7426_v22 = vsel %vm567_vm3, %v575_v35, %v579_v9  ;;  %v91_v23 = vld [vmem:[%s7343_s20 + $0x20] sm:$0xff]  ;;  %v8748_v45 = vshll.u32 %v7313_v32, 16  ;;  %v1551_v9 = vrot.slane %v7044_v42, 1 }
  0x64   : > { %5884 = vmatpush3.bf16.msra.mxu0 %v6674_v60  ;;  %5757 = vmatprep.subr.bf16.mxu1 %v6675_v27  ;;  %v585_v35 = vor.u32 %v584_v50, %v7189_v16  ;;  %v6681_v60 = vld [vmem:[%s8726_s2 + $0xe0] sm:$0xff]   ;;  %v588_v16 = vor.u32 %v587_v28, %v7205_v29  ;;  %v6684_v29 = vld [vmem:[%s8726_s2 + $0x1e8] sm:$0xff]  }
  0x65   : > { %5885 = vmatprep.subr.bf16.mxu0 %v6676_v52  ;;  %5743 = vmatprep.mubr.bf16.mxu1 %v7404_v10 }
  0x66   : > { %5871 = vmatprep.mubr.bf16.mxu0 %v7231_v48  ;;  %1984 = vperm.xlu0 %6623, %v88_v54   ;;  %v6679_v48 = vld [vmem:[%s8726_s2 + $0xd8] sm:$0xff]   ;;  %v97_v54 = vld [vmem:[%s7343_s20 + $0x50] sm:$0xff] }
  0x67   : > { %5758 = vmatpush3.bf16.msra.mxu1 %v6675_v27  ;;  %1994 = vperm.xlu1 %6624, %v90_v30   ;;  %v8747_v27 = vshrl.u32 %v7260_v17, 16  ;;  %v6688_v30 = vld [vmem:[%s8726_s2 + $0x1f8] sm:$0xff]  }
  0x68   : > { %5886 = vmatpush3.bf16.msra.mxu0 %v6676_v52  ;;  %5759 = vmatprep.subr.bf16.mxu1 %v6677_v24 }
  0x69   : > { %5887 = vmatprep.subr.bf16.mxu0 %v6678_v14  ;;  %v1361_v52 = vor.u32 %v8747_v27, %v7306_v57  ;;  %v1550_v57 = vrot.slane %v7035_v36, 1  ;;  %v1561_v27 = vrot.slane %v7142_v41, 1 }
  0x6a   : > { %5744 = vmatmul.mubr.bf16.gmra.mrb[4].mxu1 %v7426_v22  ;;  %1999 = vperm.xlu0 %6623, %v91_v23   ;;  %v6690_v23 = vld [vmem:[%s8732_s8] sm:$0xff]  }
  0x6b   : > { %5872 = vmatmul.mubr.bf16.gmra.mrb[4].mxu0 %v7249_v61  ;;  %5760 = vmatpush3.bf16.msra.mxu1 %v6677_v24  ;;  %v7455_v61 = vsel %vm567_vm3, %v581_v5, %v585_v35  ;;  %v7489_v5 = vsel %vm567_vm3, %v587_v28, %v591_v11  ;;  %v1555_v28 = vrot.slane %v7076_v58, 1  ;;  %v100_v35 = vld [vmem:[%s7343_s20 + $0x68] sm:$0xff] }
  0x6c   : > { %5888 = vmatpush3.bf16.msra.mxu0 %v6678_v14  ;;  %5761 = vmatprep.subr.bf16.mxu1 %v6679_v48  ;;  %v1552_v14 = vsel %vm1549_vm5, %v1550_v57, %v1551_v9  ;;  %v1565_v57 = vrot.slane %v7313_v32, 1 }
  0x6d   : > { %5889 = vmatprep.subr.bf16.mxu0 %v6680_v34  ;;  %5747 = vmatprep.mubr.bf16.mxu1 %v7438_v55 }
  0x6e   : > { %5875 = vmatprep.mubr.bf16.mxu0 %v7278_v40  ;;  %2004 = vperm.xlu1 %6624, %v92_v33   ;;  %v7467_v40 = vsel %vm567_vm3, %v584_v50, %v588_v16  ;;  %v1553_v50 = vrot.slane %v7061_v51, 1  ;;  %v1557_v16 = vrot.slane %v7090_v8, 1 }
  0x6f   : > { %5762 = vmatpush3.bf16.msra.mxu1 %v6679_v48  ;;  %2009 = vperm.xlu0 %6623, %v93_v56   ;;  %v99_v48 = vld [vmem:[%s7343_s20 + $0x60] sm:$0xff] }
  0x70   : > { %5890 = vmatpush3.bf16.msra.mxu0 %v6680_v34  ;;  %5763 = vmatprep.subr.bf16.mxu1 %v6681_v60  ;;  %v6689_v34 = vld [vmem:[%s8726_s2 + $0x200] sm:$0xff]   ;;  %v1554_v33 = vsel %vm1549_vm5, %v1551_v9, %v1553_v50  ;;  %v1556_v56 = vsel %vm1549_vm5, %v1553_v50, %v1555_v28  ;;  %v1558_v11 = vsel %vm1549_vm5, %v1555_v28, %v1557_v16  ;;  %v6702_v9 = vld [vmem:[%s8732_s8 + $0x30] sm:$0xff]  }
  0x71   : > { %5891 = vmatprep.subr.bf16.mxu0 %v6682_v39 }
  0x72   : > { %5748 = vmatmul.mubr.bf16.gmra.mrb[8].mxu1 %v7455_v61  ;;  %2014 = vperm.xlu1 %6624, %v94_v44   ;;  %v6694_v44 = vld [vmem:[%s8732_s8 + $0x10] sm:$0xff]  }
  0x73   : > { %5876 = vmatmul.mubr.bf16.gmra.mrb[8].mxu0 %v7295_v59  ;;  %5764 = vmatpush3.bf16.msra.mxu1 %v6681_v60  ;;  %v1365_v59 = vrot.slane %v8748_v45, 1  ;;  %v6691_v60 = vld [vmem:[%s8726_s2 + $0x208] sm:$0xff]   ;;  %v6697_v45 = vld [vmem:[%s8726_s2 + $0x220] sm:$0xff]  }
  0x74   : > { %5892 = vmatpush3.bf16.msra.mxu0 %v6682_v39  ;;  %5765 = vmatprep.subr.bf16.mxu1 %v6683_v26  ;;  %v101_v39 = vld [vmem:[%s7343_s20 + $0x70] sm:$0xff] }
  0x75   : > { %5893 = vmatprep.subr.bf16.mxu0 %v6684_v29  ;;  %5751 = vmatprep.mubr.bf16.mxu1 %v7467_v40  ;;  %v1366_v24 = vsel %vm1144_vm2, %v1361_v52, %v1365_v59  ;;  %v6698_v52 = vld [vmem:[%s8732_s8 + $0x20] sm:$0xff]   ;;  %v782_v59 = vrot.slane %v7264_v19, 7 }
  0x76   : > { %5879 = vmatprep.mubr.bf16.mxu0 %v7329_v47  ;;  %2019 = vperm.xlu0 %6623, %v95_v38   ;;  %v6687_v47 = vld [vmem:[%s8726_s2 + $0xf8] sm:$0xff]  }
  0x77   : > { %5766 = vmatpush3.bf16.msra.mxu1 %v6683_v26  ;;  %2024 = vperm.xlu1 %6624, %v96_v63   ;;  %v102_v26 = vld [vmem:[%s7343_s20 + $0x78] sm:$0xff]  ;;  %v785_v19 = vor.u32 %v7238_v53, %v782_v59 }
  0x78   : > { %5894 = vmatpush3.bf16.msra.mxu0 %v6684_v29  ;;  %5767 = vmatprep.subr.bf16.mxu1 %v6685_v12  ;;  %v1559_v29 = vrot.slane %v7103_v15, 1  ;;  %v6696_v38 = vld [vmem:[%s8732_s8 + $0x18] sm:$0xff]  }
  0x79   : > { %5895 = vmatprep.subr.bf16.mxu0 %v6686_v49  ;;  %v786_v53 = vsel %vm567_vm3, %v590_v21, %v785_v19 }
  0x7a   : > { %5752 = vmatmul.mubr.bf16.gmra.mrb[12].mxu1 %v7489_v5  ;;  %2029 = vperm.xlu0 %6623, %v97_v54   ;;  %v1562_v63 = vsel %vm1549_vm5, %v1559_v29, %v1561_v27  ;;  %v6704_v54 = vld [vmem:[%s8732_s8 + $0x38] sm:$0xff]  }
  0x7b   : > { %5880 = vmatmul.mubr.bf16.gmra.mrb[12].mxu0 %v1366_v24  ;;  %5768 = vmatpush3.bf16.msra.mxu1 %v6685_v12  ;;  %v1560_v12 = vsel %vm1549_vm5, %v1557_v16, %v1559_v29 }
  0x7c   : > { %5896 = vmatpush3.bf16.msra.mxu0 %v6686_v49  ;;  %5769 = vmatprep.subr.bf16.mxu1 %v6687_v47  ;;  %v6700_v49 = vld [vmem:[%s8732_s8 + $0x28] sm:$0xff]  }
  0x7d   : > { %5897 = vmatprep.subr.bf16.mxu0 %v6688_v30  ;;  %5771 = vmatprep.mubr.bf16.mxu1 %v7384_v62  ;;  %v6692_v62 = vld [vmem:[%s8732_s8 + $0x8] sm:$0xff]  }
  0x7e   : > { %5899 = vmatprep.mubr.bf16.mxu0 %v1552_v14  ;;  %2034 = vperm.xlu1 %6624, %v98_v46  }
  0x7f   : > { %5770 = vmatpush3.bf16.msra.mxu1 %v6687_v47  ;;  %2039 = vperm.xlu0 %6623, %v99_v48  }
  0x80   : > { %5898 = vmatpush3.bf16.msra.mxu0 %v6688_v30  ;;  %5947 = vmatprep.subr.bf16.mxu1 %v6690_v23 }
  0x81   : > { %5915 = vmatprep.subr.bf16.mxu0 %v6689_v34 }
  0x82   : > { %5772 = vmatmul.mubr.bf16.vlgmr.msra.gmra.mrb[0].mxu1 %v7404_v10  ;;  %2044 = vperm.xlu1 %6624, %v100_v35   ;;  %v6693_v10 = vld [vmem:[%s8726_s2 + $0x210] sm:$0xff]  }
  0x83   : > { %5900 = vmatmul.mubr.bf16.vlgmr.msra.gmra.mrb[0].mxu0 %v1554_v33  ;;  %5948 = vmatpush3.bf16.msra.mxu1 %v6690_v23 }
  0x84   : > { %5916 = vmatpush3.bf16.msra.mxu0 %v6689_v34  ;;  %5949 = vmatprep.subr.bf16.mxu1 %v6692_v62 }
  0x85   : > { %5917 = vmatprep.subr.bf16.mxu0 %v6691_v60  ;;  %5775 = vmatprep.mubr.bf16.mxu1 %v7426_v22  ;;  %v6695_v22 = vld [vmem:[%s8726_s2 + $0x218] sm:$0xff]  }
  0x86   : > { %5903 = vmatprep.mubr.bf16.mxu0 %v1556_v56  ;;  %2049 = vperm.xlu0 %6623, %v101_v39  }
  0x87   : > { %5950 = vmatpush3.bf16.msra.mxu1 %v6692_v62  ;;  %2054 = vperm.xlu1 %6624, %v102_v26  }
  0x88   : > { %5918 = vmatpush3.bf16.msra.mxu0 %v6691_v60  ;;  %5951 = vmatprep.subr.bf16.mxu1 %v6694_v44 }
  0x89   : > { %5919 = vmatprep.subr.bf16.mxu0 %v6693_v10 }
  0x8a   : > { %5776 = vmatmul.mubr.bf16.gmra.mrb[4].mxu1 %v7438_v55  ;;  %v1563_v55 = vrot.slane %v7260_v17, 1 }
  0x8b   : > { %5904 = vmatmul.mubr.bf16.gmra.mrb[4].mxu0 %v1558_v11  ;;  %5952 = vmatpush3.bf16.msra.mxu1 %v6694_v44 }
  0x8c   : > { %5920 = vmatpush3.bf16.msra.mxu0 %v6693_v10  ;;  %5953 = vmatprep.subr.bf16.mxu1 %v6696_v38  ;;  %v1564_v17 = vsel %vm1549_vm5, %v1561_v27, %v1563_v55  ;;  %v1566_v32 = vsel %vm1549_vm5, %v1563_v55, %v1565_v57 }
  0x8d   : > { %5921 = vmatprep.subr.bf16.mxu0 %v6695_v22  ;;  %5779 = vmatprep.mubr.bf16.mxu1 %v7455_v61  ;;  %v6699_v61 = vld [vmem:[%s8726_s2 + $0x228] sm:$0xff]  }
  0x8e   : > { %5907 = vmatprep.mubr.bf16.mxu0 %v1560_v12 }
  0x8f   : > { %5954 = vmatpush3.bf16.msra.mxu1 %v6696_v38 }
  0x90   : > { %5922 = vmatpush3.bf16.msra.mxu0 %v6695_v22  ;;  %5955 = vmatprep.subr.bf16.mxu1 %v6698_v52 }
  0x91   : > { %5923 = vmatprep.subr.bf16.mxu0 %v6697_v45 }
  0x92   : > { %5780 = vmatmul.mubr.bf16.gmra.mrb[8].mxu1 %v7467_v40  ;;  %v6701_v40 = vld [vmem:[%s8726_s2 + $0x230] sm:$0xff]  }
  0x93   : > { %5908 = vmatmul.mubr.bf16.gmra.mrb[8].mxu0 %v1562_v63  ;;  %5956 = vmatpush3.bf16.msra.mxu1 %v6698_v52 }
  0x94   : > { %5924 = vmatpush3.bf16.msra.mxu0 %v6697_v45  ;;  %5957 = vmatprep.subr.bf16.mxu1 %v6700_v49 }
  0x95   : > { %5925 = vmatprep.subr.bf16.mxu0 %v6699_v61  ;;  %5783 = vmatprep.mubr.bf16.mxu1 %v7489_v5  ;;  %v6703_v5 = vld [vmem:[%s8726_s2 + $0x238] sm:$0xff]   ;;  %s7726_s2 = smov (%p41_p0), 0  }
  0x96   : > { %5911 = vmatprep.mubr.bf16.mxu0 %v1564_v17 }
  0x97   : > { %5958 = vmatpush3.bf16.msra.mxu1 %v6700_v49 }
  0x98   : > { %5926 = vmatpush3.bf16.msra.mxu0 %v6699_v61  ;;  %5959 = vmatprep.subr.bf16.mxu1 %v6702_v9 }
  0x99   : > { %5927 = vmatprep.subr.bf16.mxu0 %v6701_v40 }
  0x9a   : > { %5784 = vmatmul.mubr.bf16.gmra.mrb[12].mxu1 %v786_v53 }
  0x9b   : > { %5912 = vmatmul.mubr.bf16.gmra.mrb[12].mxu0 %v1566_v32  ;;  %5960 = vmatpush3.bf16.msra.mxu1 %v6702_v9 }
  0x9c   : > { %5928 = vmatpush3.bf16.msra.mxu0 %v6701_v40  ;;  %5961 = vmatprep.subr.bf16.mxu1 %v6704_v54 }
  0x9d   : > { %5929 = vmatprep.subr.bf16.mxu0 %v6703_v5  ;;  %5931 = vmatprep.mubr.bf16.mxu0 %v7349_v13 }
  0x9e   : > { %5963 = vmatprep.mubr.bf16.mxu1 %v7012_v25 }
  0x9f   : > { %5962 = vmatpush3.bf16.msra.mxu1 %v6704_v54 }
  0xa0   : > { %5930 = vmatpush3.bf16.msra.mxu0 %v6703_v5 }
  0xa2   : > { %5964 = vmatmul.mubr.bf16.vlgmr.msra.gmra.mrb[16].mxu1 %v7035_v36 }
  0xa3   : > { %5932 = vmatmul.mubr.bf16.vlgmr.msra.gmra.mrb[0].mxu0 %v7352_v20  ;;  %5967 = vmatprep.mubr.bf16.mxu1 %v7044_v42 }
  0xa4   : > { %5935 = vmatprep.mubr.bf16.mxu0 %v7355_v4 }
  0xaa   : > { %5968 = vmatmul.mubr.bf16.gmra.mrb[20].mxu1 %v7061_v51 }
  0xab   : > { %5936 = vmatmul.mubr.bf16.gmra.mrb[4].mxu0 %v7362_v37  ;;  %5971 = vmatprep.mubr.bf16.mxu1 %v7076_v58 }
  0xac   : > { %5939 = vmatprep.mubr.bf16.mxu0 %v7380_v31 }
  0xb2   : > { %5972 = vmatmul.mubr.bf16.gmra.mrb[24].mxu1 %v7090_v8 }
  0xb3   : > { %5940 = vmatmul.mubr.bf16.gmra.mrb[8].mxu0 %v7388_v7  ;;  %5975 = vmatprep.mubr.bf16.mxu1 %v7103_v15 }
  0xb4   : > { %5943 = vmatprep.mubr.bf16.mxu0 %v7395_v18 }
  0xba   : > { %5976 = vmatmul.mubr.bf16.gmra.mrb[28].mxu1 %v7142_v41 }
  0xbb   : > { %5944 = vmatmul.mubr.bf16.gmra.mrb[12].mxu0 %v7410_v43 }
  0xde   : > { %v1980_v7 = vpop.permute.xlu0 %1979 }
  0xe1   : > { %v1990_v15 = vpop.permute.xlu1 %1989 }
  0xe5   : > { %v1985_v37 = vpop.permute.xlu0 %1984 }
  0xe6   : > { %v1995_v18 = vpop.permute.xlu1 %1994 }
  0xe9   : > { %v7616_v21 = vpop.permute.xlu0 %1999 }
  0xed   : > { %v7620_v47 = vpop.permute.xlu1 %2004 }
  0xee   : > { %v7626_v46 = vpop.permute.xlu0 %2009 }
  0xf1   : > { %v7628_v50 = vpop.permute.xlu1 %2014 }
  0xf5   : > { %v7643_v27 = vpop.permute.xlu0 %2019 }
  0xf6   : > { %v7646_v55 = vpop.permute.xlu1 %2024 }
 0x155   : > { %v5773_v25 = vpop.f32.mrb[0].mxu1 }
 0x156   : > { %v870_v36 = vpop.f32.mrb[1].mxu1 }
 0x157   : > { %v5774_v42 = vpop.f32.mrb[2].mxu1 }
 0x158   : > { %v873_v51 = vpop.f32.mrb[3].mxu1 }
 0x15d   : > { %v7598_v6 = vpop.f32.mrb[4].mxu1 }
 0x15e   : > { %v7600_v58 = vpop.f32.mrb[5].mxu1 }
 0x15f   : > { %v7602_v13 = vpop.f32.mrb[6].mxu1 }
 0x160   : > { %v7604_v8 = vpop.f32.mrb[7].mxu1 }
 0x165   : > { %v7606_v20 = vpop.f32.mrb[8].mxu1 }
 0x166   : > { %v7608_v41 = vpop.f32.mrb[9].mxu1 }
 0x167   : > { %v7610_v4 = vpop.f32.mrb[10].mxu1 }
 0x168   : > { %v7612_v31 = vpop.f32.mrb[11].mxu1 }
 0x16d   : > { %v7614_v43 = vpop.f32.mrb[12].mxu1 }
 0x16e   : > { %v7618_v24 = vpop.f32.mrb[13].mxu1 }
 0x16f   : > { %v7622_v30 = vpop.f32.mrb[14].mxu1 }
 0x170   : > { %v7624_v14 = vpop.f32.mrb[15].mxu1 }
 0x175   : > { %v5965_v23 = vpop.f32.mrb[16].mxu1 }
 0x176   : > { %v5933_v48 = vpop.f32.mrb[0].mxu0  ;;  %2297 = vst [vmem:[%s7631_s18 + $0x10] sm:$0xff] %v5965_v23  ;;  %v2231_v34 = vpop.f32.mrb[17].mxu1  ;;  %v2335_v16 = vmul.f32 %v5965_v23, %v5965_v23 }
 0x177   : > { %v6267_v28 = vadd.f32 %v5933_v48, %v5773_v25  ;;  %v1881_v35 = vpop.f32.mrb[1].mxu0  ;;  %2295 = vst [vmem:[%s7631_s18] sm:$0xff] %v2231_v34  ;;  %v2333_v33 = vmul.f32 %v2231_v34, %v2231_v34  ;;  %v5966_v62 = vpop.f32.mrb[18].mxu1 }
 0x178   : > { %v6268_v60 = vadd.f32 %v1881_v35, %v870_v36  ;;  %v5934_v56 = vpop.f32.mrb[2].mxu0  ;;  %2298 = vst [vmem:[%s7631_s18 + $0x18] sm:$0xff] %v5966_v62  ;;  %v2234_v39 = vpop.f32.mrb[19].mxu1  ;;  %v2336_v63 = vmul.f32 %v5966_v62, %v5966_v62 }
 0x179   : > { %1963 = vst [vmem:[%s7637_s19 + $0x10] sm:$0xff] %v6267_v28  ;;  %v6269_v44 = vadd.f32 %v5934_v56, %v5774_v42  ;;  %v1884_v26 = vpop.f32.mrb[3].mxu0  ;;  %2296 = vst [vmem:[%s7631_s18 + $0x8] sm:$0xff] %v2234_v39  ;;  %v2311_v10 = vadd.f32 %v2234_v39, %v2231_v34  ;;  %v2334_v29 = vmul.f32 %v2234_v39, %v2234_v39 }
 0x17a   : > { %1961 = vst [vmem:[%s7637_s19] sm:$0xff] %v6268_v60  ;;  %v2057_v11 = vmul.f32 %v6268_v60, %v1980_v7  ;;  %v6270_v38 = vadd.f32 %v1884_v26, %v873_v51  ;;  %v2059_v52 = vmul.f32 %v6267_v28, %v1990_v15  ;;  %v2030_v26 = vpop.permute.xlu0 %2029 }
 0x17b   : > { %1964 = vst [vmem:[%s7637_s19 + $0x18] sm:$0xff] %v6269_v44  ;;  %v2312_v22 = vadd.f32 %v5965_v23, %v2311_v10  ;;  %v2349_v12 = vadd.f32 %v2334_v29, %v2333_v33  ;;  %v2060_v59 = vmul.f32 %v6269_v44, %v1995_v18 }
 0x17c   : > { %1962 = vst [vmem:[%s7637_s19 + $0x8] sm:$0xff] %v6270_v38  ;;  %v2058_v45 = vmul.f32 %v6270_v38, %v1985_v37  ;;  %v2095_v19 = vmul.f32 %v6268_v60, %v2057_v11  ;;  %v2097_v51 = vmul.f32 %v6267_v28, %v2059_v52 }
 0x17d   : > { %v2350_v49 = vadd.f32 %v2349_v12, %v2335_v16  ;;  %v5969_v61 = vpop.f32.mrb[20].mxu1  ;;  %v2313_v17 = vadd.f32 %v5966_v62, %v2312_v22  ;;  %v2098_v48 = vmul.f32 %v6269_v44, %v2060_v59 }
 0x17e   : > { %v2073_v57 = vadd.f32 %v2058_v45, %v2057_v11  ;;  %v2096_v9 = vmul.f32 %v6270_v38, %v2058_v45  ;;  %v5937_v40 = vpop.f32.mrb[4].mxu0  ;;  %2301 = vst [vmem:[%s7631_s18 + $0x30] sm:$0xff] %v5969_v61  ;;  %v2247_v53 = vpop.f32.mrb[21].mxu1  ;;  %v2339_v39 = vmul.f32 %v5969_v61, %v5969_v61 }
 0x17f   : > { %v6271_v32 = vadd.f32 %v5937_v40, %v7598_v6  ;;  %v1897_v54 = vpop.f32.mrb[5].mxu0  ;;  %2299 = vst [vmem:[%s7631_s18 + $0x20] sm:$0xff] %v2247_v53  ;;  %v2314_v5 = vadd.f32 %v2313_v17, %v2247_v53  ;;  %v2337_v25 = vmul.f32 %v2247_v53, %v2247_v53  ;;  %v2351_v36 = vadd.f32 %v2350_v49, %v2336_v63  ;;  %v5970_v42 = vpop.f32.mrb[22].mxu1 }
 0x180   : > { %v2074_v7 = vadd.f32 %v2073_v57, %v2059_v52  ;;  %v2111_v15 = vadd.f32 %v2096_v9, %v2095_v19  ;;  %v6272_v37 = vadd.f32 %v1897_v54, %v7600_v58  ;;  %v5938_v18 = vpop.f32.mrb[6].mxu0  ;;  %2302 = vst [vmem:[%s7631_s18 + $0x38] sm:$0xff] %v5970_v42  ;;  %v2250_v23 = vpop.f32.mrb[23].mxu1  ;;  %v2340_v52 = vmul.f32 %v5970_v42, %v5970_v42 }
 0x181   : > { %1967 = vst [vmem:[%s7637_s19 + $0x30] sm:$0xff] %v6271_v32  ;;  %v2352_v6 = vadd.f32 %v2351_v36, %v2337_v25  ;;  %v6273_v34 = vadd.f32 %v5938_v18, %v7602_v13  ;;  %v1900_v35 = vpop.f32.mrb[7].mxu0  ;;  %2300 = vst [vmem:[%s7631_s18 + $0x28] sm:$0xff] %v2250_v23  ;;  %v2315_v33 = vadd.f32 %v2314_v5, %v2250_v23  ;;  %v2035_v38 = vpop.permute.xlu1 %2034 }
 0x182   : > { %v2112_v62 = vadd.f32 %v2111_v15, %v2097_v51  ;;  %1965 = vst [vmem:[%s7637_s19 + $0x20] sm:$0xff] %v6272_v37  ;;  %v2061_v28 = vmul.f32 %v6272_v37, %v7616_v21  ;;  %v2075_v60 = vadd.f32 %v2074_v7, %v2060_v59  ;;  %v6274_v58 = vadd.f32 %v1900_v35, %v7604_v8 }
 0x183   : > { %v2063_v56 = vmul.f32 %v6271_v32, %v7626_v46  ;;  %1968 = vst [vmem:[%s7637_s19 + $0x38] sm:$0xff] %v6273_v34  ;;  %v2316_v16 = vadd.f32 %v5969_v61, %v2315_v33  ;;  %v2338_v44 = vmul.f32 %v2250_v23, %v2250_v23  ;;  %v2064_v21 = vmul.f32 %v6273_v34, %v7628_v50 }
 0x184   : > { %v2076_v13 = vadd.f32 %v2075_v60, %v2061_v28  ;;  %v2099_v10 = vmul.f32 %v6272_v37, %v2061_v28  ;;  %v2113_v29 = vadd.f32 %v2112_v62, %v2098_v48  ;;  %1966 = vst [vmem:[%s7637_s19 + $0x28] sm:$0xff] %v6274_v58  ;;  %v2062_v11 = vmul.f32 %v6274_v58, %v7620_v47 }
 0x185   : > { %v2353_v22 = vadd.f32 %v2352_v6, %v2338_v44  ;;  %v5973_v8 = vpop.f32.mrb[24].mxu1  ;;  %v2317_v12 = vadd.f32 %v5970_v42, %v2316_v16  ;;  %v2101_v9 = vmul.f32 %v6271_v32, %v2063_v56  ;;  %v2102_v36 = vmul.f32 %v6273_v34, %v2064_v21  ;;  %v2040_v34 = vpop.permute.xlu0 %2039 }
 0x186   : > { %v2114_v46 = vadd.f32 %v2113_v29, %v2099_v10  ;;  %v2077_v45 = vadd.f32 %v2076_v13, %v2062_v11  ;;  %v2100_v59 = vmul.f32 %v6274_v58, %v2062_v11  ;;  %v5941_v63 = vpop.f32.mrb[8].mxu0  ;;  %2305 = vst [vmem:[%s7631_s18 + $0x50] sm:$0xff] %v5973_v8  ;;  %v2263_v49 = vpop.f32.mrb[25].mxu1  ;;  %v2343_v60 = vmul.f32 %v5973_v8, %v5973_v8 }
 0x187   : > { %v2354_v61 = vadd.f32 %v2353_v22, %v2339_v39  ;;  %v6275_v17 = vadd.f32 %v5941_v63, %v7606_v20  ;;  %v1913_v47 = vpop.f32.mrb[9].mxu0  ;;  %2303 = vst [vmem:[%s7631_s18 + $0x40] sm:$0xff] %v2263_v49  ;;  %v2318_v19 = vadd.f32 %v2317_v12, %v2263_v49  ;;  %v2341_v50 = vmul.f32 %v2263_v49, %v2263_v49  ;;  %v5974_v57 = vpop.f32.mrb[26].mxu1 }
 0x188   : > { %v2078_v40 = vadd.f32 %v2077_v45, %v2063_v56  ;;  %v2115_v53 = vadd.f32 %v2114_v46, %v2100_v59  ;;  %v6276_v54 = vadd.f32 %v1913_v47, %v7608_v41  ;;  %v5942_v5 = vpop.f32.mrb[10].mxu0  ;;  %2306 = vst [vmem:[%s7631_s18 + $0x58] sm:$0xff] %v5974_v57  ;;  %v2266_v25 = vpop.f32.mrb[27].mxu1  ;;  %v2344_v39 = vmul.f32 %v5974_v57, %v5974_v57 }
 0x189   : > { %1971 = vst [vmem:[%s7637_s19 + $0x50] sm:$0xff] %v6275_v17  ;;  %v2355_v42 = vadd.f32 %v2354_v61, %v2340_v52  ;;  %v6277_v20 = vadd.f32 %v5942_v5, %v7610_v4  ;;  %v1916_v51 = vpop.f32.mrb[11].mxu0  ;;  %2304 = vst [vmem:[%s7631_s18 + $0x48] sm:$0xff] %v2266_v25  ;;  %v2319_v7 = vadd.f32 %v2318_v19, %v2266_v25  ;;  %v2045_v28 = vpop.permute.xlu1 %2044 }
 0x18a   : > { %v2116_v15 = vadd.f32 %v2115_v53, %v2101_v9  ;;  %1969 = vst [vmem:[%s7637_s19 + $0x40] sm:$0xff] %v6276_v54  ;;  %v2065_v32 = vmul.f32 %v6276_v54, %v7643_v27  ;;  %v2079_v37 = vadd.f32 %v2078_v40, %v2064_v21  ;;  %v6278_v41 = vadd.f32 %v1916_v51, %v7612_v31 }
 0x18b   : > { %v2067_v18 = vmul.f32 %v6275_v17, %v2030_v26  ;;  %v2356_v23 = vadd.f32 %v2355_v42, %v2341_v50  ;;  %1972 = vst [vmem:[%s7637_s19 + $0x58] sm:$0xff] %v6277_v20  ;;  %v2068_v48 = vmul.f32 %v6277_v20, %v2035_v38  ;;  %v2320_v6 = vadd.f32 %v5973_v8, %v2319_v7 }
 0x18c   : > { %v2080_v35 = vadd.f32 %v2079_v37, %v2065_v32  ;;  %v2103_v4 = vmul.f32 %v6276_v54, %v2065_v32  ;;  %v2117_v33 = vadd.f32 %v2116_v15, %v2102_v36  ;;  %1970 = vst [vmem:[%s7637_s19 + $0x48] sm:$0xff] %v6278_v41  ;;  %v2066_v62 = vmul.f32 %v6278_v41, %v7646_v55 }
 0x18d   : > { %v2342_v27 = vmul.f32 %v2266_v25, %v2266_v25  ;;  %v5977_v58 = vpop.f32.mrb[28].mxu1  ;;  %v2321_v56 = vadd.f32 %v5974_v57, %v2320_v6  ;;  %v2105_v10 = vmul.f32 %v6275_v17, %v2067_v18  ;;  %v2106_v22 = vmul.f32 %v6277_v20, %v2068_v48  ;;  %v2050_v17 = vpop.permute.xlu0 %2049 }
 0x18e   : > { %v2118_v31 = vadd.f32 %v2117_v33, %v2103_v4  ;;  %v2081_v16 = vadd.f32 %v2080_v35, %v2066_v62  ;;  %v2104_v44 = vmul.f32 %v6278_v41, %v2066_v62  ;;  %v5945_v26 = vpop.f32.mrb[12].mxu0  ;;  %2309 = vst [vmem:[%s7631_s18 + $0x70] sm:$0xff] %v5977_v58  ;;  %v2279_v13 = vpop.f32.mrb[29].mxu1  ;;  %v2347_v36 = vmul.f32 %v5977_v58, %v5977_v58 }
 0x18f   : > { %v2357_v29 = vadd.f32 %v2356_v23, %v2342_v27  ;;  %v6279_v11 = vadd.f32 %v5945_v26, %v7614_v43  ;;  %v1929_v55 = vpop.f32.mrb[13].mxu0  ;;  %2307 = vst [vmem:[%s7631_s18 + $0x60] sm:$0xff] %v2279_v13  ;;  %v2322_v38 = vadd.f32 %v2321_v56, %v2279_v13  ;;  %v5978_v21 = vpop.f32.mrb[30].mxu1  ;;  %v2345_v63 = vmul.f32 %v2279_v13, %v2279_v13 }
 0x190   : > { %v2082_v8 = vadd.f32 %v2081_v16, %v2067_v18  ;;  %v2119_v12 = vadd.f32 %v2118_v31, %v2104_v44  ;;  %v6280_v46 = vadd.f32 %v1929_v55, %v7618_v24  ;;  %v5946_v52 = vpop.f32.mrb[14].mxu0  ;;  %2310 = vst [vmem:[%s7631_s18 + $0x78] sm:$0xff] %v5978_v21  ;;  %v2282_v45 = vpop.f32.mrb[31].mxu1  ;;  %v2348_v6 = vmul.f32 %v5978_v21, %v5978_v21 }
 0x191   : > { %v2358_v59 = vadd.f32 %v2357_v29, %v2343_v60  ;;  %1975 = vst [vmem:[%s7637_s19 + $0x70] sm:$0xff] %v6279_v11  ;;  %v6281_v43 = vadd.f32 %v5946_v52, %v7622_v30  ;;  %v1932_v49 = vpop.f32.mrb[15].mxu0  ;;  %2308 = vst [vmem:[%s7631_s18 + $0x68] sm:$0xff] %v2282_v45  ;;  %v2323_v61 = vadd.f32 %v2322_v38, %v2282_v45  ;;  %v2055_v25 = vpop.permute.xlu1 %2054 }
 0x192   : > { %v2120_v47 = vadd.f32 %v2119_v12, %v2105_v10  ;;  %1973 = vst [vmem:[%s7637_s19 + $0x60] sm:$0xff] %v6280_v46  ;;  %v2069_v19 = vmul.f32 %v6280_v46, %v2040_v34  ;;  %v2083_v50 = vadd.f32 %v2082_v8, %v2068_v48  ;;  %v6282_v24 = vadd.f32 %v1932_v49, %v7624_v14 }
 0x193   : > { %v2071_v57 = vmul.f32 %v6279_v11, %v2050_v17  ;;  %v2359_v9 = vadd.f32 %v2358_v59, %v2344_v39  ;;  %1976 = vst [vmem:[%s7637_s19 + $0x78] sm:$0xff] %v6281_v43  ;;  %v2324_v40 = vadd.f32 %v5977_v58, %v2323_v61  ;;  %v2346_v51 = vmul.f32 %v2282_v45, %v2282_v45 }
 0x194   : > { %v2084_v53 = vadd.f32 %v2083_v50, %v2069_v19  ;;  %v2107_v54 = vmul.f32 %v6280_v46, %v2069_v19  ;;  %v2121_v5 = vadd.f32 %v2120_v47, %v2106_v22  ;;  %1974 = vst [vmem:[%s7637_s19 + $0x68] sm:$0xff] %v6282_v24  ;;  %v2070_v30 = vmul.f32 %v6282_v24, %v2045_v28 }
 0x195   : > { %v2360_v42 = vadd.f32 %v2359_v9, %v2345_v63  ;;  %v2325_v20 = vadd.f32 %v5978_v21, %v2324_v40  ;;  %v2072_v15 = vmul.f32 %v6281_v43, %v2055_v25  ;;  %v2109_v18 = vmul.f32 %v6279_v11, %v2071_v57  ;;  %v2371_v9 = vld [vmem:[%s8727_s3] sm:$0x1] (%p41_p0) }
 0x196   : > { %v2122_v7 = vadd.f32 %v2121_v5, %v2107_v54  ;;  %v2085_v32 = vadd.f32 %v2084_v53, %v2070_v30  ;;  %v2108_v37 = vmul.f32 %v6282_v24, %v2070_v30  ;;  %v6868_v19 = vmov (%p41_p0), 0  }
 0x197   : > { %v2326_v41 = vrot.slane %v2325_v20, 4  ;;  %v2361_v14 = vadd.f32 %v2360_v42, %v2346_v51  ;;  %v2110_v4 = vmul.f32 %v6281_v43, %v2072_v15  ;;  %2383 = vst [vmem:[#allocation3] sm:$0xff] (%p41_p0), %v6868_v19  ;;  %2384 = vst [vmem:[#allocation3 + $0x8] sm:$0xff] (%p41_p0), %v6868_v19 }
 0x198   : > { %v2086_v23 = vadd.f32 %v2085_v32, %v2071_v57  ;;  %v2123_v48 = vadd.f32 %v2122_v7, %v2108_v37  ;;  %2385 = vst [vmem:[#allocation3 + $0x150] sm:$0xff] (%p41_p0), %v6868_v19  ;;  %2386 = vst [vmem:[#allocation3 + $0x158] sm:$0xff] (%p41_p0), %v6868_v19 }
 0x199   : > { %v2327_v34 = vadd.f32 %v2326_v41, %v2325_v20  ;;  %v2362_v35 = vadd.f32 %v2361_v14, %v2347_v36 }
 0x19a   : > { %v2087_v33 = vadd.f32 %v2086_v23, %v2072_v15  ;;  %v2124_v62 = vadd.f32 %v2123_v48, %v2109_v18 }
 0x19b   : > { %v2328_v28 = vrot.slane %v2327_v34, 2  ;;  %v2363_v60 = vadd.f32 %v2362_v35, %v2348_v6 }
 0x19c   : > { %v2088_v27 = vrot.slane %v2087_v33, 4  ;;  %v2125_v58 = vadd.f32 %v2124_v62, %v2110_v4 }
 0x19d   : > { %v2329_v56 = vadd.f32 %v2328_v28, %v2327_v34  ;;  %v2364_v31 = vrot.slane %v2363_v60, 4 }
 0x19e   : > { %v2089_v39 = vadd.f32 %v2088_v27, %v2087_v33  ;;  %v2126_v16 = vrot.slane %v2125_v58, 4 }
 0x19f   : > { %v2330_v44 = vrot.slane %v2329_v56, 1  ;;  %v2365_v26 = vadd.f32 %v2364_v31, %v2363_v60 }
 0x1a0   : > { %v2090_v13 = vrot.slane %v2089_v39, 2  ;;  %v2127_v10 = vadd.f32 %v2126_v16, %v2125_v58 }
 0x1a1   : > { %v2331_v29 = vadd.f32 %v2330_v44, %v2329_v56  ;;  %v2366_v11 = vrot.slane %v2365_v26, 2 }
 0x1a2   : > { %v2091_v55 = vadd.f32 %v2090_v13, %v2089_v39  ;;  %v2128_v38 = vrot.slane %v2127_v10, 2 }
 0x1a3   : > { %v7691_v1 = vadd.f32 %v6833_v1, %v2331_v29   ;;  %v2367_v22 = vadd.f32 %v2366_v11, %v2365_v26 }
 0x1a4   : > { %v2092_v8 = vrot.slane %v2091_v55, 1  ;;  %v2129_v12 = vadd.f32 %v2128_v38, %v2127_v10 }
 0x1a5   : > { %8749 = vst [vmem:[#allocation5_spill] sm:$0xff] %v7691_v1  ;;  %v2368_v46 = vrot.slane %v2367_v22, 1  ;;  %v8755_v21 = vmov %v7691_v1 }
 0x1a6   : > { %v2093_v52 = vadd.f32 %v2092_v8, %v2091_v55  ;;  %v2130_v45 = vrot.slane %v2129_v12, 1  ;;  %v8756_v1 = vmov %v8755_v21  ;;  %43 = sbr.rel (!%p41_p0) target bundleno = 1 (0x1), region = 121 }
 0x1a7   : > { %v2369_v59 = vadd.f32 %v2368_v46, %v2367_v22 }
 0x1a8   : > { %v2094_v63 = vadd.f32 %v6841_v3, %v2093_v52   ;;  %v2131_v43 = vadd.f32 %v2130_v45, %v2129_v12 }
 0x1a9   : > { %v7695_v0 = vadd.f32 %v6829_v0, %v2369_v59  }
 0x1aa   : > { %v2132_v61 = vadd.f32 %v6837_v2, %v2131_v43   ;;  %v8758_v3 = vmov %v2094_v63 }
 0x1ab   : > { %8751 = vst [vmem:[#allocation6_spill] sm:$0xff] %v7695_v0  ;;  %v8753_v49 = vmov %v7695_v0  ;;  %v2373_v3 = vmul.f32 (%p41_p0), 0.001953125, %v2094_v63 }
 0x1ac   : > { %v8754_v0 = vmov %v8753_v49  ;;  %v8757_v2 = vmov %v2132_v61  ;;  %v2374_v17 = vmul.f32 (%p41_p0), 0.001953125, %v2132_v61 }
 0x1ad   :  { %v2375_v47 = vmul.f32 %v2373_v3, %v2373_v3  ;;  %v7719_v0 = vld [vmem:[%s8728_s4] sm:$0x1] }
 0x1af   :  { %v2376_v50 = vsub.f32 %v2374_v17, %v2375_v47 }
 0x1b1   :  { %v2377_v24 = vmax.f32 %v2376_v50, 0.0 }
 0x1b3   :  { %v2378_v57 = vadd.f32 1e-05, %v2377_v24 }
 0x1b5   :  { %6705 = vrsqrt.f32 %v2378_v57 }
 0x1bf   :  { %v6706_v40 = vpop.eup %6705 }
 0x1c0   :  { %v7714_v53 = vmul.f32 %v6706_v40, %v2371_v9 }
 0x1c2   :  { %v7722_v1 = vmul.f32 %v7714_v53, %v2373_v3 }
 0x1c4   :  { %v2382_v2 = vsub.f32 %v7719_v0, %v7722_v1 }
 0x1c5 LB: > { %v6869_v54 = vmov 0   ;;  %s7732_s3 = sshll.u32 %s6849_s2, 7  ;;  %v2428_v6 = vlaneseq  ;;  %s2392_s2 = sadd.s32 1, %s6849_s2   ;;  %s6849_s2 = sphi %s7726_s2, %s2392_s2  }
 0x1c6   : > { %6708 = vset.pattern.permute.xlu1 %v6869_v54  ;;  %6707 = vset.pattern.permute.xlu0 %v6869_v54  ;;  %s2394_s22 = scalar_lea.vmem %s8724_s0, %s7732_s3  ;;  %s7741_s24 = scalar_lea.vmem [#allocation2], %s7732_s3 }
 0x1c7   : > { %v2397_v5 = vld [vmem:[%s2394_s22 + $0x10] sm:$0xff]  ;;  %v2395_v30 = vld [vmem:[%s2394_s22] sm:$0xff]  ;;  %v2398_v25 = vld [vmem:[%s2394_s22 + $0x18] sm:$0xff]  ;;  %v2429_v34 = vshrl.u32 %v2428_v6, 7  ;;  %s2582_s25 = sadd.s32 32, %s7732_s3  ;;  %p2389_p1 = scmp.ge.s32.totalorder %s2392_s2, 5  }
 0x1c8   : > { %2498 = vperm.xlu1 %6708, %v2397_v5   ;;  %2488 = vperm.xlu0 %6707, %v2395_v30   ;;  %v2396_v36 = vld [vmem:[%s2394_s22 + $0x8] sm:$0xff]  ;;  %v2399_v20 = vld [vmem:[%s2394_s22 + $0x20] sm:$0xff]  ;;  %v2402_v51 = vld [vmem:[%s2394_s22 + $0x38] sm:$0xff]  ;;  %s7774_s26 = sshra.s32 %s2582_s25, 4  ;;  %s7822_s29 = smov (%p2389_p1), 0  }
 0x1c9   : > { %v2400_v42 = vld [vmem:[%s2394_s22 + $0x28] sm:$0xff]  ;;  %v2401_v7 = vld [vmem:[%s2394_s22 + $0x30] sm:$0xff]  ;;  %v2403_v32 = vld [vmem:[%s2394_s22 + $0x40] sm:$0xff]  ;;  %v7738_v35 = vsub.s32 0, %v2429_v34  ;;  %s5151_s27 = sshll.u32 %s7774_s26, 3 }
 0x1ca   : > { %v2404_v15 = vld [vmem:[%s2394_s22 + $0x48] sm:$0xff]  ;;  %v2406_v37 = vld [vmem:[%s2394_s22 + $0x58] sm:$0xff]  ;;  %v2405_v41 = vld [vmem:[%s2394_s22 + $0x50] sm:$0xff]  ;;  %s7790_s28 = scalar_lea.vmem [#allocation3], %s5151_s27 }
 0x1cb   : > { %v2408_v14 = vld [vmem:[%s2394_s22 + $0x68] sm:$0xff]  ;;  %v2407_v18 = vld [vmem:[%s2394_s22 + $0x60] sm:$0xff]  ;;  %v2410_v23 = vld [vmem:[%s2394_s22 + $0x78] sm:$0xff]  ;;  %8759 = vst [vmem:[#allocation7_spill] sm:$0xff] %v7738_v35  ;;  %v7746_v33 = vrot.slane %v7714_v53, %v7738_v35  ;;  %v7755_v27 = vrot.slane %v2382_v2, %v7738_v35 }
 0x1cc   : > { %2503 = vperm.xlu1 %6708, %v2398_v25   ;;  %2493 = vperm.xlu0 %6707, %v2396_v36   ;;  %v2409_v48 = vld [vmem:[%s2394_s22 + $0x70] sm:$0xff]  ;;  %v2412_v62 = vld [vmem:[%s7741_s24] sm:$0xff]  ;;  %v2415_v28 = vld [vmem:[%s7741_s24 + $0x18] sm:$0xff] }
 0x1cd   : > { %v2414_v4 = vld [vmem:[%s7741_s24 + $0x10] sm:$0xff]  ;;  %v2413_v60 = vld [vmem:[%s7741_s24 + $0x8] sm:$0xff]  ;;  %v2432_v31 = vmul.f32 %v7746_v33, %v2412_v62  ;;  %v2435_v39 = vmul.f32 %v7746_v33, %v2415_v28  ;;  %v2416_v44 = vld [vmem:[%s7741_s24 + $0x20] sm:$0xff] }
 0x1ce   : > { %v2417_v58 = vld [vmem:[%s7741_s24 + $0x28] sm:$0xff]  ;;  %v2434_v56 = vmul.f32 %v7746_v33, %v2414_v4  ;;  %v2433_v16 = vmul.f32 %v7746_v33, %v2413_v60  ;;  %v2436_v13 = vmul.f32 %v7746_v33, %v2416_v44  ;;  %v2419_v10 = vld [vmem:[%s7741_s24 + $0x38] sm:$0xff]  ;;  %v2418_v22 = vld [vmem:[%s7741_s24 + $0x30] sm:$0xff] }
 0x1cf   : > { %v2437_v26 = vmul.f32 %v7746_v33, %v2417_v58  ;;  %v2454_v11 = vadd.f32 %v7755_v27, %v2432_v31  ;;  %v2457_v55 = vadd.f32 %v7755_v27, %v2435_v39  ;;  %v2439_v12 = vmul.f32 %v7746_v33, %v2419_v10  ;;  %v2421_v17 = vld [vmem:[%s7741_s24 + $0x48] sm:$0xff]  ;;  %v2420_v47 = vld [vmem:[%s7741_s24 + $0x40] sm:$0xff] }
 0x1d0   : > { %2513 = vperm.xlu1 %6708, %v2400_v42   ;;  %2508 = vperm.xlu0 %6707, %v2399_v20   ;;  %v2456_v29 = vadd.f32 %v7755_v27, %v2434_v56  ;;  %v2455_v38 = vadd.f32 %v7755_v27, %v2433_v16  ;;  %v2458_v45 = vadd.f32 %v7755_v27, %v2436_v13  ;;  %v2423_v20 = vld [vmem:[%s7741_s24 + $0x58] sm:$0xff]  ;;  %v2425_v62 = vld [vmem:[%s7741_s24 + $0x68] sm:$0xff]  ;;  %v2424_v28 = vld [vmem:[%s7741_s24 + $0x60] sm:$0xff] }
 0x1d1   : > { %v2459_v8 = vadd.f32 %v7755_v27, %v2437_v26  ;;  %v2438_v59 = vmul.f32 %v7746_v33, %v2418_v22  ;;  %v2470_v43 = vmax.f32 %v2454_v11, 0.0  ;;  %v2473_v61 = vmax.f32 %v2457_v55, 0.0  ;;  %v2427_v11 = vld [vmem:[%s7741_s24 + $0x78] sm:$0xff]  ;;  %v2426_v55 = vld [vmem:[%s7741_s24 + $0x70] sm:$0xff] }
 0x1d2   : > { %v2472_v63 = vmax.f32 %v2456_v29, 0.0  ;;  %v2471_v3 = vmax.f32 %v2455_v38, 0.0  ;;  %v2461_v50 = vadd.f32 %v7755_v27, %v2439_v12  ;;  %v2474_v9 = vmax.f32 %v2458_v45, 0.0 }
 0x1d3   : > { %v2475_v19 = vmax.f32 %v2459_v8, 0.0  ;;  %v2460_v40 = vadd.f32 %v7755_v27, %v2438_v59  ;;  %v2441_v54 = vmul.f32 %v7746_v33, %v2421_v17  ;;  %v2440_v5 = vmul.f32 %v7746_v33, %v2420_v47 }
 0x1d4   : > { %2523 = vperm.xlu1 %6708, %v2402_v51   ;;  %2518 = vperm.xlu0 %6707, %v2401_v7   ;;  %v2422_v51 = vld [vmem:[%s7741_s24 + $0x50] sm:$0xff]  ;;  %v2445_v16 = vmul.f32 %v7746_v33, %v2425_v62  ;;  %v2444_v44 = vmul.f32 %v7746_v33, %v2424_v28 }
 0x1d5   : > { %v2476_v34 = vmax.f32 %v2460_v40, 0.0  ;;  %v2462_v4 = vadd.f32 %v7755_v27, %v2440_v5 }
 0x1d6   : > { %v2466_v45 = vadd.f32 %v7755_v27, %v2444_v44 }
 0x1d7   : > { %v2478_v29 = vmax.f32 %v2462_v4, 0.0 }
 0x1d8   : > { %2533 = vperm.xlu1 %6708, %v2404_v15   ;;  %2528 = vperm.xlu0 %6707, %v2403_v32  }
 0x1dc   : > { %2543 = vperm.xlu1 %6708, %v2406_v37   ;;  %2538 = vperm.xlu0 %6707, %v2405_v41   ;;  %v2477_v41 = vmax.f32 %v2461_v50, 0.0  ;;  %v2482_v50 = vmax.f32 %v2466_v45, 0.0 }
 0x1e0   : > { %2553 = vperm.xlu1 %6708, %v2408_v14   ;;  %2548 = vperm.xlu0 %6707, %v2407_v18   ;;  %v2463_v14 = vadd.f32 %v7755_v27, %v2441_v54  ;;  %v2443_v18 = vmul.f32 %v7746_v33, %v2423_v20 }
 0x1e2   : > { %v2465_v31 = vadd.f32 %v7755_v27, %v2443_v18  ;;  %v2479_v10 = vmax.f32 %v2463_v14, 0.0 }
 0x1e4   : > { %2563 = vperm.xlu1 %6708, %v2410_v23   ;;  %2558 = vperm.xlu0 %6707, %v2409_v48   ;;  %v2442_v23 = vmul.f32 %v7746_v33, %v2422_v51  ;;  %v2481_v12 = vmax.f32 %v2465_v31, 0.0 }
 0x1e6   : > { %v2464_v39 = vadd.f32 %v7755_v27, %v2442_v23 }
 0x247   : > { %v2499_v46 = vpop.permute.xlu1 %2498  ;;  %v2489_v52 = vpop.permute.xlu0 %2488 }
 0x248   : > { %v2568_v30 = vmul.f32 %v2499_v46, %v2472_v63  ;;  %v2566_v25 = vmul.f32 %v2489_v52, %v2470_v43  ;;  %v2480_v46 = vmax.f32 %v2464_v39, 0.0  ;;  %v2467_v52 = vadd.f32 %v7755_v27, %v2445_v16 }
 0x249   : > { %v2447_v43 = vmul.f32 %v7746_v33, %v2427_v11 }
 0x24b   : > { %v2504_v24 = vpop.permute.xlu1 %2503  ;;  %v2494_v57 = vpop.permute.xlu0 %2493 }
 0x24c   : > { %v2569_v36 = vmul.f32 %v2504_v24, %v2473_v61  ;;  %v2567_v42 = vmul.f32 %v2494_v57, %v2471_v3  ;;  %v2446_v61 = vmul.f32 %v7746_v33, %v2426_v55 }
 0x24e   : > { %v2584_v7 = vpack.c.bf16 %v2569_v36, %v2568_v30  ;;  %v2583_v15 = vpack.c.bf16 %v2567_v42, %v2566_v25  ;;  %v2468_v40 = vadd.f32 %v7755_v27, %v2446_v61 }
 0x24f   : > { %v2514_v32 = vpop.permute.xlu1 %2513  ;;  %v2509_v37 = vpop.permute.xlu0 %2508 }
 0x250   : > { %2596 = vst [vmem:[%s7790_s28 + $0x8] sm:$0xff] %v2584_v7  ;;  %2595 = vst [vmem:[%s7790_s28] sm:$0xff] %v2583_v15  ;;  %v2571_v48 = vmul.f32 %v2514_v32, %v2475_v19  ;;  %v2570_v6 = vmul.f32 %v2509_v37, %v2474_v9  ;;  %v2483_v19 = vmax.f32 %v2467_v52, 0.0  ;;  %v2469_v9 = vadd.f32 %v7755_v27, %v2447_v43 }
 0x251   : > { %v2484_v42 = vmax.f32 %v2468_v40, 0.0  ;;  %v7818_v27 = vmov (%p2389_p1), 0.0  }
 0x252   : > { %v2585_v60 = vpack.c.bf16 %v2571_v48, %v2570_v6  ;;  %v2485_v36 = vmax.f32 %v2469_v9, 0.0 }
 0x253   : > { %v2524_v58 = vpop.permute.xlu1 %2523  ;;  %v2519_v56 = vpop.permute.xlu0 %2518 }
 0x254   : > { %2597 = vst [vmem:[%s7790_s28 + $0x10] sm:$0xff] %v2585_v60  ;;  %v2573_v26 = vmul.f32 %v2524_v58, %v2477_v41  ;;  %v2572_v13 = vmul.f32 %v2519_v56, %v2476_v34  ;;  %v7820_v41 = vmov (%p2389_p1), 0.0  }
 0x256   : > { %v2586_v38 = vpack.c.bf16 %v2573_v26, %v2572_v13 }
 0x257   : > { %v2534_v22 = vpop.permute.xlu1 %2533  ;;  %v2529_v8 = vpop.permute.xlu0 %2528 }
 0x258   : > { %2598 = vst [vmem:[%s7790_s28 + $0x18] sm:$0xff] %v2586_v38  ;;  %v2575_v59 = vmul.f32 %v2534_v22, %v2479_v10  ;;  %v2574_v63 = vmul.f32 %v2529_v8, %v2478_v29 }
 0x25a   : > { %v2587_v3 = vpack.c.bf16 %v2575_v59, %v2574_v63 }
 0x25b   : > { %v2544_v17 = vpop.permute.xlu1 %2543  ;;  %v2539_v47 = vpop.permute.xlu0 %2538 }
 0x25c   : > { %2599 = vst [vmem:[%s7790_s28 + $0x20] sm:$0xff] %v2587_v3  ;;  %v2577_v24 = vmul.f32 %v2544_v17, %v2481_v12  ;;  %v2576_v57 = vmul.f32 %v2539_v47, %v2480_v46 }
 0x25e   : > { %v2588_v54 = vpack.c.bf16 %v2577_v24, %v2576_v57 }
 0x25f   : > { %v2554_v5 = vpop.permute.xlu1 %2553  ;;  %v2549_v30 = vpop.permute.xlu0 %2548 }
 0x260   : > { %2600 = vst [vmem:[%s7790_s28 + $0x28] sm:$0xff] %v2588_v54  ;;  %v2579_v25 = vmul.f32 %v2554_v5, %v2483_v19  ;;  %v2578_v33 = vmul.f32 %v2549_v30, %v2482_v50 }
 0x262   : > { %v2589_v20 = vpack.c.bf16 %v2579_v25, %v2578_v33  ;;  %2391 = sbr.rel (!%p2389_p1) target bundleno = 453 (0x1c5), region = 132 }
 0x263   : > { %v2564_v51 = vpop.permute.xlu1 %2563  ;;  %v2559_v7 = vpop.permute.xlu0 %2558 }
 0x264   : > { %2601 = vst [vmem:[%s7790_s28 + $0x30] sm:$0xff] %v2589_v20  ;;  %v2581_v15 = vmul.f32 %v2564_v51, %v2485_v36  ;;  %v2580_v32 = vmul.f32 %v2559_v7, %v2484_v42 }
 0x266   : > { %v2590_v37 = vpack.c.bf16 %v2581_v15, %v2580_v32 }
 0x268   : > { %2602 = vst [vmem:[%s7790_s28 + $0x38] sm:$0xff] %v2590_v37 }
 0x269 LB: > { %8760 = vst [vmem:[#allocation8_spill] sm:$0xff] %v6853_v27  ;;  %8761 = vst [vmem:[#allocation9_spill] sm:$0xff] %v6857_v41  ;;  %v6711_v53 = vld [vmem:[%s8729_s5 + $0x40] sm:$0xff]   ;;  %v6713_v1 = vld [vmem:[%s8729_s5 + $0x48] sm:$0xff]   ;;  %s7849_s21 = sshll.u32 %s6861_s29, 7  ;;  %v6870_v41 = vmov 0   ;;  %s6861_s29 = sphi %s7822_s29, %s2608_s29   ;;  %v6857_v41 = vphi %v7820_v41, %v8772_v41   ;;  %v6853_v27 = vphi %v7818_v27, %v8771_v27  }
 0x26a   : > { %v6712_v0 = vld [vmem:[%s8729_s5 + $0x100] sm:$0xff]   ;;  %5979 = vmatprep.subr.bf16.mxu1 %v6711_v53  ;;  %v6714_v2 = vld [vmem:[%s8729_s5 + $0x108] sm:$0xff]   ;;  %v6715_v14 = vld [vmem:[%s8729_s5 + $0x50] sm:$0xff]   ;;  %s2612_s2 = sshra.s32 %s7849_s21, 4  ;;  %s8212_s16 = scalar_lea.vmem %s8724_s0, %s7849_s21  ;;  %6709 = vset.pattern.permute.xlu0 %v6870_v41 }
 0x26b   : > { %6107 = vmatprep.subr.bf16.mxu0 %v6712_v0  ;;  %5980 = vmatpush3.bf16.msra.mxu1 %v6711_v53  ;;  %v6716_v18 = vld [vmem:[%s8729_s5 + $0x110] sm:$0xff]   ;;  %v6717_v23 = vld [vmem:[%s8729_s5 + $0x58] sm:$0xff]   ;;  %s5153_s24 = sshll.u32 %s2612_s2, 3  ;;  %v6719_v6 = vld [vmem:[%s8729_s5 + $0x60] sm:$0xff]   ;;  %s8473_s28 = scalar_lea.vmem [#allocation2], %s7849_s21 }
 0x26c   : > { %6108 = vmatpush3.bf16.msra.mxu0 %v6712_v0  ;;  %5981 = vmatprep.subr.bf16.mxu1 %v6713_v1  ;;  %v6718_v48 = vld [vmem:[%s8729_s5 + $0x118] sm:$0xff]   ;;  %v6720_v34 = vld [vmem:[%s8729_s5 + $0x120] sm:$0xff]   ;;  %v6721_v4 = vld [vmem:[%s8729_s5 + $0x68] sm:$0xff]   ;;  %s7870_s12 = scalar_lea.vmem [#allocation3], %s5153_s24  ;;  %s2608_s29 = sadd.s32 1, %s6861_s29  }
 0x26d   : > { %6109 = vmatprep.subr.bf16.mxu0 %v6714_v2  ;;  %v6722_v58 = vld [vmem:[%s8729_s5 + $0x128] sm:$0xff]   ;;  %v6723_v16 = vld [vmem:[%s8729_s5 + $0x70] sm:$0xff]   ;;  %v6725_v26 = vld [vmem:[%s8729_s5 + $0x78] sm:$0xff]   ;;  %6710 = vset.pattern.permute.xlu1 %v6870_v41  ;;  %p2605_p2 = scmp.ge.s32.totalorder %s2608_s29, 5  }
 0x26e   : > { %v6724_v44 = vld [vmem:[%s8729_s5 + $0x130] sm:$0xff]   ;;  %v6726_v13 = vld [vmem:[%s8729_s5 + $0x138] sm:$0xff]   ;;  %v6727_v29 = vld [vmem:[%s8729_s5] sm:$0xff]  }
 0x26f   : > { %5982 = vmatpush3.bf16.msra.mxu1 %v6713_v1  ;;  %v7873_v62 = vld [vmem:[%s7870_s12] sm:$0xff]  ;;  %v7876_v28 = vld [vmem:[%s7870_s12 + $0x8] sm:$0xff]  ;;  %v7879_v60 = vld [vmem:[%s7870_s12 + $0x10] sm:$0xff] }
 0x270   : > { %6110 = vmatpush3.bf16.msra.mxu0 %v6714_v2  ;;  %5983 = vmatprep.subr.bf16.mxu1 %v6715_v14  ;;  %v2671_v56 = vrot.slane %v7873_v62, 7  ;;  %v2672_v31 = vrot.slane %v7876_v28, 7  ;;  %v2674_v10 = vrot.slane %v7879_v60, 7  ;;  %v7905_v11 = vld [vmem:[%s7870_s12 + $0x18] sm:$0xff]  ;;  %v6728_v55 = vld [vmem:[%s8729_s5 + $0x140] sm:$0xff]   ;;  %v6729_v8 = vld [vmem:[%s8729_s5 + $0x8] sm:$0xff]  }
 0x271   : > { %6111 = vmatprep.subr.bf16.mxu0 %v6716_v18  ;;  %6123 = vmatprep.mubr.bf16.mxu0 %v7879_v60  ;;  %v2676_v38 = vrot.slane %v7905_v11, 7  ;;  %v7916_v12 = vld [vmem:[%s7870_s12 + $0x20] sm:$0xff]  ;;  %v6730_v46 = vld [vmem:[%s8729_s5 + $0x148] sm:$0xff]   ;;  %v6731_v59 = vld [vmem:[%s8729_s5 + $0x10] sm:$0xff]   ;;  %v2843_v19 = vshrl.u32 %v7873_v62, 16  ;;  %v2851_v24 = vshrl.u32 %v7876_v28, 16 }
 0x272   : > { %v2673_v39 = vsel %vm145_vm0, %v2671_v56, %v2672_v31  ;;  %v2675_v22 = vsel %vm145_vm0, %v2672_v31, %v2674_v10  ;;  %v2678_v45 = vrot.slane %v7916_v12, 7  ;;  %v7928_v63 = vld [vmem:[%s7870_s12 + $0x28] sm:$0xff]  ;;  %v6732_v43 = vld [vmem:[%s8729_s5 + $0x150] sm:$0xff]   ;;  %v6733_v17 = vld [vmem:[%s8729_s5 + $0x18] sm:$0xff]   ;;  %v2846_v9 = vshll.u32 %v7873_v62, 16 }
 0x273   : > { %5984 = vmatpush3.bf16.msra.mxu1 %v6715_v14  ;;  %5995 = vmatprep.mubr.bf16.mxu1 %v2673_v39  ;;  %v2677_v52 = vsel %vm145_vm0, %v2674_v10, %v2676_v38  ;;  %v2680_v61 = vrot.slane %v7928_v63, 7  ;;  %v7940_v47 = vld [vmem:[%s7870_s12 + $0x30] sm:$0xff]  ;;  %v6734_v50 = vld [vmem:[%s8729_s5 + $0x158] sm:$0xff]   ;;  %v8740_v40 = vshll.u32 %v7876_v28, 16  ;;  %v7953_v5 = vshrl.u32 %v7879_v60, 16  ;;  %v6735_v30 = vld [vmem:[%s8729_s5 + $0x20] sm:$0xff]  }
 0x274   : > { %6112 = vmatpush3.bf16.msra.mxu0 %v6716_v18  ;;  %5985 = vmatprep.subr.bf16.mxu1 %v6717_v23  ;;  %v2679_v3 = vsel %vm145_vm0, %v2676_v38, %v2678_v45  ;;  %v2682_v54 = vrot.slane %v7940_v47, 7  ;;  %v7959_v25 = vshll.u32 %v7879_v60, 16  ;;  %v7962_v33 = vld [vmem:[%s7870_s12 + $0x38] sm:$0xff]  ;;  %v6736_v36 = vld [vmem:[%s8729_s5 + $0x160] sm:$0xff]   ;;  %v2845_v42 = vrot.slane %v2843_v19, 6  ;;  %v6737_v37 = vld [vmem:[%s8729_s5 + $0x28] sm:$0xff]  }
 0x275   : > { %6113 = vmatprep.subr.bf16.mxu0 %v6718_v48  ;;  %v2681_v57 = vsel %vm145_vm0, %v2678_v45, %v2680_v61  ;;  %v7970_v20 = vshrl.u32 %v7905_v11, 16  ;;  %v2684_v51 = vrot.slane %v7962_v33, 7  ;;  %v2848_v7 = vrot.slane %v2846_v9, 7  ;;  %v7987_v1 = vld [vmem:[%s7870_s12 + $0x40] sm:$0xff]  ;;  %v6738_v2 = vld [vmem:[%s8729_s5 + $0x168] sm:$0xff]  }
 0x276   : > { %v7975_v15 = vshll.u32 %v7905_v11, 16  ;;  %v2683_v32 = vsel %vm145_vm0, %v2680_v61, %v2682_v54  ;;  %v2853_v53 = vrot.slane %v2851_v24, 6  ;;  %v7984_v0 = vshll.u32 %v7916_v12, 16  ;;  %v8004_v60 = vld [vmem:[%s7870_s12 + $0x48] sm:$0xff]  ;;  %v6759_v41 = vld [vmem:[%s8729_s5 + $0xc0] sm:$0xff]  }
 0x277   : > { %5986 = vmatpush3.bf16.msra.mxu1 %v6717_v23  ;;  %v2856_v14 = vrot.slane %v8740_v40, 7  ;;  %v2685_v18 = vsel %vm145_vm0, %v2682_v54, %v2684_v51  ;;  %v3670_v23 = vrot.slane %v7959_v25, 1  ;;  %v2865_v56 = vrot.slane %v7959_v25, 7 }
 0x278   : > { %6114 = vmatpush3.bf16.msra.mxu0 %v6718_v48  ;;  %5987 = vmatprep.subr.bf16.mxu1 %v6719_v6  ;;  %v3672_v48 = vrot.slane %v7975_v15, 1  ;;  %v3675_v31 = vrot.slane %v7984_v0, 1  ;;  %v2849_v39 = vor.u32 %v2848_v7, %v2845_v42  ;;  %v8018_v10 = vshrl.u32 %v7916_v12, 16 }
 0x279   : > { %6115 = vmatprep.subr.bf16.mxu0 %v6720_v34  ;;  %v3671_v38 = vor.u32 %v3670_v23, %v7953_v5  ;;  %v2883_v54 = vrot.slane %v7984_v0, 7 }
 0x27a   : > { %v2880_v45 = vrot.slane %v8018_v10, 6 }
 0x27b   : > { %5988 = vmatpush3.bf16.msra.mxu1 %v6719_v6  ;;  %v2862_v6 = vrot.slane %v7953_v5, 6 }
 0x27c   : > { %6116 = vmatpush3.bf16.msra.mxu0 %v6720_v34  ;;  %5989 = vmatprep.subr.bf16.mxu1 %v6721_v4  ;;  %v2686_v34 = vrot.slane %v7987_v1, 7 }
 0x27d   : > { %6117 = vmatprep.subr.bf16.mxu0 %v6722_v58  ;;  %v2866_v61 = vor.u32 %v2865_v56, %v2862_v6  ;;  %v4075_v6 = vrot.slane %v7905_v11, 1  ;;  %v4076_v56 = vrot.slane %v7916_v12, 1 }
 0x27f   : > { %5990 = vmatpush3.bf16.msra.mxu1 %v6721_v4  ;;  %v6739_v4 = vld [vmem:[%s8729_s5 + $0x30] sm:$0xff]  }
 0x280   : > { %6118 = vmatpush3.bf16.msra.mxu0 %v6722_v58  ;;  %5991 = vmatprep.subr.bf16.mxu1 %v6723_v16  ;;  %v6740_v58 = vld [vmem:[%s8729_s5 + $0x170] sm:$0xff]  }
 0x281   : > { %6119 = vmatprep.subr.bf16.mxu0 %v6724_v44 }
 0x283   : > { %5992 = vmatpush3.bf16.msra.mxu1 %v6723_v16  ;;  %v2857_v16 = vor.u32 %v2856_v14, %v2853_v53  ;;  %v6746_v53 = vld [vmem:[%s8729_s5 + $0x188] sm:$0xff]   ;;  %v8068_v14 = vshll.u32 %v7962_v33, 16 }
 0x284   : > { %6120 = vmatpush3.bf16.msra.mxu0 %v6724_v44  ;;  %5993 = vmatprep.subr.bf16.mxu1 %v6725_v26  ;;  %v8013_v44 = vshrl.u32 %v8004_v60, 16 }
 0x285   : > { %6121 = vmatprep.subr.bf16.mxu0 %v6726_v13 }
 0x286   : > { %v4302_v40 = vrot.slane %v8013_v44, 1 }
 0x287   : > { %5994 = vmatpush3.bf16.msra.mxu1 %v6725_v26  ;;  %v2871_v26 = vrot.slane %v7970_v20, 6 }
 0x288   : > { %6122 = vmatpush3.bf16.msra.mxu0 %v6726_v13  ;;  %6011 = vmatprep.subr.bf16.mxu1 %v6727_v29  ;;  %v2874_v13 = vrot.slane %v7975_v15, 7 }
 0x289   : > { %6139 = vmatprep.subr.bf16.mxu0 %v6728_v55 }
 0x28a   : > { %5996 = vmatmul.mubr.bf16.vlgmr.msra.gmra.mrb[0].mxu1 %v2675_v22  ;;  %v8026_v22 = vshll.u32 %v7928_v63, 16  ;;  %v2875_v9 = vor.u32 %v2874_v13, %v2871_v26  ;;  %v4078_v26 = vrot.slane %v7928_v63, 1  ;;  %v3684_v13 = vrot.slane %v8068_v14, 1 }
 0x28b   : > { %6124 = vmatmul.mubr.bf16.vlgmr.msra.gmra.mrb[0].mxu0 %v7905_v11  ;;  %6012 = vmatpush3.bf16.msra.mxu1 %v6727_v29  ;;  %v2687_v29 = vsel %vm145_vm0, %v2684_v51, %v2686_v34  ;;  %v6745_v51 = vld [vmem:[%s8729_s5 + $0x88] sm:$0xff]   ;;  %v8088_v11 = vshrl.u32 %v7962_v33, 16 }
 0x28c   : > { %6140 = vmatpush3.bf16.msra.mxu0 %v6728_v55  ;;  %6013 = vmatprep.subr.bf16.mxu1 %v6729_v8  ;;  %v6741_v55 = vld [vmem:[%s8729_s5 + $0x38] sm:$0xff]   ;;  %v2876_v23 = vsel %vm316_vm1, %v2866_v61, %v2875_v9 }
 0x28d   : > { %6141 = vmatprep.subr.bf16.mxu0 %v6730_v46  ;;  %5999 = vmatprep.mubr.bf16.mxu1 %v2677_v52  ;;  %v2858_v52 = vsel %vm316_vm1, %v2849_v39, %v2857_v16 }
 0x28e   : > { %6127 = vmatprep.mubr.bf16.mxu0 %v7916_v12  ;;  %v6748_v12 = vld [vmem:[%s8729_s5 + $0x190] sm:$0xff]  }
 0x28f   : > { %6014 = vmatpush3.bf16.msra.mxu1 %v6729_v8  ;;  %v8029_v8 = vshll.u32 %v8004_v60, 16 }
 0x290   : > { %6142 = vmatpush3.bf16.msra.mxu0 %v6730_v46  ;;  %6015 = vmatprep.subr.bf16.mxu1 %v6731_v59  ;;  %v6742_v46 = vld [vmem:[%s8729_s5 + $0x178] sm:$0xff]  }
 0x291   : > { %6143 = vmatprep.subr.bf16.mxu0 %v6732_v43 }
 0x292   : > { %6000 = vmatmul.mubr.bf16.gmra.mrb[4].mxu1 %v2679_v3  ;;  %v3678_v3 = vrot.slane %v8026_v22, 1 }
 0x293   : > { %6128 = vmatmul.mubr.bf16.gmra.mrb[4].mxu0 %v7928_v63  ;;  %6016 = vmatpush3.bf16.msra.mxu1 %v6731_v59  ;;  %v8037_v59 = vshll.u32 %v7940_v47, 16 }
 0x294   : > { %6144 = vmatpush3.bf16.msra.mxu0 %v6732_v43  ;;  %6017 = vmatprep.subr.bf16.mxu1 %v6733_v17  ;;  %v3673_v43 = vsel %vm1144_vm2, %v3671_v38, %v3672_v48  ;;  %v8101_v38 = vsel %vm1549_vm5, %v4075_v6, %v4076_v56  ;;  %v4086_v6 = vrot.slane %v8004_v60, 1 }
 0x295   : > { %6145 = vmatprep.subr.bf16.mxu0 %v6734_v50  ;;  %6003 = vmatprep.mubr.bf16.mxu1 %v2681_v57  ;;  %v6743_v57 = vld [vmem:[%s8729_s5 + $0x80] sm:$0xff]   ;;  %v3681_v7 = vrot.slane %v8037_v59, 1  ;;  %v4291_v49 = vrot.slane %v8037_v59, 2 }
 0x296   : > { %6131 = vmatprep.mubr.bf16.mxu0 %v7940_v47 }
 0x297   : > { %6018 = vmatpush3.bf16.msra.mxu1 %v6733_v17  ;;  %v8043_v17 = vshrl.u32 %v7928_v63, 16 }
 0x298   : > { %6146 = vmatpush3.bf16.msra.mxu0 %v6734_v50  ;;  %6019 = vmatprep.subr.bf16.mxu1 %v6735_v30  ;;  %v3674_v50 = vor.u32 %v3672_v48, %v7970_v20  ;;  %v8075_v48 = vshll.u32 %v7987_v1, 16 }
 0x299   : > { %6147 = vmatprep.subr.bf16.mxu0 %v6736_v36  ;;  %v2889_v42 = vrot.slane %v8043_v17, 6  ;;  %v3680_v39 = vor.u32 %v3678_v3, %v8043_v17 }
 0x29a   : > { %6004 = vmatmul.mubr.bf16.gmra.mrb[8].mxu1 %v2683_v32  ;;  %v2892_v32 = vrot.slane %v8026_v22, 7  ;;  %v3687_v63 = vrot.slane %v8075_v48, 1 }
 0x29b   : > { %6132 = vmatmul.mubr.bf16.gmra.mrb[8].mxu0 %v7962_v33  ;;  %6020 = vmatpush3.bf16.msra.mxu1 %v6735_v30  ;;  %v6744_v30 = vld [vmem:[%s8729_s5 + $0x180] sm:$0xff]  }
 0x29c   : > { %6148 = vmatpush3.bf16.msra.mxu0 %v6736_v36  ;;  %6021 = vmatprep.subr.bf16.mxu1 %v6737_v37  ;;  %v3677_v36 = vor.u32 %v3675_v31, %v8018_v10 }
 0x29d   : > { %6149 = vmatprep.subr.bf16.mxu0 %v6738_v2  ;;  %6007 = vmatprep.mubr.bf16.mxu1 %v2685_v18  ;;  %v8071_v18 = vsel %vm1144_vm2, %v3674_v50, %v3675_v31  ;;  %v6747_v31 = vld [vmem:[%s8729_s5 + $0x90] sm:$0xff]   ;;  %v8117_v50 = vsel %vm1144_vm2, %v3680_v39, %v3681_v7 }
 0x29e   : > { %6135 = vmatprep.mubr.bf16.mxu0 %v7987_v1  ;;  %v8079_v34 = vsel %vm1144_vm2, %v3677_v36, %v3678_v3 }
 0x29f   : > { %6022 = vmatpush3.bf16.msra.mxu1 %v6737_v37  ;;  %v2867_v37 = vsel %vm316_vm1, %v2857_v16, %v2866_v61  ;;  %v2893_v16 = vor.u32 %v2892_v32, %v2889_v42  ;;  %v2910_v61 = vrot.slane %v8068_v14, 7  ;;  %v3690_v42 = vrot.slane %v8029_v8, 1 }
 0x2a0   : > { %6150 = vmatpush3.bf16.msra.mxu0 %v6738_v2  ;;  %6023 = vmatprep.subr.bf16.mxu1 %v6739_v4  ;;  %v8065_v2 = vshrl.u32 %v7940_v47, 16 }
 0x2a1   : > { %6151 = vmatprep.subr.bf16.mxu0 %v6740_v58 }
 0x2a2   : > { %6008 = vmatmul.mubr.bf16.gmra.mrb[12].mxu1 %v2687_v29  ;;  %v2898_v29 = vrot.slane %v8065_v2, 6  ;;  %v4290_v35 = vrot.slane %v8065_v2, 1 }
 0x2a3   : > { %6136 = vmatmul.mubr.bf16.gmra.mrb[12].mxu0 %v8004_v60  ;;  %6024 = vmatpush3.bf16.msra.mxu1 %v6739_v4  ;;  %v2884_v4 = vor.u32 %v2883_v54, %v2880_v45  ;;  %v8107_v45 = vsel %vm1549_vm5, %v4076_v56, %v4078_v26  ;;  %v3683_v54 = vor.u32 %v3681_v7, %v8065_v2 }
 0x2a4   : > { %6152 = vmatpush3.bf16.msra.mxu0 %v6740_v58  ;;  %6025 = vmatprep.subr.bf16.mxu1 %v6741_v55  ;;  %v2901_v58 = vrot.slane %v8037_v59, 7 }
 0x2a5   : > { %6153 = vmatprep.subr.bf16.mxu0 %v6742_v46  ;;  %6027 = vmatprep.mubr.bf16.mxu1 %v2858_v52  ;;  %v2907_v52 = vrot.slane %v8088_v11, 6  ;;  %v2894_v36 = vsel %vm316_vm1, %v2884_v4, %v2893_v16 }
 0x2a6   : > { %6155 = vmatprep.mubr.bf16.mxu0 %v3673_v43  ;;  %v2885_v43 = vsel %vm316_vm1, %v2875_v9, %v2884_v4  ;;  %v8124_v9 = vshrl.u32 %v7987_v1, 16  ;;  %v2902_v7 = vor.u32 %v2901_v58, %v2898_v29  ;;  %v8143_v4 = vrot.slane %v2843_v19, 7  ;;  %v6752_v29 = vld [vmem:[%s8729_s5 + $0x1a0] sm:$0xff]  }
 0x2a7   : > { %6026 = vmatpush3.bf16.msra.mxu1 %v6741_v55  ;;  %v8098_v55 = vld [vmem:[%s7870_s12 + $0x50] sm:$0xff]  ;;  %v8139_v56 = vor.u32 %v2910_v61, %v2907_v52  ;;  %v8163_v19 = vsel %vm1144_vm2, %v3683_v54, %v3684_v13  ;;  %v4279_v61 = vrot.slane %v7970_v20, 1  ;;  %v8188_v54 = vor.u32 %v3690_v42, %v8013_v44 }
 0x2a8   : > { %6154 = vmatpush3.bf16.msra.mxu0 %v6742_v46  ;;  %6043 = vmatprep.subr.bf16.mxu1 %v6743_v57  ;;  %v4080_v46 = vrot.slane %v7940_v47, 1  ;;  %v4082_v47 = vrot.slane %v7962_v33, 1  ;;  %v6750_v33 = vld [vmem:[%s8729_s5 + $0x198] sm:$0xff]   ;;  %v3689_v60 = vor.u32 %v3687_v63, %v8124_v9  ;;  %v2916_v58 = vrot.slane %v8124_v9, 6 }
 0x2a9   : > { %6171 = vmatprep.subr.bf16.mxu0 %v6744_v30 }
 0x2aa   : > { %6028 = vmatmul.mubr.bf16.vlgmr.msra.gmra.mrb[0].mxu1 %v2867_v37  ;;  %v8112_v3 = vsel %vm1549_vm5, %v4078_v26, %v4080_v46  ;;  %v8133_v32 = vsel %vm1549_vm5, %v4080_v46, %v4082_v47  ;;  %v4084_v37 = vrot.slane %v7987_v1, 1  ;;  %v8739_v1 = vrot.slane %v8098_v55, 1  ;;  %v8169_v46 = vld [vmem:[%s7870_s12 + $0x58] sm:$0x3] }
 0x2ab   : > { %6156 = vmatmul.mubr.bf16.vlgmr.msra.gmra.mrb[0].mxu0 %v8071_v18  ;;  %6044 = vmatpush3.bf16.msra.mxu1 %v6743_v57  ;;  %v6749_v57 = vld [vmem:[%s8729_s5 + $0x98] sm:$0xff]  }
 0x2ac   : > { %6172 = vmatpush3.bf16.msra.mxu0 %v6744_v30  ;;  %6045 = vmatprep.subr.bf16.mxu1 %v6745_v51  ;;  %v8741_v30 = vshll.u32 %v8098_v55, 16  ;;  %v8146_v39 = vsel %vm1549_vm5, %v4082_v47, %v4084_v37  ;;  %v8159_v62 = vsel %vm1549_vm5, %v4084_v37, %v4086_v6  ;;  %v8174_v52 = vsel %vm1549_vm5, %v4086_v6, %v8739_v1 }
 0x2ad   : > { %6173 = vmatprep.subr.bf16.mxu0 %v6746_v53  ;;  %6031 = vmatprep.mubr.bf16.mxu1 %v2876_v23  ;;  %v3686_v23 = vor.u32 %v3684_v13, %v8088_v11  ;;  %v8182_v13 = vrot.slane %v2851_v24, 7  ;;  %v2912_v47 = vsel %vm316_vm1, %v2902_v7, %v8139_v56  ;;  %v4294_v6 = vrot.slane %v8088_v11, 1 }
 0x2ae   : > { %6159 = vmatprep.mubr.bf16.mxu0 %v8079_v34  ;;  %v8156_v26 = vrot.slane %v8741_v30, 1  ;;  %v4295_v1 = vrot.slane %v8068_v14, 2  ;;  %v4303_v37 = vrot.slane %v8029_v8, 2 }
 0x2af   : > { %6046 = vmatpush3.bf16.msra.mxu1 %v6745_v51  ;;  %v2919_v51 = vrot.slane %v8075_v48, 7 }
 0x2b0   : > { %6174 = vmatpush3.bf16.msra.mxu0 %v6746_v53  ;;  %6047 = vmatprep.subr.bf16.mxu1 %v6747_v31  ;;  %v6751_v53 = vld [vmem:[%s8729_s5 + $0xa0] sm:$0xff]  }
 0x2b1   : > { %6175 = vmatprep.subr.bf16.mxu0 %v6748_v12  ;;  %v2920_v24 = vor.u32 %v2919_v51, %v2916_v58  ;;  %v4298_v51 = vrot.slane %v8124_v9, 1  ;;  %v4286_v58 = vrot.slane %v8043_v17, 1 }
 0x2b2   : > { %6032 = vmatmul.mubr.bf16.gmra.mrb[4].mxu1 %v2885_v43  ;;  %v2903_v43 = vsel %vm316_vm1, %v2893_v16, %v2902_v7  ;;  %v4280_v16 = vrot.slane %v7975_v15, 2 }
 0x2b3   : > { %6160 = vmatmul.mubr.bf16.gmra.mrb[4].mxu0 %v8117_v50  ;;  %6048 = vmatpush3.bf16.msra.mxu1 %v6747_v31  ;;  %v8178_v31 = vsel %vm1144_vm2, %v3686_v23, %v3687_v63  ;;  %v8194_v63 = vsel %vm1144_vm2, %v3689_v60, %v3690_v42  ;;  %v4283_v23 = vrot.slane %v7984_v0, 2  ;;  %v6753_v42 = vld [vmem:[%s8729_s5 + $0xa8] sm:$0xff]   ;;  %v4299_v60 = vrot.slane %v8075_v48, 2 }
 0x2b4   : > { %6176 = vmatpush3.bf16.msra.mxu0 %v6748_v12  ;;  %6049 = vmatprep.subr.bf16.mxu1 %v6749_v57  ;;  %v4281_v7 = vor.u32 %v4280_v16, %v4279_v61  ;;  %v4296_v16 = vor.u32 %v4295_v1, %v4294_v6  ;;  %v8762_v1 = vshrl.u32 %v8098_v55, 16  ;;  %v8763_v6 = vshll.u32 %v8098_v55, 16 }
 0x2b5   : > { %6177 = vmatprep.subr.bf16.mxu0 %v6750_v33  ;;  %6035 = vmatprep.mubr.bf16.mxu1 %v2894_v36  ;;  %v4282_v36 = vrot.slane %v8018_v10, 1  ;;  %v4300_v30 = vor.u32 %v4299_v60, %v4298_v51  ;;  %v6755_v51 = vld [vmem:[%s8729_s5 + $0xb0] sm:$0xff]  }
 0x2b6   : > { %6163 = vmatprep.mubr.bf16.mxu0 %v8163_v19 }
 0x2b7   : > { %6050 = vmatpush3.bf16.msra.mxu1 %v6749_v57  ;;  %v4287_v57 = vrot.slane %v8026_v22, 2  ;;  %v4284_v61 = vor.u32 %v4283_v23, %v4282_v36  ;;  %v4304_v36 = vor.u32 %v4303_v37, %v4302_v40  ;;  %v4306_v23 = vrot.slane %v8762_v1, 1  ;;  %v4503_v37 = vld [vmem:[%s8212_s16] sm:$0xff] }
 0x2b8   : > { %6178 = vmatpush3.bf16.msra.mxu0 %v6750_v33  ;;  %6051 = vmatprep.subr.bf16.mxu1 %v6751_v53  ;;  %v6754_v33 = vld [vmem:[%s8729_s5 + $0x1a8] sm:$0xff]   ;;  %v8233_v60 = vsel %vm1753_vm4, %v4296_v16, %v4300_v30  ;;  %v4310_v40 = vshrl.u32 %v8169_v46, 16  ;;  %v8764_v1 = vshll.u32 %v8169_v46, 16 }
 0x2b9   : > { %6179 = vmatprep.subr.bf16.mxu0 %v6752_v29  ;;  %v4288_v12 = vor.u32 %v4287_v57, %v4286_v58  ;;  %v8223_v21 = vsel %vm1753_vm4, %v4281_v7, %v4284_v61  ;;  %v4292_v7 = vor.u32 %v4291_v49, %v4290_v35  ;;  %v8244_v58 = vsel %vm1753_vm4, %v4300_v30, %v4304_v36 }
 0x2ba   : > { %6036 = vmatmul.mubr.bf16.gmra.mrb[8].mxu1 %v2903_v43  ;;  %v4307_v43 = vrot.slane %v8763_v6, 2  ;;  %v4313_v6 = vrot.slane %v8764_v1, 2  ;;  %v8765_v49 = vshll.u32 %v7876_v28, 16  ;;  %v4312_v27 = vrot.slane %v4310_v40, 1  ;;  %4521 = vperm.xlu0 %6709, %v4503_v37   ;;  %v4505_v28 = vld [vmem:[%s8212_s16 + $0x10] sm:$0xff]  ;;  %v4508_v37 = vld [vmem:[%s8212_s16 + $0x28] sm:$0xff] }
 0x2bb   : > { %6164 = vmatmul.mubr.bf16.gmra.mrb[8].mxu0 %v8178_v31  ;;  %6052 = vmatpush3.bf16.msra.mxu1 %v6751_v53  ;;  %v8236_v53 = vsel %vm1753_vm4, %v4284_v61, %v4288_v12  ;;  %v8256_v61 = vsel %vm1753_vm4, %v4292_v7, %v4296_v16  ;;  %v2921_v30 = vsel %vm316_vm1, %v8139_v56, %v2920_v24  ;;  %v4504_v16 = vld [vmem:[%s8212_s16 + $0x8] sm:$0xff]  ;;  %v3109_v1 = vrot.slane %v8065_v2, 7 }
 0x2bc   : > { %6180 = vmatpush3.bf16.msra.mxu0 %v6752_v29  ;;  %6053 = vmatprep.subr.bf16.mxu1 %v6753_v42  ;;  %v6756_v29 = vld [vmem:[%s8729_s5 + $0x1b0] sm:$0xff]   ;;  %v4308_v57 = vor.u32 %v4307_v43, %v4306_v23  ;;  %v3095_v35 = vor.u32 %v8182_v13, %v8765_v49  ;;  %v3097_v23 = vrot.slane %v7953_v5, 7  ;;  %v4314_v56 = vor.u32 %v4313_v6, %v4312_v27  ;;  %v6758_v5 = vld [vmem:[%s8729_s5 + $0x1b8] sm:$0xff]  }
 0x2bd   : > { %6181 = vmatprep.subr.bf16.mxu0 %v6754_v33  ;;  %6039 = vmatprep.mubr.bf16.mxu1 %v2912_v47  ;;  %v8253_v47 = vsel %vm1753_vm4, %v4288_v12, %v4292_v7  ;;  %v8268_v12 = vsel %vm1144_vm2, %v8188_v54, %v8156_v26  ;;  %v4507_v7 = vld [vmem:[%s8212_s16 + $0x20] sm:$0xff]  ;;  %v4510_v6 = vld [vmem:[%s8212_s16 + $0x38] sm:$0xff]  ;;  %v3112_v2 = vrot.slane %v8088_v11, 7 }
 0x2be   : > { %6167 = vmatprep.mubr.bf16.mxu0 %v8194_v63  ;;  %v8262_v43 = vsel %vm1753_vm4, %v4304_v36, %v4308_v57  ;;  %v3096_v24 = vsel %vm567_vm3, %v8143_v4, %v3095_v35  ;;  %v8280_v54 = vsel %vm1753_vm4, %v4308_v57, %v4314_v56  ;;  %4531 = vperm.xlu1 %6710, %v4505_v28   ;;  %v4506_v4 = vld [vmem:[%s8212_s16 + $0x18] sm:$0xff]  ;;  %v4509_v57 = vld [vmem:[%s8212_s16 + $0x30] sm:$0xff]  ;;  %v4512_v28 = vld [vmem:[%s8212_s16 + $0x48] sm:$0xff] }
 0x2bf   : > { %6054 = vmatpush3.bf16.msra.mxu1 %v6753_v42  ;;  %v6757_v42 = vld [vmem:[%s8729_s5 + $0xb8] sm:$0xff]   ;;  %v3098_v27 = vor.u32 %v3097_v23, %v7959_v25  ;;  %4526 = vperm.xlu0 %6709, %v4504_v16   ;;  %v3110_v35 = vor.u32 %v3109_v1, %v8037_v59  ;;  %v6768_v11 = vld [vmem:[%s8729_s5 + $0x1e0] sm:$0xff]   ;;  %v3113_v59 = vor.u32 %v3112_v2, %v8068_v14  ;;  %v4513_v56 = vld [vmem:[%s8212_s16 + $0x50] sm:$0xff]  ;;  %v8766_v16 = vshrl.u32 %v8098_v55, 16 }
 0x2c0   : > { %6182 = vmatpush3.bf16.msra.mxu0 %v6754_v33  ;;  %6055 = vmatprep.subr.bf16.mxu1 %v6755_v51  ;;  %v3100_v33 = vrot.slane %v7970_v20, 7  ;;  %v6760_v20 = vld [vmem:[%s8729_s5 + $0x1c0] sm:$0xff]   ;;  %v6765_v49 = vld [vmem:[%s8729_s5 + $0xd8] sm:$0xff]   ;;  %v6770_v14 = vld [vmem:[%s8729_s5 + $0x1e8] sm:$0xff]  }
 0x2c1   : > { %6183 = vmatprep.subr.bf16.mxu0 %v6756_v29  ;;  %v8296_v25 = vsel %vm567_vm3, %v8182_v13, %v3098_v27  ;;  %v6771_v27 = vld [vmem:[%s8729_s5 + $0xf0] sm:$0xff]  }
 0x2c2   : > { %6040 = vmatmul.mubr.bf16.gmra.mrb[12].mxu1 %v2921_v30  ;;  %v3101_v36 = vor.u32 %v3100_v33, %v7975_v15  ;;  %4536 = vperm.xlu1 %6710, %v4506_v4   ;;  %v6762_v15 = vld [vmem:[%s8729_s5 + $0x1c8] sm:$0xff]   ;;  %v4511_v30 = vld [vmem:[%s8212_s16 + $0x40] sm:$0xff]  ;;  %v8767_v4 = vshll.u32 %v8169_v46, 16 }
 0x2c3   : > { %6168 = vmatmul.mubr.bf16.gmra.mrb[12].mxu0 %v8268_v12  ;;  %6056 = vmatpush3.bf16.msra.mxu1 %v6755_v51  ;;  %v3103_v51 = vrot.slane %v8018_v10, 7  ;;  %v3106_v10 = vrot.slane %v8043_v17, 7  ;;  %v6764_v17 = vld [vmem:[%s8729_s5 + $0x1d0] sm:$0xff]  }
 0x2c4   : > { %6184 = vmatpush3.bf16.msra.mxu0 %v6756_v29  ;;  %6057 = vmatprep.subr.bf16.mxu1 %v6757_v42  ;;  %v8308_v13 = vsel %vm567_vm3, %v3097_v23, %v3101_v36  ;;  %v6763_v29 = vld [vmem:[%s8729_s5 + $0xd0] sm:$0xff]   ;;  %v6767_v23 = vld [vmem:[%s8729_s5 + $0xe0] sm:$0xff]  }
 0x2c5   : > { %6185 = vmatprep.subr.bf16.mxu0 %v6758_v5  ;;  %6059 = vmatprep.mubr.bf16.mxu1 %v3096_v24  ;;  %v3104_v40 = vor.u32 %v3103_v51, %v7984_v0  ;;  %v3107_v0 = vor.u32 %v3106_v10, %v8026_v22  ;;  %v6766_v22 = vld [vmem:[%s8729_s5 + $0x1d8] sm:$0xff]  }
 0x2c6   : > { %6187 = vmatprep.mubr.bf16.mxu0 %v8071_v18  ;;  %v6761_v18 = vld [vmem:[%s8729_s5 + $0xc8] sm:$0xff]   ;;  %4541 = vperm.xlu0 %6709, %v4507_v7   ;;  %v6773_v7 = vld [vmem:[%s8729_s5 + $0xf8] sm:$0xff]  }
 0x2c7   : > { %6058 = vmatpush3.bf16.msra.mxu1 %v6757_v42  ;;  %4546 = vperm.xlu1 %6710, %v4508_v37   ;;  %v3115_v42 = vrot.slane %v8124_v9, 7 }
 0x2c8   : > { %6186 = vmatpush3.bf16.msra.mxu0 %v6758_v5  ;;  %6075 = vmatprep.subr.bf16.mxu1 %v6759_v41  ;;  %v6769_v5 = vld [vmem:[%s8729_s5 + $0xe8] sm:$0xff]  }
 0x2c9   : > { %6203 = vmatprep.subr.bf16.mxu0 %v6760_v20  ;;  %v3116_v24 = vor.u32 %v3115_v42, %v8075_v48  ;;  %v6772_v48 = vld [vmem:[%s8729_s5 + $0x1f0] sm:$0xff]  }
 0x2ca   : > { %6060 = vmatmul.mubr.bf16.vlgmr.msra.gmra.mrb[0].mxu1 %v8296_v25  ;;  %4551 = vperm.xlu0 %6709, %v4509_v57  }
 0x2cb   : > { %6188 = vmatmul.mubr.bf16.vlgmr.msra.gmra.mrb[0].mxu0 %v8079_v34  ;;  %6076 = vmatpush3.bf16.msra.mxu1 %v6759_v41  ;;  %v8325_v34 = vsel %vm567_vm3, %v3100_v33, %v3104_v40  ;;  %v4514_v33 = vld [vmem:[%s8212_s16 + $0x58] sm:$0xff]  ;;  %v3886_v41 = vor.u32 %v8766_v16, %v8156_v26  ;;  %v8388_v36 = vsel %vm567_vm3, %v3112_v2, %v3116_v24  ;;  %v4516_v26 = vld [vmem:[%s8212_s16 + $0x68] sm:$0xff] }
 0x2cc   : > { %6204 = vmatpush3.bf16.msra.mxu0 %v6760_v20  ;;  %6077 = vmatprep.subr.bf16.mxu1 %v6761_v18  ;;  %v4515_v20 = vld [vmem:[%s8212_s16 + $0x60] sm:$0xff]  ;;  %v6776_v40 = vld [vmem:[%s8729_s5 + $0x208] sm:$0xff]  }
 0x2cd   : > { %6205 = vmatprep.subr.bf16.mxu0 %v6762_v15  ;;  %6063 = vmatprep.mubr.bf16.mxu1 %v8308_v13 }
 0x2ce   : > { %6191 = vmatprep.mubr.bf16.mxu0 %v8117_v50  ;;  %v8337_v50 = vsel %vm567_vm3, %v3103_v51, %v3107_v0  ;;  %4556 = vperm.xlu1 %6710, %v4510_v6  }
 0x2cf   : > { %6078 = vmatpush3.bf16.msra.mxu1 %v6761_v18  ;;  %4561 = vperm.xlu0 %6709, %v4511_v30   ;;  %v4517_v18 = vld [vmem:[%s8212_s16 + $0x70] sm:$0xff] }
 0x2d0   : > { %6206 = vmatpush3.bf16.msra.mxu0 %v6762_v15  ;;  %6079 = vmatprep.subr.bf16.mxu1 %v6763_v29  ;;  %v6775_v15 = vld [vmem:[%s8729_s5 + $0x200] sm:$0xff]  }
 0x2d1   : > { %6207 = vmatprep.subr.bf16.mxu0 %v6764_v17 }
 0x2d2   : > { %6064 = vmatmul.mubr.bf16.gmra.mrb[4].mxu1 %v8325_v34  ;;  %4566 = vperm.xlu1 %6710, %v4512_v28  }
 0x2d3   : > { %6192 = vmatmul.mubr.bf16.gmra.mrb[4].mxu0 %v8163_v19  ;;  %6080 = vmatpush3.bf16.msra.mxu1 %v6763_v29  ;;  %v8354_v19 = vsel %vm567_vm3, %v3106_v10, %v3110_v35  ;;  %v4518_v10 = vld [vmem:[%s8212_s16 + $0x78] sm:$0xff] }
 0x2d4   : > { %6208 = vmatpush3.bf16.msra.mxu0 %v6764_v17  ;;  %6081 = vmatprep.subr.bf16.mxu1 %v6765_v49 }
 0x2d5   : > { %6209 = vmatprep.subr.bf16.mxu0 %v6766_v22  ;;  %6067 = vmatprep.mubr.bf16.mxu1 %v8337_v50 }
 0x2d6   : > { %6195 = vmatprep.mubr.bf16.mxu0 %v8178_v31  ;;  %v8366_v31 = vsel %vm567_vm3, %v3109_v1, %v3113_v59  ;;  %4571 = vperm.xlu0 %6709, %v4513_v56  }
 0x2d7   : > { %6082 = vmatpush3.bf16.msra.mxu1 %v6765_v49  ;;  %4576 = vperm.xlu1 %6710, %v4514_v33  }
 0x2d8   : > { %6210 = vmatpush3.bf16.msra.mxu0 %v6766_v22  ;;  %6083 = vmatprep.subr.bf16.mxu1 %v6767_v23 }
 0x2d9   : > { %6211 = vmatprep.subr.bf16.mxu0 %v6768_v11 }
 0x2da   : > { %6068 = vmatmul.mubr.bf16.gmra.mrb[8].mxu1 %v8354_v19  ;;  %4581 = vperm.xlu0 %6709, %v4515_v20  }
 0x2db   : > { %6196 = vmatmul.mubr.bf16.gmra.mrb[8].mxu0 %v8194_v63  ;;  %6084 = vmatpush3.bf16.msra.mxu1 %v6767_v23  ;;  %v3890_v63 = vrot.slane %v8767_v4, 1 }
 0x2dc   : > { %6212 = vmatpush3.bf16.msra.mxu0 %v6768_v11  ;;  %6085 = vmatprep.subr.bf16.mxu1 %v6769_v5 }
 0x2dd   : > { %6213 = vmatprep.subr.bf16.mxu0 %v6770_v14  ;;  %6071 = vmatprep.mubr.bf16.mxu1 %v8366_v31  ;;  %v3891_v51 = vsel %vm1144_vm2, %v3886_v41, %v3890_v63 }
 0x2de   : > { %6199 = vmatprep.mubr.bf16.mxu0 %v8268_v12  ;;  %v6774_v12 = vld [vmem:[%s8729_s5 + $0x1f8] sm:$0xff]   ;;  %4586 = vperm.xlu1 %6710, %v4516_v26  }
 0x2df   : > { %6086 = vmatpush3.bf16.msra.mxu1 %v6769_v5  ;;  %4591 = vperm.xlu0 %6709, %v4517_v18  }
 0x2e0   : > { %6214 = vmatpush3.bf16.msra.mxu0 %v6770_v14  ;;  %6087 = vmatprep.subr.bf16.mxu1 %v6771_v27 }
 0x2e1   : > { %6215 = vmatprep.subr.bf16.mxu0 %v6772_v48 }
 0x2e2   : > { %6072 = vmatmul.mubr.bf16.gmra.mrb[12].mxu1 %v8388_v36  ;;  %4596 = vperm.xlu1 %6710, %v4518_v10  }
 0x2e3   : > { %6200 = vmatmul.mubr.bf16.gmra.mrb[12].mxu0 %v3891_v51  ;;  %6088 = vmatpush3.bf16.msra.mxu1 %v6771_v27 }
 0x2e4   : > { %6216 = vmatpush3.bf16.msra.mxu0 %v6772_v48  ;;  %6089 = vmatprep.subr.bf16.mxu1 %v6773_v7 }
 0x2e5   : > { %6217 = vmatprep.subr.bf16.mxu0 %v6774_v12  ;;  %6091 = vmatprep.mubr.bf16.mxu1 %v8296_v25  ;;  %v6778_v25 = vld [vmem:[%s8729_s5 + $0x218] sm:$0xff]  }
 0x2e6   : > { %6219 = vmatprep.mubr.bf16.mxu0 %v8101_v38  ;;  %v6777_v38 = vld [vmem:[%s8729_s5 + $0x210] sm:$0xff]  }
 0x2e7   : > { %6090 = vmatpush3.bf16.msra.mxu1 %v6773_v7 }
 0x2e8   : > { %6218 = vmatpush3.bf16.msra.mxu0 %v6774_v12  ;;  %6395 = vmatprep.subr.bf16.mxu1 %v6775_v15 }
 0x2e9   : > { %6235 = vmatprep.subr.bf16.mxu0 %v6775_v15 }
 0x2ea   : > { %6092 = vmatmul.mubr.bf16.vlgmr.msra.gmra.mrb[0].mxu1 %v8308_v13 }
 0x2eb   : > { %6220 = vmatmul.mubr.bf16.vlgmr.msra.gmra.mrb[0].mxu0 %v8107_v45  ;;  %6403 = vmatpush3.bf16.msra.mxu1 %v6775_v15  ;;  %v6779_v45 = vld [vmem:[%s8729_s5 + $0x220] sm:$0xff]  }
 0x2ec   : > { %6236 = vmatpush3.bf16.msra.mxu0 %v6775_v15  ;;  %6396 = vmatprep.subr.bf16.mxu1 %v6776_v40 }
 0x2ed   : > { %6237 = vmatprep.subr.bf16.mxu0 %v6776_v40  ;;  %6095 = vmatprep.mubr.bf16.mxu1 %v8325_v34 }
 0x2ee   : > { %6223 = vmatprep.mubr.bf16.mxu0 %v8112_v3  ;;  %v3307_v3 = vrot.slane %v8013_v44, 7  ;;  %v6781_v44 = vld [vmem:[%s8729_s5 + $0x230] sm:$0xff]  }
 0x2ef   : > { %6404 = vmatpush3.bf16.msra.mxu1 %v6776_v40 }
 0x2f0   : > { %6238 = vmatpush3.bf16.msra.mxu0 %v6776_v40  ;;  %6397 = vmatprep.subr.bf16.mxu1 %v6777_v38  ;;  %v3310_v13 = vor.u32 %v8029_v8, %v3307_v3  ;;  %v8768_v8 = vrot.slane %v8098_v55, 1 }
 0x2f1   : > { %6239 = vmatprep.subr.bf16.mxu0 %v6777_v38 }
 0x2f2   : > { %6096 = vmatmul.mubr.bf16.gmra.mrb[4].mxu1 %v8337_v50 }
 0x2f3   : > { %6224 = vmatmul.mubr.bf16.gmra.mrb[4].mxu0 %v8133_v32  ;;  %6405 = vmatpush3.bf16.msra.mxu1 %v6777_v38  ;;  %v6780_v32 = vld [vmem:[%s8729_s5 + $0x228] sm:$0xff]  }
 0x2f4   : > { %6240 = vmatpush3.bf16.msra.mxu0 %v6777_v38  ;;  %6398 = vmatprep.subr.bf16.mxu1 %v6778_v25 }
 0x2f5   : > { %6241 = vmatprep.subr.bf16.mxu0 %v6778_v25  ;;  %6099 = vmatprep.mubr.bf16.mxu1 %v8354_v19 }
 0x2f6   : > { %6227 = vmatprep.mubr.bf16.mxu0 %v8146_v39  ;;  %v4090_v39 = vrot.slane %v8169_v46, 1  ;;  %v6782_v46 = vld [vmem:[%s8729_s5 + $0x238] sm:$0xff]  }
 0x2f7   : > { %6406 = vmatpush3.bf16.msra.mxu1 %v6778_v25 }
 0x2f8   : > { %6242 = vmatpush3.bf16.msra.mxu0 %v6778_v25  ;;  %6399 = vmatprep.subr.bf16.mxu1 %v6779_v45  ;;  %v4091_v37 = vsel %vm1549_vm5, %v8768_v8, %v4090_v39 }
 0x2f9   : > { %6243 = vmatprep.subr.bf16.mxu0 %v6779_v45 }
 0x2fa   : > { %6100 = vmatmul.mubr.bf16.gmra.mrb[8].mxu1 %v8366_v31 }
 0x2fb   : > { %6228 = vmatmul.mubr.bf16.gmra.mrb[8].mxu0 %v8159_v62  ;;  %6407 = vmatpush3.bf16.msra.mxu1 %v6779_v45  ;;  %v3311_v62 = vsel %vm567_vm3, %v3115_v42, %v3310_v13 }
 0x2fc   : > { %6244 = vmatpush3.bf16.msra.mxu0 %v6779_v45  ;;  %6400 = vmatprep.subr.bf16.mxu1 %v6780_v32 }
 0x2fd   : > { %6245 = vmatprep.subr.bf16.mxu0 %v6780_v32  ;;  %6103 = vmatprep.mubr.bf16.mxu1 %v8388_v36 }
 0x2fe   : > { %6231 = vmatprep.mubr.bf16.mxu0 %v8174_v52 }
 0x2ff   : > { %6408 = vmatpush3.bf16.msra.mxu1 %v6780_v32 }
 0x300   : > { %6246 = vmatpush3.bf16.msra.mxu0 %v6780_v32  ;;  %6401 = vmatprep.subr.bf16.mxu1 %v6781_v44 }
 0x301   : > { %6247 = vmatprep.subr.bf16.mxu0 %v6781_v44 }
 0x302   : > { %6104 = vmatmul.mubr.bf16.gmra.mrb[12].mxu1 %v3311_v62 }
 0x303   : > { %6232 = vmatmul.mubr.bf16.gmra.mrb[12].mxu0 %v4091_v37  ;;  %6409 = vmatpush3.bf16.msra.mxu1 %v6781_v44 }
 0x304   : > { %6248 = vmatpush3.bf16.msra.mxu0 %v6781_v44  ;;  %6402 = vmatprep.subr.bf16.mxu1 %v6782_v46 }
 0x305   : > { %6249 = vmatprep.subr.bf16.mxu0 %v6782_v46  ;;  %6251 = vmatprep.mubr.bf16.mxu0 %v8223_v21 }
 0x306   : > { %6259 = vmatprep.mubr.bf16.mxu1 %v8233_v60 }
 0x307   : > { %6410 = vmatpush3.bf16.msra.mxu1 %v6782_v46 }
 0x308   : > { %6250 = vmatpush3.bf16.msra.mxu0 %v6782_v46 }
 0x30a   : > { %6260 = vmatmul.mubr.bf16.vlgmr.msra.gmra.mrb[16].mxu1 %v8244_v58 }
 0x30b   : > { %6252 = vmatmul.mubr.bf16.vlgmr.msra.gmra.mrb[0].mxu0 %v8236_v53  ;;  %6263 = vmatprep.mubr.bf16.mxu1 %v8262_v43 }
 0x30c   : > { %6255 = vmatprep.mubr.bf16.mxu0 %v8253_v47 }
 0x312   : > { %6264 = vmatmul.mubr.bf16.gmra.mrb[20].mxu1 %v8280_v54 }
 0x313   : > { %6256 = vmatmul.mubr.bf16.gmra.mrb[4].mxu0 %v8256_v61 }
 0x339   : > { %v4522_v53 = vpop.permute.xlu0 %4521 }
 0x33d   : > { %v4532_v43 = vpop.permute.xlu1 %4531 }
 0x33e   : > { %v4527_v35 = vpop.permute.xlu0 %4526 }
 0x341   : > { %v4537_v30 = vpop.permute.xlu1 %4536 }
 0x345   : > { %v4542_v27 = vpop.permute.xlu0 %4541 }
 0x346   : > { %v8466_v16 = vpop.permute.xlu1 %4546 }
 0x349   : > { %v4552_v3 = vpop.permute.xlu0 %4551 }
 0x34d   : > { %v4557_v39 = vpop.permute.xlu1 %4556 }
 0x3bd   : > { %v6093_v55 = vpop.f32.mrb[0].mxu1 }
 0x3be   : > { %v3395_v9 = vpop.f32.mrb[1].mxu1 }
 0x3bf   : > { %v6094_v52 = vpop.f32.mrb[2].mxu1 }
 0x3c0   : > { %v3398_v21 = vpop.f32.mrb[3].mxu1 }
 0x3c5   : > { %v8456_v29 = vpop.f32.mrb[4].mxu1 }
 0x3c6   : > { %v8458_v60 = vpop.f32.mrb[5].mxu1 }
 0x3c7   : > { %v8460_v57 = vpop.f32.mrb[6].mxu1 }
 0x3c8   : > { %v8462_v58 = vpop.f32.mrb[7].mxu1 }
 0x3cd   : > { %v6101_v17 = vpop.f32.mrb[8].mxu1 }
 0x3ce   : > { %v6229_v47 = vpop.f32.mrb[8].mxu0  ;;  %v3427_v0 = vpop.f32.mrb[9].mxu1 }
 0x3cf   : > { %v6419_v54 = vadd.f32 %v6229_v47, %v6101_v17  ;;  %v4214_v34 = vpop.f32.mrb[9].mxu0  ;;  %v6102_v61 = vpop.f32.mrb[10].mxu1 }
 0x3d0   : > { %v6421_v1 = vadd.f32 %v4214_v34, %v3427_v0  ;;  %v6230_v6 = vpop.f32.mrb[10].mxu0  ;;  %v3430_v49 = vpop.f32.mrb[11].mxu1 }
 0x3d1   : > { %v6423_v22 = vadd.f32 %v6230_v6, %v6102_v61  ;;  %v4217_v50 = vpop.f32.mrb[11].mxu0 }
 0x3d2   : > { %v6425_v2 = vadd.f32 %v4217_v50, %v3430_v49 }
 0x3d5   : > { %v6105_v23 = vpop.f32.mrb[12].mxu1 }
 0x3d6   : > { %v6233_v28 = vpop.f32.mrb[12].mxu0  ;;  %v3443_v11 = vpop.f32.mrb[13].mxu1 }
 0x3d7   : > { %v6427_v59 = vadd.f32 %v6233_v28, %v6105_v23  ;;  %v4230_v19 = vpop.f32.mrb[13].mxu0  ;;  %v6106_v42 = vpop.f32.mrb[14].mxu1 }
 0x3d8   : > { %v6429_v56 = vadd.f32 %v4230_v19, %v3443_v11  ;;  %v6234_v5 = vpop.f32.mrb[14].mxu0  ;;  %v3446_v14 = vpop.f32.mrb[15].mxu1 }
 0x3d9   : > { %v6431_v31 = vadd.f32 %v6234_v5, %v6106_v42  ;;  %v4233_v24 = vpop.f32.mrb[15].mxu0 }
 0x3da   : > { %v8464_v33 = vadd.f32 %v4233_v24, %v3446_v14 }
 0x3dd   : > { %v6261_v41 = vpop.f32.mrb[16].mxu1 }
 0x3de   : > { %v6253_v4 = vpop.f32.mrb[0].mxu0  ;;  %v8468_v63 = vadd.f32 %v6419_v54, %v6261_v41  ;;  %v4438_v20 = vpop.f32.mrb[17].mxu1 }
 0x3df   : > { %v6411_v48 = vadd.f32 %v6253_v4, %v6093_v55  ;;  %v4406_v36 = vpop.f32.mrb[1].mxu0  ;;  %v8470_v26 = vadd.f32 %v6421_v1, %v4438_v20  ;;  %v6262_v51 = vpop.f32.mrb[18].mxu1 }
 0x3e0   : > { %4496 = vst [vmem:[%s8473_s28 + $0x50] sm:$0xff] %v8468_v63  ;;  %v6412_v7 = vadd.f32 %v4406_v36, %v3395_v9  ;;  %v6254_v12 = vpop.f32.mrb[2].mxu0  ;;  %v8477_v18 = vadd.f32 %v6423_v22, %v6262_v51  ;;  %v4441_v15 = vpop.f32.mrb[19].mxu1 }
 0x3e1   : > { %4488 = vst [vmem:[%s8473_s28 + $0x10] sm:$0xff] %v6411_v48  ;;  %4494 = vst [vmem:[%s8473_s28 + $0x40] sm:$0xff] %v8470_v26  ;;  %v6413_v10 = vadd.f32 %v6254_v12, %v6094_v52  ;;  %v4409_v40 = vpop.f32.mrb[3].mxu0  ;;  %v8482_v38 = vadd.f32 %v6425_v2, %v4441_v15  ;;  %v4601_v32 = vmul.f32 %v6411_v48, %v4532_v43 }
 0x3e2   : > { %4486 = vst [vmem:[%s8473_s28] sm:$0xff] %v6412_v7  ;;  %v4599_v25 = vmul.f32 %v6412_v7, %v4522_v53  ;;  %4497 = vst [vmem:[%s8473_s28 + $0x58] sm:$0xff] %v8477_v18  ;;  %v6414_v45 = vadd.f32 %v4409_v40, %v3398_v21 }
 0x3e3   : > { %4489 = vst [vmem:[%s8473_s28 + $0x18] sm:$0xff] %v6413_v10  ;;  %4495 = vst [vmem:[%s8473_s28 + $0x48] sm:$0xff] %v8482_v38  ;;  %v4602_v44 = vmul.f32 %v6413_v10, %v4537_v30  ;;  %v4639_v47 = vmul.f32 %v6411_v48, %v4601_v32  ;;  %v4562_v30 = vpop.permute.xlu0 %4561 }
 0x3e4   : > { %4487 = vst [vmem:[%s8473_s28 + $0x8] sm:$0xff] %v6414_v45  ;;  %v4600_v13 = vmul.f32 %v6414_v45, %v4527_v35  ;;  %v4637_v8 = vmul.f32 %v6412_v7, %v4599_v25 }
 0x3e5   : > { %v6265_v62 = vpop.f32.mrb[20].mxu1  ;;  %v4640_v22 = vmul.f32 %v6413_v10, %v4602_v44 }
 0x3e6   : > { %v4615_v37 = vadd.f32 %v4600_v13, %v4599_v25  ;;  %v4638_v46 = vmul.f32 %v6414_v45, %v4600_v13  ;;  %v6257_v55 = vpop.f32.mrb[4].mxu0  ;;  %v8491_v9 = vadd.f32 %v6427_v59, %v6265_v62  ;;  %v4454_v52 = vpop.f32.mrb[21].mxu1 }
 0x3e7   : > { %v6415_v21 = vadd.f32 %v6257_v55, %v8456_v29  ;;  %v4422_v53 = vpop.f32.mrb[5].mxu0  ;;  %v8494_v17 = vadd.f32 %v6429_v56, %v4454_v52  ;;  %v6266_v43 = vpop.f32.mrb[22].mxu1 }
 0x3e8   : > { %v4616_v0 = vadd.f32 %v4615_v37, %v4601_v32  ;;  %v4653_v54 = vadd.f32 %v4638_v46, %v4637_v8  ;;  %4500 = vst [vmem:[%s8473_s28 + $0x70] sm:$0xff] %v8491_v9  ;;  %v6416_v34 = vadd.f32 %v4422_v53, %v8458_v60  ;;  %v6258_v61 = vpop.f32.mrb[6].mxu0  ;;  %v4457_v1 = vpop.f32.mrb[23].mxu1  ;;  %v8503_v6 = vadd.f32 %v6431_v31, %v6266_v43 }
 0x3e9   : > { %4492 = vst [vmem:[%s8473_s28 + $0x30] sm:$0xff] %v6415_v21  ;;  %4498 = vst [vmem:[%s8473_s28 + $0x60] sm:$0xff] %v8494_v17  ;;  %v6417_v29 = vadd.f32 %v6258_v61, %v8460_v57  ;;  %v4425_v49 = vpop.f32.mrb[7].mxu0  ;;  %v4567_v57 = vpop.permute.xlu1 %4566  ;;  %v6434_v59 = vadd.f32 %v8464_v33, %v4457_v1  ;;  %v4605_v19 = vmul.f32 %v6415_v21, %v4552_v3 }
 0x3ea   : > { %v4654_v50 = vadd.f32 %v4653_v54, %v4639_v47  ;;  %4490 = vst [vmem:[%s8473_s28 + $0x20] sm:$0xff] %v6416_v34  ;;  %v4603_v2 = vmul.f32 %v6416_v34, %v4542_v27  ;;  %v4617_v35 = vadd.f32 %v4616_v0, %v4602_v44  ;;  %4501 = vst [vmem:[%s8473_s28 + $0x78] sm:$0xff] %v8503_v6  ;;  %v4572_v24 = vpop.permute.xlu0 %4571 }
 0x3eb   : > { %4493 = vst [vmem:[%s8473_s28 + $0x38] sm:$0xff] %v6417_v29  ;;  %v6418_v11 = vadd.f32 %v4425_v49, %v8462_v58  ;;  %4499 = vst [vmem:[%s8473_s28 + $0x68] sm:$0xff] %v6434_v59  ;;  %v4606_v5 = vmul.f32 %v6417_v29, %v4557_v39  ;;  %v4607_v27 = vmul.f32 %v8470_v26, %v4562_v30 }
 0x3ec   : > { %v4618_v60 = vadd.f32 %v4617_v35, %v4603_v2  ;;  %v4641_v23 = vmul.f32 %v6416_v34, %v4603_v2  ;;  %v4655_v28 = vadd.f32 %v4654_v50, %v4640_v22  ;;  %v4643_v41 = vmul.f32 %v6415_v21, %v4605_v19 }
 0x3ed   : > { %4491 = vst [vmem:[%s8473_s28 + $0x28] sm:$0xff] %v6418_v11  ;;  %v4604_v56 = vmul.f32 %v6418_v11, %v8466_v16  ;;  %v4577_v48 = vpop.permute.xlu1 %4576  ;;  %v4608_v58 = vmul.f32 %v8482_v38, %v4567_v57  ;;  %v4644_v36 = vmul.f32 %v6417_v29, %v4606_v5  ;;  %v4609_v7 = vmul.f32 %v8468_v63, %v4572_v24 }
 0x3ee   : > { %v4656_v42 = vadd.f32 %v4655_v28, %v4641_v23  ;;  %v4645_v16 = vmul.f32 %v8470_v26, %v4607_v27  ;;  %v4582_v10 = vpop.permute.xlu0 %4581  ;;  %v4610_v40 = vmul.f32 %v8477_v18, %v4577_v48 }
 0x3ef   : > { %v4619_v14 = vadd.f32 %v4618_v60, %v4604_v56  ;;  %v4642_v31 = vmul.f32 %v6418_v11, %v4604_v56  ;;  %v4646_v25 = vmul.f32 %v8482_v38, %v4608_v58  ;;  %v4647_v13 = vmul.f32 %v8468_v63, %v4609_v7  ;;  %v8770_v56 = vld [vmem:[#allocation8_spill] sm:$0xff] }
 0x3f0   : > { %v4611_v39 = vmul.f32 %v8494_v17, %v4582_v10  ;;  %v4648_v8 = vmul.f32 %v8477_v18, %v4610_v40 }
 0x3f1   : > { %v4620_v4 = vadd.f32 %v4619_v14, %v4605_v19  ;;  %v4657_v20 = vadd.f32 %v4656_v42, %v4642_v31  ;;  %v4587_v32 = vpop.permute.xlu1 %4586  ;;  %v8769_v19 = vld [vmem:[#allocation9_spill] sm:$0xff] }
 0x3f2   : > { %v4612_v37 = vmul.f32 %v6434_v59, %v4587_v32  ;;  %v4592_v55 = vpop.permute.xlu0 %4591  ;;  %v4649_v21 = vmul.f32 %v8494_v17, %v4611_v39  ;;  %v8773_v31 = vld [vmem:[#allocation5_spill] sm:$0xff] (%p2605_p2) }
 0x3f3   : > { %v4621_v33 = vadd.f32 %v4620_v4, %v4606_v5  ;;  %v4658_v51 = vadd.f32 %v4657_v20, %v4643_v41  ;;  %v4613_v52 = vmul.f32 %v8491_v9, %v4592_v55  ;;  %v4689_v24 = vmul.f32 (%p2605_p2), 0.001953125, %v8773_v31  ;;  %v8560_v32 = vld [vmem:[%s8734_s10] sm:$0x1] (%p2605_p2) }
 0x3f4   : > { %v4650_v0 = vmul.f32 %v6434_v59, %v4612_v37 }
 0x3f5   : > { %v4622_v12 = vadd.f32 %v4621_v33, %v4607_v27  ;;  %v4659_v15 = vadd.f32 %v4658_v51, %v4644_v36  ;;  %v4597_v43 = vpop.permute.xlu1 %4596  ;;  %v4651_v34 = vmul.f32 %v8491_v9, %v4613_v52  ;;  %v4691_v48 = vmul.f32 (%p2605_p2), %v4689_v24, %v4689_v24 }
 0x3f6   : > { %v4614_v47 = vmul.f32 %v8503_v6, %v4597_v43 }
 0x3f7   : > { %v4660_v45 = vadd.f32 %v4659_v15, %v4645_v16  ;;  %v4623_v3 = vadd.f32 %v4622_v12, %v4608_v58  ;;  %v4675_v12 = vld [vmem:[%s8730_s6] sm:$0x1] (%p2605_p2) }
 0x3f8   : > { %v4652_v1 = vmul.f32 %v8503_v6, %v4614_v47 }
 0x3f9   : > { %v4624_v44 = vadd.f32 %v4623_v3, %v4609_v7  ;;  %v4661_v62 = vadd.f32 %v4660_v45, %v4646_v25  ;;  %v8550_v25 = vld [vmem:[%s8731_s7] sm:$0x1] (%p2605_p2)  ;;  %s8569_s7 = smov (%p2605_p2), 0  }
 0x3fb   : > { %v4625_v26 = vadd.f32 %v4624_v44, %v4610_v40  ;;  %v4662_v46 = vadd.f32 %v4661_v62, %v4647_v13 }
 0x3fd   : > { %v4626_v38 = vadd.f32 %v4625_v26, %v4611_v39  ;;  %v4663_v53 = vadd.f32 %v4662_v46, %v4648_v8 }
 0x3ff   : > { %v4627_v63 = vadd.f32 %v4626_v38, %v4612_v37  ;;  %v4664_v54 = vadd.f32 %v4663_v53, %v4649_v21 }
 0x401   : > { %v4628_v61 = vadd.f32 %v4627_v63, %v4613_v52  ;;  %v4665_v18 = vadd.f32 %v4664_v54, %v4650_v0 }
 0x403   : > { %v4629_v29 = vadd.f32 %v4628_v61, %v4614_v47  ;;  %v4666_v49 = vadd.f32 %v4665_v18, %v4651_v34 }
 0x405   : > { %v4630_v22 = vrot.slane %v4629_v29, 4  ;;  %v4667_v50 = vadd.f32 %v4666_v49, %v4652_v1 }
 0x407   : > { %v4631_v2 = vadd.f32 %v4630_v22, %v4629_v29  ;;  %v4668_v17 = vrot.slane %v4667_v50, 4 }
 0x409   : > { %v4632_v35 = vrot.slane %v4631_v2, 2  ;;  %v4669_v30 = vadd.f32 %v4668_v17, %v4667_v50 }
 0x40b   : > { %v4633_v60 = vadd.f32 %v4632_v35, %v4631_v2  ;;  %v4670_v23 = vrot.slane %v4669_v30, 2 }
 0x40d   : > { %v4634_v28 = vrot.slane %v4633_v60, 1  ;;  %v4671_v11 = vadd.f32 %v4670_v23, %v4669_v30 }
 0x40f   : > { %v4635_v57 = vadd.f32 %v4634_v28, %v4633_v60  ;;  %v4672_v59 = vrot.slane %v4671_v11, 1  ;;  %2607 = sbr.rel (!%p2605_p2) target bundleno = 617 (0x269), region = 143 }
 0x411   : > { %v4636_v9 = vadd.f32 %v8769_v19, %v4635_v57   ;;  %v4673_v42 = vadd.f32 %v4672_v59, %v4671_v11 }
 0x413   : > { %v4674_v5 = vadd.f32 %v8770_v56, %v4673_v42   ;;  %v8772_v41 = vmov %v4636_v9  ;;  %v4677_v6 = vmul.f32 (%p2605_p2), 0.001953125, %v4636_v9 }
 0x414   :  { %v8774_v41 = vld [vmem:[#allocation6_spill] sm:$0xff] (%p2605_p2) }
 0x415   : > { %v8771_v27 = vmov %v4674_v5  ;;  %v4678_v14 = vmul.f32 (%p2605_p2), 0.001953125, %v4674_v5  ;;  %v4690_v4 = vmul.f32 (%p2605_p2), 0.001953125, %v8774_v41  ;;  %v4679_v20 = vmul.f32 (%p2605_p2), %v4677_v6, %v4677_v6 }
 0x416   :  { %v4687_v27 = vld [vmem:[%s8733_s9] sm:$0x1] }
 0x417   :  { %v4680_v58 = vsub.f32 %v4678_v14, %v4679_v20  ;;  %v4692_v36 = vsub.f32 %v4690_v4, %v4691_v48 }
 0x419   :  { %v4681_v33 = vmax.f32 %v4680_v58, 0.0  ;;  %v4693_v51 = vmax.f32 %v4692_v36, 0.0 }
 0x41b   :  { %v4682_v7 = vadd.f32 1e-05, %v4681_v33  ;;  %v4694_v16 = vadd.f32 1e-05, %v4693_v51 }
 0x41d   :  { %6783 = vrsqrt.f32 %v4682_v7 }
 0x41e   :  { %6785 = vrsqrt.f32 %v4694_v16 }
 0x427   :  { %v6784_v15 = vpop.eup %6783 }
 0x428   :  { %v6786_v10 = vpop.eup %6785  ;;  %v8545_v40 = vmul.f32 %v6784_v15, %v4675_v12 }
 0x429   :  { %v8552_v45 = vmul.f32 %v6786_v10, %v4687_v27 }
 0x42a   :  { %v8555_v3 = vmul.f32 %v8545_v40, %v4677_v6 }
 0x42b   :  { %v8563_v13 = vmul.f32 %v8552_v45, %v4689_v24 }
 0x42c   :  { %v4686_v39 = vsub.f32 %v8550_v25, %v8555_v3 }
 0x42d   :  { %v4698_v44 = vsub.f32 %v8560_v32, %v8563_v13 }
 0x42e LB: > { %v8775_v62 = vld [vmem:[#allocation7_spill] sm:$0xff]  ;;  %s8583_s9 = sshll.u32 %s6865_s7, 7  ;;  %s4704_s7 = sadd.s32 1, %s6865_s7   ;;  %s6865_s7 = sphi %s8569_s7, %s4704_s7  }
 0x42f   : > { %v8576_v8 = vrot.slane %v8545_v40, %v8775_v62  ;;  %v8580_v37 = vrot.slane %v8552_v45, %v8775_v62  ;;  %v8589_v26 = vrot.slane %v4686_v39, %v8775_v62  ;;  %v8595_v46 = vrot.slane %v4698_v44, %v8775_v62  ;;  %s8598_s10 = scalar_lea.vmem [#allocation2], %s8583_s9  ;;  %s8602_s13 = scalar_lea.vmem [#allocation4], %s8583_s9 }
 0x430   : > { %v4707_v55 = vld [vmem:[%s8598_s10] sm:$0xff]  ;;  %v4708_v21 = vld [vmem:[%s8598_s10 + $0x8] sm:$0xff]  ;;  %v4709_v63 = vld [vmem:[%s8598_s10 + $0x10] sm:$0xff]  ;;  %s8636_s18 = scalar_lea.vmem %s8735_s11, %s8583_s9  ;;  %p4701_p3 = scmp.ge.s32.totalorder %s4704_s7, 5  }
 0x431   : > { %v4766_v52 = vld [vmem:[%s8602_s13] sm:$0xff]  ;;  %v4727_v38 = vmul.f32 %v8576_v8, %v4707_v55  ;;  %v4728_v43 = vmul.f32 %v8576_v8, %v4708_v21  ;;  %v4767_v47 = vld [vmem:[%s8602_s13 + $0x8] sm:$0xff]  ;;  %v4768_v0 = vld [vmem:[%s8602_s13 + $0x10] sm:$0xff]  ;;  %v4729_v34 = vmul.f32 %v8576_v8, %v4709_v63 }
 0x432   : > { %v4786_v53 = vmul.f32 %v8580_v37, %v4766_v52  ;;  %v4787_v54 = vmul.f32 %v8580_v37, %v4767_v47  ;;  %v4788_v61 = vmul.f32 %v8580_v37, %v4768_v0  ;;  %v4710_v18 = vld [vmem:[%s8598_s10 + $0x18] sm:$0xff]  ;;  %v4711_v29 = vld [vmem:[%s8598_s10 + $0x20] sm:$0xff]  ;;  %v4712_v35 = vld [vmem:[%s8598_s10 + $0x28] sm:$0xff] }
 0x433   : > { %v4769_v1 = vld [vmem:[%s8602_s13 + $0x18] sm:$0xff]  ;;  %v4749_v49 = vadd.f32 %v8589_v26, %v4727_v38  ;;  %v4750_v50 = vadd.f32 %v8589_v26, %v4728_v43  ;;  %v4730_v2 = vmul.f32 %v8576_v8, %v4710_v18  ;;  %v4770_v17 = vld [vmem:[%s8602_s13 + $0x20] sm:$0xff]  ;;  %v4751_v60 = vadd.f32 %v8589_v26, %v4729_v34  ;;  %v4771_v11 = vld [vmem:[%s8602_s13 + $0x28] sm:$0xff] }
 0x434   : > { %v4808_v22 = vadd.f32 %v8595_v46, %v4786_v53  ;;  %v4809_v30 = vadd.f32 %v8595_v46, %v4787_v54  ;;  %v4810_v23 = vadd.f32 %v8595_v46, %v4788_v61  ;;  %v4789_v28 = vmul.f32 %v8580_v37, %v4769_v1  ;;  %v4713_v14 = vld [vmem:[%s8598_s10 + $0x30] sm:$0xff]  ;;  %v4714_v48 = vld [vmem:[%s8598_s10 + $0x38] sm:$0xff]  ;;  %v4715_v36 = vld [vmem:[%s8598_s10 + $0x40] sm:$0xff] }
 0x435   : > { %v4752_v59 = vadd.f32 %v8589_v26, %v4730_v2  ;;  %v4731_v19 = vmul.f32 %v8576_v8, %v4711_v29  ;;  %v4790_v9 = vmul.f32 %v8580_v37, %v4770_v17  ;;  %v4732_v6 = vmul.f32 %v8576_v8, %v4712_v35  ;;  %v4772_v31 = vld [vmem:[%s8602_s13 + $0x30] sm:$0xff]  ;;  %v4773_v58 = vld [vmem:[%s8602_s13 + $0x38] sm:$0xff]  ;;  %v4774_v55 = vld [vmem:[%s8602_s13 + $0x40] sm:$0xff] }
 0x436   : > { %v4824_v57 = vadd.f32 %v4808_v22, %v4749_v49  ;;  %v4825_v42 = vadd.f32 %v4809_v30, %v4750_v50  ;;  %v4826_v56 = vadd.f32 %v4810_v23, %v4751_v60  ;;  %v4811_v5 = vadd.f32 %v8595_v46, %v4789_v28  ;;  %v4716_v43 = vld [vmem:[%s8598_s10 + $0x48] sm:$0xff]  ;;  %v4717_v61 = vld [vmem:[%s8598_s10 + $0x50] sm:$0xff]  ;;  %v4718_v50 = vld [vmem:[%s8598_s10 + $0x58] sm:$0xff] }
 0x437   : > { %v4753_v41 = vadd.f32 %v8589_v26, %v4731_v19  ;;  %v4812_v4 = vadd.f32 %v8595_v46, %v4790_v9  ;;  %v4791_v20 = vmul.f32 %v8580_v37, %v4771_v11  ;;  %v4754_v16 = vadd.f32 %v8589_v26, %v4732_v6  ;;  %v4775_v47 = vld [vmem:[%s8602_s13 + $0x48] sm:$0xff]  ;;  %v4776_v18 = vld [vmem:[%s8602_s13 + $0x50] sm:$0xff] }
 0x438   : > { %v4840_v24 = vmax.f32 %v4824_v57, 0.0  ;;  %v4841_v33 = vmax.f32 %v4825_v42, 0.0  ;;  %v4842_v51 = vmax.f32 %v4826_v56, 0.0  ;;  %v4827_v7 = vadd.f32 %v4811_v5, %v4752_v59  ;;  %v4777_v57 = vld [vmem:[%s8602_s13 + $0x58] sm:$0xff]  ;;  %v4719_v59 = vld [vmem:[%s8598_s10 + $0x60] sm:$0xff]  ;;  %v4720_v6 = vld [vmem:[%s8598_s10 + $0x68] sm:$0xff] }
 0x439   : > { %v4828_v12 = vadd.f32 %v4812_v4, %v4753_v41  ;;  %v4813_v27 = vadd.f32 %v8595_v46, %v4791_v20  ;;  %v4733_v15 = vmul.f32 %v8576_v8, %v4713_v14  ;;  %v4792_v10 = vmul.f32 %v8580_v37, %v4772_v31  ;;  %v4778_v5 = vld [vmem:[%s8602_s13 + $0x60] sm:$0xff]  ;;  %v4779_v4 = vld [vmem:[%s8602_s13 + $0x68] sm:$0xff] }
 0x43a   : > { %4857 = vst [vmem:[%s8636_s18] sm:$0xff] %v4840_v24  ;;  %4858 = vst [vmem:[%s8636_s18 + $0x8] sm:$0xff] %v4841_v33  ;;  %v4843_v52 = vmax.f32 %v4827_v7, 0.0  ;;  %v4734_v21 = vmul.f32 %v8576_v8, %v4714_v48  ;;  %v4793_v38 = vmul.f32 %v8580_v37, %v4773_v58  ;;  %v4735_v53 = vmul.f32 %v8576_v8, %v4715_v36  ;;  %v4721_v33 = vld [vmem:[%s8598_s10 + $0x70] sm:$0xff] }
 0x43b   : > { %4859 = vst [vmem:[%s8636_s18 + $0x10] sm:$0xff] %v4842_v51  ;;  %v4844_v63 = vmax.f32 %v4828_v12, 0.0  ;;  %v4829_v0 = vadd.f32 %v4813_v27, %v4754_v16  ;;  %v4755_v54 = vadd.f32 %v8589_v26, %v4733_v15  ;;  %v4814_v34 = vadd.f32 %v8595_v46, %v4792_v10  ;;  %v4780_v27 = vld [vmem:[%s8602_s13 + $0x70] sm:$0xff]  ;;  %v4722_v15 = vld [vmem:[%s8598_s10 + $0x78] sm:$0xff] }
 0x43c   : > { %4860 = vst [vmem:[%s8636_s18 + $0x18] sm:$0xff] %v4843_v52  ;;  %v4756_v1 = vadd.f32 %v8589_v26, %v4734_v21  ;;  %v4815_v29 = vadd.f32 %v8595_v46, %v4793_v38  ;;  %v4757_v49 = vadd.f32 %v8589_v26, %v4735_v53  ;;  %v4794_v22 = vmul.f32 %v8580_v37, %v4774_v55  ;;  %v4781_v38 = vld [vmem:[%s8602_s13 + $0x78] sm:$0xff] }
 0x43d   : > { %4861 = vst [vmem:[%s8636_s18 + $0x20] sm:$0xff] %v4844_v63  ;;  %v4845_v2 = vmax.f32 %v4829_v0, 0.0  ;;  %v4830_v17 = vadd.f32 %v4814_v34, %v4755_v54  ;;  %v4736_v35 = vmul.f32 %v8576_v8, %v4716_v43  ;;  %v4795_v30 = vmul.f32 %v8580_v37, %v4775_v47 }
 0x43e   : > { %v4831_v60 = vadd.f32 %v4815_v29, %v4756_v1  ;;  %v4816_v23 = vadd.f32 %v8595_v46, %v4794_v22  ;;  %v4737_v28 = vmul.f32 %v8576_v8, %v4717_v61  ;;  %v4796_v11 = vmul.f32 %v8580_v37, %v4776_v18 }
 0x43f   : > { %4862 = vst [vmem:[%s8636_s18 + $0x28] sm:$0xff] %v4845_v2  ;;  %v4846_v19 = vmax.f32 %v4830_v17, 0.0  ;;  %v4758_v9 = vadd.f32 %v8589_v26, %v4736_v35  ;;  %v4817_v42 = vadd.f32 %v8595_v46, %v4795_v30  ;;  %v4738_v56 = vmul.f32 %v8576_v8, %v4718_v50 }
 0x440   : > { %v4847_v14 = vmax.f32 %v4831_v60, 0.0  ;;  %v4832_v31 = vadd.f32 %v4816_v23, %v4757_v49  ;;  %v4759_v24 = vadd.f32 %v8589_v26, %v4737_v28  ;;  %v4818_v41 = vadd.f32 %v8595_v46, %v4796_v11 }
 0x441   : > { %4863 = vst [vmem:[%s8636_s18 + $0x30] sm:$0xff] %v4846_v19  ;;  %v4833_v20 = vadd.f32 %v4817_v42, %v4758_v9  ;;  %v4760_v48 = vadd.f32 %v8589_v26, %v4738_v56  ;;  %v4797_v58 = vmul.f32 %v8580_v37, %v4777_v57  ;;  %v4739_v36 = vmul.f32 %v8576_v8, %v4719_v59 }
 0x442   : > { %4864 = vst [vmem:[%s8636_s18 + $0x38] sm:$0xff] %v4847_v14  ;;  %v4848_v51 = vmax.f32 %v4832_v31, 0.0  ;;  %v4834_v7 = vadd.f32 %v4818_v41, %v4759_v24  ;;  %v4798_v16 = vmul.f32 %v8580_v37, %v4778_v5  ;;  %v4740_v12 = vmul.f32 %v8576_v8, %v4720_v6 }
 0x443   : > { %v4849_v10 = vmax.f32 %v4833_v20, 0.0  ;;  %v4819_v55 = vadd.f32 %v8595_v46, %v4797_v58  ;;  %v4761_v52 = vadd.f32 %v8589_v26, %v4739_v36  ;;  %v4799_v21 = vmul.f32 %v8580_v37, %v4779_v4 }
 0x444   : > { %4865 = vst [vmem:[%s8636_s18 + $0x40] sm:$0xff] %v4848_v51  ;;  %v4850_v53 = vmax.f32 %v4834_v7, 0.0  ;;  %v4820_v43 = vadd.f32 %v8595_v46, %v4798_v16  ;;  %v4762_v47 = vadd.f32 %v8589_v26, %v4740_v12  ;;  %v4741_v63 = vmul.f32 %v8576_v8, %v4721_v33 }
 0x445   : > { %4866 = vst [vmem:[%s8636_s18 + $0x48] sm:$0xff] %v4849_v10  ;;  %v4835_v0 = vadd.f32 %v4819_v55, %v4760_v48  ;;  %v4821_v54 = vadd.f32 %v8595_v46, %v4799_v21  ;;  %v4800_v34 = vmul.f32 %v8580_v37, %v4780_v27  ;;  %v4742_v61 = vmul.f32 %v8576_v8, %v4722_v15 }
 0x446   : > { %4867 = vst [vmem:[%s8636_s18 + $0x50] sm:$0xff] %v4850_v53  ;;  %v4836_v18 = vadd.f32 %v4820_v43, %v4761_v52  ;;  %v4763_v1 = vadd.f32 %v8589_v26, %v4741_v63  ;;  %v4801_v29 = vmul.f32 %v8580_v37, %v4781_v38 }
 0x447   : > { %v4851_v49 = vmax.f32 %v4835_v0, 0.0  ;;  %v4837_v22 = vadd.f32 %v4821_v54, %v4762_v47  ;;  %v4822_v50 = vadd.f32 %v8595_v46, %v4800_v34  ;;  %v4764_v2 = vadd.f32 %v8589_v26, %v4742_v61 }
 0x448   : > { %v4852_v17 = vmax.f32 %v4836_v18, 0.0  ;;  %v4823_v35 = vadd.f32 %v8595_v46, %v4801_v29  ;;  %4703 = sbr.rel (!%p4701_p3) target bundleno = 1070 (0x42e), region = 154 }
 0x449   : > { %4868 = vst [vmem:[%s8636_s18 + $0x58] sm:$0xff] %v4851_v49  ;;  %v4853_v8 = vmax.f32 %v4837_v22, 0.0  ;;  %v4838_v30 = vadd.f32 %v4822_v50, %v4763_v1 }
 0x44a   : > { %4869 = vst [vmem:[%s8636_s18 + $0x60] sm:$0xff] %v4852_v17  ;;  %v4839_v60 = vadd.f32 %v4823_v35, %v4764_v2 }
 0x44b   : > { %4870 = vst [vmem:[%s8636_s18 + $0x68] sm:$0xff] %v4853_v8  ;;  %v4854_v23 = vmax.f32 %v4838_v30, 0.0 }
 0x44c   : > { %v4855_v28 = vmax.f32 %v4839_v60, 0.0 }
 0x44d   : > { %4871 = vst [vmem:[%s8636_s18 + $0x70] sm:$0xff] %v4854_v23 }
 0x44e   : > { %4872 = vst [vmem:[%s8636_s18 + $0x78] sm:$0xff] %v4855_v28 }

</bundles_post_ra>
